<compile_context>
chip_gen: v5e
topology: v5e:2x2
jax: 0.10.0
libtpu: 0.0.40
codegen_flags: <defaults>
</compile_context>

<pallas_src>
import functools
import math

import jax
import jax.numpy as jnp
from jax.experimental import pallas as pl
from jax.experimental.pallas import tpu as pltpu

BN_EPS = 1e-5
LANES = 128
# 32 MiB is safe on every generation (v5e/v6e: 128 MiB physical, 16/32 MiB scoped
# default; v7x: 64 MiB physical per TC).  Re-derive together with the 512-row tile cap
# if channel widths grow: 2 buffers x (x-tile + out-tile) + resident weights < cap.
VMEM_LIMIT = 32 * 1024 * 1024
VMEM_SPEC = pl.BlockSpec(memory_space=pltpu.MemorySpace.VMEM)


# ----------------------------------------------------------------------------
# helpers
# ----------------------------------------------------------------------------
def _pad_up(c, m=LANES):
    return ((c + m - 1) // m) * m


def _round_up(n, m):
    return ((n + m - 1) // m) * m


def _row_tile(n):
    # Split the rows into >=2 grid steps so "parallel" semantics can shard the tiles
    # across v7x's 2 TensorCores; tiles are multiples of 16 rows (bf16 sublane packing)
    # and capped at 512 so x/h/out tiles plus the resident CxC bf16 weights stay inside
    # v7x's 64 MiB VMEM when double-buffered (v5e/v6e have 128 MiB -> 512 is also safe).
    half = (n + 1) // 2
    return min(512, max(16, _round_up(half, 16)))


def _pinned(shape):
    # Constant index_map -> Pallas never re-DMAs these across grid steps.
    # NOTE: pipeline_mode=pl.Buffered(1) would halve their resident VMEM; only relevant
    # once channel widths grow well past 256.
    nd = len(shape)
    return pl.BlockSpec(shape, lambda i: (0,) * nd)


def _grid_params():
    return pltpu.CompilerParams(
        dimension_semantics=("parallel",),   # shard row tiles across v7x's 2 TensorCores
        vmem_limit_bytes=VMEM_LIMIT,
    )


# ----------------------------------------------------------------------------
# Pallas kernels
# ----------------------------------------------------------------------------
def _mm(x, w_bf16):
    # MXU matmul with bf16 inputs, f32 accumulation; skip the cast if already bf16.
    if x.dtype != jnp.bfloat16:
        x = x.astype(jnp.bfloat16)
    return jnp.dot(x, w_bf16, preferred_element_type=jnp.float32)


def _phi_stage_kernel(*refs, has_embed):
    """[init_embed] + ConvBNReLU1D transfer + phi ConvBNReLURes1D, fused per row tile."""
    if has_embed:
        (x_ref, ew_ref, eb_ref, wt_ref, st_ref, tt_ref,
         w1_ref, s1_ref, t1_ref, w2_ref, s2_ref, t2_ref, o_ref) = refs
        # init_embed is Linear(1, C): a K=1 contraction -> VPU broadcast multiply-add.
        x = x_ref[...] * ew_ref[...] + eb_ref[...]
    else:
        (x_ref, wt_ref, st_ref, tt_ref,
         w1_ref, s1_ref, t1_ref, w2_ref, s2_ref, t2_ref, o_ref) = refs
        x = x_ref[...]                                     # bf16 from the previous stage
    # transfer: Linear (+bias folded into tt) + BN + ReLU (f32 scale/shift math)
    h = jnp.maximum(_mm(x, wt_ref[...]) * st_ref[...] + tt_ref[...], 0.0)
    # phi ConvBNReLURes1D (linears are bias-free when bn=True)
    r = jnp.maximum(_mm(h, w1_ref[...]) * s1_ref[...] + t1_ref[...], 0.0)
    r = _mm(r, w2_ref[...]) * s2_ref[...] + t2_ref[...]
    o_ref[...] = (r + h).astype(o_ref.dtype)               # bf16 inter-stage activation


def _res_kernel(x_ref, ps_ref, w1_ref, s1_ref, t1_ref, w2_ref, s2_ref, t2_ref, o_ref):
    """gamma: per-channel pre-scale (norm = alpha/sigma) + ConvBNReLURes1D.

    Max-aggregation commutes with the non-negative per-channel scale, so fusing the
    scale here (instead of scaling every edge message) is exact and removes the scaled
    (m, C) HBM intermediate.
    """
    x = x_ref[...].astype(jnp.float32) * ps_ref[...]
    r = jnp.maximum(_mm(x, w1_ref[...]) * s1_ref[...] + t1_ref[...], 0.0)
    r = _mm(r, w2_ref[...]) * s2_ref[...] + t2_ref[...]
    o_ref[...] = (r + x).astype(o_ref.dtype)


def _classifier_kernel(*refs, n_layers):
    """All classifier (Linear+BN+ReLU+Dropout[eval -> identity]) blocks, fused."""
    x = refs[0][...]
    o_ref = refs[-1]
    for l in range(n_layers):
        w_ref, s_ref, t_ref = refs[1 + 3 * l: 4 + 3 * l]
        x = jnp.maximum(_mm(x, w_ref[...]) * s_ref[...] + t_ref[...], 0.0)
    o_ref[...] = x.astype(o_ref.dtype)


# ----------------------------------------------------------------------------
# pallas_call wrappers (row-tiled grids, weights pinned as block (0,0))
# ----------------------------------------------------------------------------
def phi_stage(x, conv_p, embed_p=None):
    n, cin = x.shape
    cout = conv_p["wt"].shape[1]
    tile = _row_tile(n)
    phi = conv_p["phi"]
    args = [x]
    if embed_p is not None:
        args += [embed_p["ew"], embed_p["eb"]]
    args += [conv_p["wt"], conv_p["st"], conv_p["tt"],
             phi["w1"], phi["s1"], phi["t1"], phi["w2"], phi["s2"], phi["t2"]]
    in_specs = [pl.BlockSpec((tile, cin), lambda i: (i, 0))]
    in_specs += [_pinned(a.shape) for a in args[1:]]
    return pl.pallas_call(
        functools.partial(_phi_stage_kernel, has_embed=embed_p is not None),
        out_shape=jax.ShapeDtypeStruct((n, cout), jnp.bfloat16),
        grid=(pl.cdiv(n, tile),),
        in_specs=in_specs,
        out_specs=pl.BlockSpec((tile, cout), lambda i: (i, 0)),
        compiler_params=_grid_params(),
    )(*args)


def res_stage(x, p, prescale):
    n, c = x.shape
    tile = _row_tile(n)
    args = [x, prescale, p["w1"], p["s1"], p["t1"], p["w2"], p["s2"], p["t2"]]
    in_specs = [pl.BlockSpec((tile, c), lambda i: (i, 0))]
    in_specs += [_pinned(a.shape) for a in args[1:]]
    return pl.pallas_call(
        _res_kernel,
        out_shape=jax.ShapeDtypeStruct((n, c), jnp.bfloat16),
        grid=(pl.cdiv(n, tile),),
        in_specs=in_specs,
        out_specs=pl.BlockSpec((tile, c), lambda i: (i, 0)),
        compiler_params=_grid_params(),
    )(*args)


def classifier_stage(x, layers):
    n = x.shape[0]
    cout = layers[-1]["w"].shape[1]
    args = [x]
    for l in layers:
        args += [l["w"], l["s"], l["t"]]
    return pl.pallas_call(
        functools.partial(_classifier_kernel, n_layers=len(layers)),
        out_shape=jax.ShapeDtypeStruct((n, cout), jnp.float32),
        in_specs=[VMEM_SPEC] * len(args),
        out_specs=VMEM_SPEC,
        compiler_params=pltpu.CompilerParams(vmem_limit_bytes=VMEM_LIMIT),
    )(*args)


# ----------------------------------------------------------------------------
# Parameter construction (deterministic, mimics nn.Module __init__ shapes),
# channel-padded to 128-lane multiples, Linear bias folded into the BN shift.
# NOTE: BN folding assumes fresh running stats (mean=0, var=1, gamma=1, beta=0);
# loading a trained checkpoint requires folding its real running statistics.
# ----------------------------------------------------------------------------
def _init_linear(key, fin, fout, fin_p, fout_p, bias=True):
    kw, kb = jax.random.split(key)
    bound = 1.0 / math.sqrt(fin)
    w = jax.random.uniform(kw, (fin, fout), jnp.float32, -bound, bound)
    w_p = jnp.zeros((fin_p, fout_p), jnp.float32).at[:fin, :fout].set(w)
    if bias:
        b = jax.random.uniform(kb, (fout,), jnp.float32, -bound, bound)
    else:
        b = jnp.zeros((fout,), jnp.float32)
    b_p = jnp.zeros((fout_p,), jnp.float32).at[:fout].set(b)
    return w_p, b_p


def _bn_fold(c, c_p):
    # PyTorch BatchNorm1d eval with fresh stats: gamma=1, beta=0, mean=0, var=1.
    scale = jnp.ones((c,), jnp.float32) / jnp.sqrt(1.0 + BN_EPS)
    shift = jnp.zeros((c,), jnp.float32)
    s = jnp.zeros((c_p,), jnp.float32).at[:c].set(scale)   # padded channels -> exactly 0
    t = jnp.zeros((c_p,), jnp.float32).at[:c].set(shift)
    return s.reshape(1, c_p), t.reshape(1, c_p)


def _init_res_block(key, c, c_p):
    k1, k2 = jax.random.split(key)
    w1, _ = _init_linear(k1, c, c, c_p, c_p, bias=False)   # bias = not bn -> False
    w2, _ = _init_linear(k2, c, c, c_p, c_p, bias=False)
    s1, t1 = _bn_fold(c, c_p)
    s2, t2 = _bn_fold(c, c_p)
    return dict(w1=w1.astype(jnp.bfloat16), s1=s1, t1=t1,
                w2=w2.astype(jnp.bfloat16), s2=s2, t2=t2)


def _init_conv(key, fin, fout):
    fin_p, fout_p = _pad_up(fin), _pad_up(fout)
    k1, k2, k3 = jax.random.split(key, 3)
    wt, bt = _init_linear(k1, fin, fout, fin_p, fout_p, bias=True)
    st, tt = _bn_fold(fout, fout_p)
    tt = bt.reshape(1, fout_p) * st + tt                   # fold Linear bias into BN shift
    alpha = jnp.zeros((fout_p,), jnp.float32).at[:fout].set(1.0)   # beta unused in forward
    return dict(wt=wt.astype(jnp.bfloat16), st=st, tt=tt,
                phi=_init_res_block(k2, fout, fout_p),
                gamma=_init_res_block(k3, fout, fout_p),
                alpha=alpha)


def init_encoder(key, mlp_specs, classifier_specs):
    n_conv = len(mlp_specs) - 1
    n_cls = len(classifier_specs) - 1
    keys = jax.random.split(key, 1 + n_conv + n_cls)
    c0, c0_p = mlp_specs[0], _pad_up(mlp_specs[0])
    ew, eb = _init_linear(keys[0], 1, c0, 1, c0_p, bias=True)      # init_embed: Linear(1, C0)
    embed = dict(ew=ew.reshape(1, c0_p), eb=eb.reshape(1, c0_p))
    convs = [_init_conv(keys[1 + i], mlp_specs[i], mlp_specs[i + 1]) for i in range(n_conv)]
    classifier = []
    for j in range(n_cls):
        fin, fout = classifier_specs[j], classifier_specs[j + 1]
        fin_p, fout_p = _pad_up(fin), _pad_up(fout)
        w, b = _init_linear(keys[1 + n_conv + j], fin, fout, fin_p, fout_p, bias=True)
        s, t = _bn_fold(fout, fout_p)
        t = b.reshape(1, fout_p) * s + t                    # fold bias into shift
        classifier.append(dict(w=w.astype(jnp.bfloat16), s=s, t=t))
    return dict(embed=embed, convs=convs, classifier=classifier)


# ----------------------------------------------------------------------------
# Graph glue (plain JAX): fps, knn (top_k), scatter-max.  Batches are assumed
# contiguous and equal-sized (satisfied by the synthetic input below).
# ----------------------------------------------------------------------------
def fps_equal_batches(pos, num_batches, ratio):
    # TODO(synk): torch_geometric fps uses a random start point (random_start=True);
    # here we deterministically start from the first point of every batch segment.
    n_total = pos.shape[0]
    n = n_total // num_batches
    m = int(math.ceil(ratio * n))
    pos_b = pos.reshape(num_batches, n, 3)

    def one_batch(p):
        def body(i, state):
            sel, dist = state
            last = sel[i - 1]
            d = jnp.sum((p - p[last]) ** 2, axis=-1)
            dist = jnp.minimum(dist, d)
            nxt = jnp.argmax(dist).astype(jnp.int32)
            return sel.at[i].set(nxt), dist

        sel0 = jnp.zeros((m,), jnp.int32)
        dist0 = jnp.full((n,), jnp.inf, jnp.float32)
        sel, _ = jax.lax.fori_loop(1, m, body, (sel0, dist0))
        return sel

    idx_local = jax.vmap(one_batch)(pos_b)                          # (B, m)
    offsets = (jnp.arange(num_batches, dtype=jnp.int32) * n)[:, None]
    return (idx_local + offsets).reshape(-1)


def knn_equal_batches(pos, idx, num_batches, k):
    n_total = pos.shape[0]
    n = n_total // num_batches
    m_total = idx.shape[0]
    m = m_total // num_batches
    q = pos[idx].reshape(num_batches, m, 3)
    p = pos.reshape(num_batches, n, 3)
    # |q - p|^2 = |q|^2 + |p|^2 - 2 q.p : matmul form avoids the (B, m, n, 3) broadcast.
    qq = jnp.sum(q * q, axis=-1)                            # (B, m)
    pp = jnp.sum(p * p, axis=-1)                            # (B, n)
    qp = jnp.einsum("bmd,bnd->bmn", q, p)                   # (B, m, n)
    d = qq[:, :, None] + pp[:, None, :] - 2.0 * qp
    # TODO(synk): for large point counts, tile over m (or move the distance block +
    # k-selection into a Pallas kernel) instead of materializing the full (B, m, n) block.
    _, nn_local = jax.lax.top_k(-d, k)                      # O(n*k) instead of full argsort
    nn_local = nn_local.astype(jnp.int32)
    col = (nn_local + (jnp.arange(num_batches, dtype=jnp.int32) * n)[:, None, None]).reshape(-1)
    row = jnp.repeat(jnp.arange(m_total, dtype=jnp.int32), k)
    return row, col


# ----------------------------------------------------------------------------
# Module forward
# ----------------------------------------------------------------------------
def pointmlp_conv(p, x, pos, batch, num_batches, k, ratio, true_d, embed_p=None):
    # phi = PreBlock (transfer + residual block), fused in one Pallas kernel (bf16 out)
    x = phi_stage(x, p, embed_p)

    n = x.shape[0]
    idx = fps_equal_batches(pos, num_batches, ratio)
    row, col = knn_equal_batches(pos, idx, num_batches, k)

    # Reference semantics: edge_index = [idx[row], col]; messages norm * (x_i - x_j)
    # with x_i = x[col] (edge_index[1], the aggregation target) and x_j = x[idx[row]];
    # max-aggregated at col with dim_size = n, then gathered at idx.  We aggregate the
    # raw differences (bf16) and fold the non-negative per-channel scale norm =
    # alpha / sigma into the gamma kernel afterwards (max commutes with it).
    x_dst = x[idx]                                          # (m, C_p) bf16
    diff = x[col] - x_dst[row]                              # (m*k, C_p) bf16
    # sigma matches the reference: every edge term divided by k * n * d with
    # n = number of INPUT points (x.shape[0]) and d = unpadded feature width.
    var_total = jnp.sum(jnp.square(diff.astype(jnp.float32))) / float(k * n * true_d)
    sigma = jnp.sqrt(jnp.maximum(var_total, 1e-6))
    norm = (p["alpha"] / sigma).reshape(1, -1)              # padded channels stay 0
    # TODO(synk): replace this XLA scatter-max with a Pallas kernel that scalar-prefetches
    # the edge list and keeps the per-tile reduction in VMEM (scatter lowers poorly on TPU);
    # likewise the agg[idx] gather could be fused into the gamma kernel via pl.Element rows.
    agg = jax.ops.segment_max(diff, col, num_segments=n)    # (n, C_p) bf16
    out = agg[idx]                                          # sampled nodes carry a self-edge

    # gamma = PosBlock residual block with the norm pre-scale fused in (one Pallas kernel)
    out = res_stage(out, p["gamma"], norm)
    return out, pos[idx], batch[idx]


@functools.partial(jax.jit,
                   static_argnames=("num_batches", "k", "ratios", "mlp_specs", "out_dim"))
def pointmlp_encoder_forward(params, x, pos, batch, *, num_batches, k, ratios,
                             mlp_specs, out_dim):
    for i, cp in enumerate(params["convs"]):
        embed_p = params["embed"] if i == 0 else None       # init_embed fused into stage 0
        x, pos, batch = pointmlp_conv(cp, x, pos, batch, num_batches, k,
                                      ratios[i], mlp_specs[i + 1], embed_p=embed_p)

    # GlobalPooling: global_max_pool over batch ids
    x = jax.ops.segment_max(x, batch, num_segments=num_batches)

    # classifier: all (Linear + BN + ReLU + Dropout[eval -> identity]) blocks, one kernel
    x = classifier_stage(x, params["classifier"])
    return x[:, :out_dim]                                   # slice off the lane padding


# ----------------------------------------------------------------------------
if __name__ == "__main__":
    # Small config (same structure as the default cfg, scaled down).
    mlp_specs = (32, 64, 128, 256)
    ratio_specs = (0.25, 0.5, 0.5, 0.5)        # only the first len(mlp_specs)-1 are used
    classifier_specs = (256, 128, 64)
    k = 8
    num_batches = 2
    points_per_batch = 128
    n_points = num_batches * points_per_batch

    key = jax.random.PRNGKey(0)
    kp, kx, kpos = jax.random.split(key, 3)
    params = init_encoder(kp, mlp_specs, classifier_specs)

    x = jax.random.normal(kx, (n_points, 1), jnp.float32)        # data.x
    pos = jax.random.normal(kpos, (n_points, 3), jnp.float32)    # data.pos
    batch = jnp.repeat(jnp.arange(num_batches, dtype=jnp.int32), points_per_batch)

    out = pointmlp_encoder_forward(
        params, x, pos, batch,
        num_batches=num_batches, k=k,
        ratios=ratio_specs[:len(mlp_specs) - 1],
        mlp_specs=mlp_specs, out_dim=classifier_specs[-1])
    out = jax.block_until_ready(out)
    assert out.shape == (num_batches, classifier_specs[-1])
    assert bool(jnp.all(jnp.isfinite(out)))
    print("KERNEL_OK")
</pallas_src>

<mosaic_0001>
module attributes {stable_mosaic.version = 11 : i64} {
  func.func @_phi_stage_kernel(%arg0: i32, %arg1: memref<128x1xf32, #tpu.memory_space<vmem>>, %arg2: memref<1x128xf32, #tpu.memory_space<vmem>>, %arg3: memref<1x128xf32, #tpu.memory_space<vmem>>, %arg4: memref<128x128xbf16, #tpu.memory_space<vmem>>, %arg5: memref<1x128xf32, #tpu.memory_space<vmem>>, %arg6: memref<1x128xf32, #tpu.memory_space<vmem>>, %arg7: memref<128x128xbf16, #tpu.memory_space<vmem>>, %arg8: memref<1x128xf32, #tpu.memory_space<vmem>>, %arg9: memref<1x128xf32, #tpu.memory_space<vmem>>, %arg10: memref<128x128xbf16, #tpu.memory_space<vmem>>, %arg11: memref<1x128xf32, #tpu.memory_space<vmem>>, %arg12: memref<1x128xf32, #tpu.memory_space<vmem>>, %arg13: memref<128x128xbf16, #tpu.memory_space<vmem>>) attributes {dimension_semantics = [#tpu.dimension_semantics<parallel>], iteration_bounds = array<i64: 2>, scalar_prefetch = 0 : i64, scratch_operands = 0 : i64, tpu.core_type = #tpu.core_type<tc>, window_params = [{transform_indices = @transform_0, window_bounds = array<i64: 128, 1>}, {pipeline_mode = #tpu.pipeline_mode<synchronous>, transform_indices = @transform_1, window_bounds = array<i64: 1, 128>}, {pipeline_mode = #tpu.pipeline_mode<synchronous>, transform_indices = @transform_2, window_bounds = array<i64: 1, 128>}, {pipeline_mode = #tpu.pipeline_mode<synchronous>, transform_indices = @transform_3, window_bounds = array<i64: 128, 128>}, {pipeline_mode = #tpu.pipeline_mode<synchronous>, transform_indices = @transform_4, window_bounds = array<i64: 1, 128>}, {pipeline_mode = #tpu.pipeline_mode<synchronous>, transform_indices = @transform_5, window_bounds = array<i64: 1, 128>}, {pipeline_mode = #tpu.pipeline_mode<synchronous>, transform_indices = @transform_6, window_bounds = array<i64: 128, 128>}, {pipeline_mode = #tpu.pipeline_mode<synchronous>, transform_indices = @transform_7, window_bounds = array<i64: 1, 128>}, {pipeline_mode = #tpu.pipeline_mode<synchronous>, transform_indices = @transform_8, window_bounds = array<i64: 1, 128>}, {pipeline_mode = #tpu.pipeline_mode<synchronous>, transform_indices = @transform_9, window_bounds = array<i64: 128, 128>}, {pipeline_mode = #tpu.pipeline_mode<synchronous>, transform_indices = @transform_10, window_bounds = array<i64: 1, 128>}, {pipeline_mode = #tpu.pipeline_mode<synchronous>, transform_indices = @transform_11, window_bounds = array<i64: 1, 128>}, {transform_indices = @transform_12, window_bounds = array<i64: 128, 128>}]} {
    %c0 = arith.constant 0 : index
    %c0_0 = arith.constant 0 : index
    %0 = vector.load %arg1[%c0, %c0_0] : memref<128x1xf32, #tpu.memory_space<vmem>>, vector<128x1xf32>
    %c0_1 = arith.constant 0 : index
    %c0_2 = arith.constant 0 : index
    %1 = vector.load %arg2[%c0_1, %c0_2] : memref<1x128xf32, #tpu.memory_space<vmem>>, vector<1x128xf32>
    %2 = vector.broadcast %0 : vector<128x1xf32> to vector<128x128xf32>
    %3 = vector.broadcast %1 : vector<1x128xf32> to vector<128x128xf32>
    %4 = arith.mulf %2, %3 : vector<128x128xf32>
    %c0_3 = arith.constant 0 : index
    %c0_4 = arith.constant 0 : index
    %5 = vector.load %arg3[%c0_3, %c0_4] : memref<1x128xf32, #tpu.memory_space<vmem>>, vector<1x128xf32>
    %6 = vector.broadcast %5 : vector<1x128xf32> to vector<128x128xf32>
    %7 = arith.addf %4, %6 : vector<128x128xf32>
    %c0_5 = arith.constant 0 : index
    %c0_6 = arith.constant 0 : index
    %8 = vector.load %arg4[%c0_5, %c0_6] : memref<128x128xbf16, #tpu.memory_space<vmem>>, vector<128x128xbf16>
    %9 = arith.truncf %7 : vector<128x128xf32> to vector<128x128xbf16>
    %cst = arith.constant dense<0.000000e+00> : vector<128x128xf32>
    %10 = tpu.matmul %9, %8, %cst {dimension_numbers = #tpu.dot_dimension_numbers<[1], [0], [0], [1], [0, 0, 1, 1], [], []>} : vector<128x128xbf16>, vector<128x128xbf16>, vector<128x128xf32> -> vector<128x128xf32>
    %c0_7 = arith.constant 0 : index
    %c0_8 = arith.constant 0 : index
    %11 = vector.load %arg5[%c0_7, %c0_8] : memref<1x128xf32, #tpu.memory_space<vmem>>, vector<1x128xf32>
    %12 = vector.broadcast %11 : vector<1x128xf32> to vector<128x128xf32>
    %13 = arith.mulf %10, %12 : vector<128x128xf32>
    %c0_9 = arith.constant 0 : index
    %c0_10 = arith.constant 0 : index
    %14 = vector.load %arg6[%c0_9, %c0_10] : memref<1x128xf32, #tpu.memory_space<vmem>>, vector<1x128xf32>
    %15 = vector.broadcast %14 : vector<1x128xf32> to vector<128x128xf32>
    %16 = arith.addf %13, %15 : vector<128x128xf32>
    %cst_11 = arith.constant 0.000000e+00 : f32
    %17 = vector.broadcast %cst_11 : f32 to vector<128x128xf32>
    %18 = arith.maximumf %16, %17 : vector<128x128xf32>
    %c0_12 = arith.constant 0 : index
    %c0_13 = arith.constant 0 : index
    %19 = vector.load %arg7[%c0_12, %c0_13] : memref<128x128xbf16, #tpu.memory_space<vmem>>, vector<128x128xbf16>
    %20 = arith.truncf %18 : vector<128x128xf32> to vector<128x128xbf16>
    %cst_14 = arith.constant dense<0.000000e+00> : vector<128x128xf32>
    %21 = tpu.matmul %20, %19, %cst_14 {dimension_numbers = #tpu.dot_dimension_numbers<[1], [0], [0], [1], [0, 0, 1, 1], [], []>} : vector<128x128xbf16>, vector<128x128xbf16>, vector<128x128xf32> -> vector<128x128xf32>
    %c0_15 = arith.constant 0 : index
    %c0_16 = arith.constant 0 : index
    %22 = vector.load %arg8[%c0_15, %c0_16] : memref<1x128xf32, #tpu.memory_space<vmem>>, vector<1x128xf32>
    %23 = vector.broadcast %22 : vector<1x128xf32> to vector<128x128xf32>
    %24 = arith.mulf %21, %23 : vector<128x128xf32>
    %c0_17 = arith.constant 0 : index
    %c0_18 = arith.constant 0 : index
    %25 = vector.load %arg9[%c0_17, %c0_18] : memref<1x128xf32, #tpu.memory_space<vmem>>, vector<1x128xf32>
    %26 = vector.broadcast %25 : vector<1x128xf32> to vector<128x128xf32>
    %27 = arith.addf %24, %26 : vector<128x128xf32>
    %cst_19 = arith.constant 0.000000e+00 : f32
    %28 = vector.broadcast %cst_19 : f32 to vector<128x128xf32>
    %29 = arith.maximumf %27, %28 : vector<128x128xf32>
    %c0_20 = arith.constant 0 : index
    %c0_21 = arith.constant 0 : index
    %30 = vector.load %arg10[%c0_20, %c0_21] : memref<128x128xbf16, #tpu.memory_space<vmem>>, vector<128x128xbf16>
    %31 = arith.truncf %29 : vector<128x128xf32> to vector<128x128xbf16>
    %cst_22 = arith.constant dense<0.000000e+00> : vector<128x128xf32>
    %32 = tpu.matmul %31, %30, %cst_22 {dimension_numbers = #tpu.dot_dimension_numbers<[1], [0], [0], [1], [0, 0, 1, 1], [], []>} : vector<128x128xbf16>, vector<128x128xbf16>, vector<128x128xf32> -> vector<128x128xf32>
    %c0_23 = arith.constant 0 : index
    %c0_24 = arith.constant 0 : index
    %33 = vector.load %arg11[%c0_23, %c0_24] : memref<1x128xf32, #tpu.memory_space<vmem>>, vector<1x128xf32>
    %34 = vector.broadcast %33 : vector<1x128xf32> to vector<128x128xf32>
    %35 = arith.mulf %32, %34 : vector<128x128xf32>
    %c0_25 = arith.constant 0 : index
    %c0_26 = arith.constant 0 : index
    %36 = vector.load %arg12[%c0_25, %c0_26] : memref<1x128xf32, #tpu.memory_space<vmem>>, vector<1x128xf32>
    %37 = vector.broadcast %36 : vector<1x128xf32> to vector<128x128xf32>
    %38 = arith.addf %35, %37 : vector<128x128xf32>
    %39 = arith.addf %38, %18 : vector<128x128xf32>
    %40 = arith.truncf %39 : vector<128x128xf32> to vector<128x128xbf16>
    %c0_27 = arith.constant 0 : index
    %c0_28 = arith.constant 0 : index
    %41 = vector.load %arg13[%c0_27, %c0_28] : memref<128x128xbf16, #tpu.memory_space<vmem>>, vector<128x128xbf16>
    tpu.vector_store %arg13[%c0_27, %c0_28], %40 {strides = array<i32>} : memref<128x128xbf16, #tpu.memory_space<vmem>>, vector<128x128xbf16>,
    return
  }
  func.func @transform_0(%arg0: i32) -> (i32, i32) {
    %c0_i32 = arith.constant 0 : i32
    %c0_i32_0 = arith.constant 0 : i32
    return %arg0, %c0_i32 : i32, i32
  }
  func.func @transform_1(%arg0: i32) -> (i32, i32) {
    %c0_i32 = arith.constant 0 : i32
    %c0_i32_0 = arith.constant 0 : i32
    %c0_i32_1 = arith.constant 0 : i32
    return %c0_i32, %c0_i32_0 : i32, i32
  }
  func.func @transform_2(%arg0: i32) -> (i32, i32) {
    %c0_i32 = arith.constant 0 : i32
    %c0_i32_0 = arith.constant 0 : i32
    %c0_i32_1 = arith.constant 0 : i32
    return %c0_i32, %c0_i32_0 : i32, i32
  }
  func.func @transform_3(%arg0: i32) -> (i32, i32) {
    %c0_i32 = arith.constant 0 : i32
    %c0_i32_0 = arith.constant 0 : i32
    %c0_i32_1 = arith.constant 0 : i32
    return %c0_i32, %c0_i32_0 : i32, i32
  }
  func.func @transform_4(%arg0: i32) -> (i32, i32) {
    %c0_i32 = arith.constant 0 : i32
    %c0_i32_0 = arith.constant 0 : i32
    %c0_i32_1 = arith.constant 0 : i32
    return %c0_i32, %c0_i32_0 : i32, i32
  }
  func.func @transform_5(%arg0: i32) -> (i32, i32) {
    %c0_i32 = arith.constant 0 : i32
    %c0_i32_0 = arith.constant 0 : i32
    %c0_i32_1 = arith.constant 0 : i32
    return %c0_i32, %c0_i32_0 : i32, i32
  }
  func.func @transform_6(%arg0: i32) -> (i32, i32) {
    %c0_i32 = arith.constant 0 : i32
    %c0_i32_0 = arith.constant 0 : i32
    %c0_i32_1 = arith.constant 0 : i32
    return %c0_i32, %c0_i32_0 : i32, i32
  }
  func.func @transform_7(%arg0: i32) -> (i32, i32) {
    %c0_i32 = arith.constant 0 : i32
    %c0_i32_0 = arith.constant 0 : i32
    %c0_i32_1 = arith.constant 0 : i32
    return %c0_i32, %c0_i32_0 : i32, i32
  }
  func.func @transform_8(%arg0: i32) -> (i32, i32) {
    %c0_i32 = arith.constant 0 : i32
    %c0_i32_0 = arith.constant 0 : i32
    %c0_i32_1 = arith.constant 0 : i32
    return %c0_i32, %c0_i32_0 : i32, i32
  }
  func.func @transform_9(%arg0: i32) -> (i32, i32) {
    %c0_i32 = arith.constant 0 : i32
    %c0_i32_0 = arith.constant 0 : i32
    %c0_i32_1 = arith.constant 0 : i32
    return %c0_i32, %c0_i32_0 : i32, i32
  }
  func.func @transform_10(%arg0: i32) -> (i32, i32) {
    %c0_i32 = arith.constant 0 : i32
    %c0_i32_0 = arith.constant 0 : i32
    %c0_i32_1 = arith.constant 0 : i32
    return %c0_i32, %c0_i32_0 : i32, i32
  }
  func.func @transform_11(%arg0: i32) -> (i32, i32) {
    %c0_i32 = arith.constant 0 : i32
    %c0_i32_0 = arith.constant 0 : i32
    %c0_i32_1 = arith.constant 0 : i32
    return %c0_i32, %c0_i32_0 : i32, i32
  }
  func.func @transform_12(%arg0: i32) -> (i32, i32) {
    %c0_i32 = arith.constant 0 : i32
    %c0_i32_0 = arith.constant 0 : i32
    return %arg0, %c0_i32 : i32, i32
  }
}

module attributes {stable_mosaic.version = 11 : i64} {
  func.func @_res_kernel(%arg0: i32, %arg1: memref<32x128xbf16, #tpu.memory_space<vmem>>, %arg2: memref<1x128xf32, #tpu.memory_space<vmem>>, %arg3: memref<128x128xbf16, #tpu.memory_space<vmem>>, %arg4: memref<1x128xf32, #tpu.memory_space<vmem>>, %arg5: memref<1x128xf32, #tpu.memory_space<vmem>>, %arg6: memref<128x128xbf16, #tpu.memory_space<vmem>>, %arg7: memref<1x128xf32, #tpu.memory_space<vmem>>, %arg8: memref<1x128xf32, #tpu.memory_space<vmem>>, %arg9: memref<32x128xbf16, #tpu.memory_space<vmem>>) attributes {dimension_semantics = [#tpu.dimension_semantics<parallel>], iteration_bounds = array<i64: 2>, scalar_prefetch = 0 : i64, scratch_operands = 0 : i64, tpu.core_type = #tpu.core_type<tc>, window_params = [{transform_indices = @transform_0, window_bounds = array<i64: 32, 128>}, {pipeline_mode = #tpu.pipeline_mode<synchronous>, transform_indices = @transform_1, window_bounds = array<i64: 1, 128>}, {pipeline_mode = #tpu.pipeline_mode<synchronous>, transform_indices = @transform_2, window_bounds = array<i64: 128, 128>}, {pipeline_mode = #tpu.pipeline_mode<synchronous>, transform_indices = @transform_3, window_bounds = array<i64: 1, 128>}, {pipeline_mode = #tpu.pipeline_mode<synchronous>, transform_indices = @transform_4, window_bounds = array<i64: 1, 128>}, {pipeline_mode = #tpu.pipeline_mode<synchronous>, transform_indices = @transform_5, window_bounds = array<i64: 128, 128>}, {pipeline_mode = #tpu.pipeline_mode<synchronous>, transform_indices = @transform_6, window_bounds = array<i64: 1, 128>}, {pipeline_mode = #tpu.pipeline_mode<synchronous>, transform_indices = @transform_7, window_bounds = array<i64: 1, 128>}, {transform_indices = @transform_8, window_bounds = array<i64: 32, 128>}]} {
    %c0 = arith.constant 0 : index
    %c0_0 = arith.constant 0 : index
    %0 = vector.load %arg1[%c0, %c0_0] : memref<32x128xbf16, #tpu.memory_space<vmem>>, vector<32x128xbf16>
    %1 = arith.extf %0 : vector<32x128xbf16> to vector<32x128xf32>
    %c0_1 = arith.constant 0 : index
    %c0_2 = arith.constant 0 : index
    %2 = vector.load %arg2[%c0_1, %c0_2] : memref<1x128xf32, #tpu.memory_space<vmem>>, vector<1x128xf32>
    %3 = vector.broadcast %2 : vector<1x128xf32> to vector<32x128xf32>
    %4 = arith.mulf %1, %3 : vector<32x128xf32>
    %c0_3 = arith.constant 0 : index
    %c0_4 = arith.constant 0 : index
    %5 = vector.load %arg3[%c0_3, %c0_4] : memref<128x128xbf16, #tpu.memory_space<vmem>>, vector<128x128xbf16>
    %6 = arith.truncf %4 : vector<32x128xf32> to vector<32x128xbf16>
    %cst = arith.constant dense<0.000000e+00> : vector<32x128xf32>
    %7 = tpu.matmul %6, %5, %cst {dimension_numbers = #tpu.dot_dimension_numbers<[1], [0], [0], [1], [0, 0, 1, 1], [], []>} : vector<32x128xbf16>, vector<128x128xbf16>, vector<32x128xf32> -> vector<32x128xf32>
    %c0_5 = arith.constant 0 : index
    %c0_6 = arith.constant 0 : index
    %8 = vector.load %arg4[%c0_5, %c0_6] : memref<1x128xf32, #tpu.memory_space<vmem>>, vector<1x128xf32>
    %9 = vector.broadcast %8 : vector<1x128xf32> to vector<32x128xf32>
    %10 = arith.mulf %7, %9 : vector<32x128xf32>
    %c0_7 = arith.constant 0 : index
    %c0_8 = arith.constant 0 : index
    %11 = vector.load %arg5[%c0_7, %c0_8] : memref<1x128xf32, #tpu.memory_space<vmem>>, vector<1x128xf32>
    %12 = vector.broadcast %11 : vector<1x128xf32> to vector<32x128xf32>
    %13 = arith.addf %10, %12 : vector<32x128xf32>
    %cst_9 = arith.constant 0.000000e+00 : f32
    %14 = vector.broadcast %cst_9 : f32 to vector<32x128xf32>
    %15 = arith.maximumf %13, %14 : vector<32x128xf32>
    %c0_10 = arith.constant 0 : index
    %c0_11 = arith.constant 0 : index
    %16 = vector.load %arg6[%c0_10, %c0_11] : memref<128x128xbf16, #tpu.memory_space<vmem>>, vector<128x128xbf16>
    %17 = arith.truncf %15 : vector<32x128xf32> to vector<32x128xbf16>
    %cst_12 = arith.constant dense<0.000000e+00> : vector<32x128xf32>
    %18 = tpu.matmul %17, %16, %cst_12 {dimension_numbers = #tpu.dot_dimension_numbers<[1], [0], [0], [1], [0, 0, 1, 1], [], []>} : vector<32x128xbf16>, vector<128x128xbf16>, vector<32x128xf32> -> vector<32x128xf32>
    %c0_13 = arith.constant 0 : index
    %c0_14 = arith.constant 0 : index
    %19 = vector.load %arg7[%c0_13, %c0_14] : memref<1x128xf32, #tpu.memory_space<vmem>>, vector<1x128xf32>
    %20 = vector.broadcast %19 : vector<1x128xf32> to vector<32x128xf32>
    %21 = arith.mulf %18, %20 : vector<32x128xf32>
    %c0_15 = arith.constant 0 : index
    %c0_16 = arith.constant 0 : index
    %22 = vector.load %arg8[%c0_15, %c0_16] : memref<1x128xf32, #tpu.memory_space<vmem>>, vector<1x128xf32>
    %23 = vector.broadcast %22 : vector<1x128xf32> to vector<32x128xf32>
    %24 = arith.addf %21, %23 : vector<32x128xf32>
    %25 = arith.addf %24, %4 : vector<32x128xf32>
    %26 = arith.truncf %25 : vector<32x128xf32> to vector<32x128xbf16>
    %c0_17 = arith.constant 0 : index
    %c0_18 = arith.constant 0 : index
    %27 = vector.load %arg9[%c0_17, %c0_18] : memref<32x128xbf16, #tpu.memory_space<vmem>>, vector<32x128xbf16>
    tpu.vector_store %arg9[%c0_17, %c0_18], %26 {strides = array<i32>} : memref<32x128xbf16, #tpu.memory_space<vmem>>, vector<32x128xbf16>,
    return
  }
  func.func @transform_0(%arg0: i32) -> (i32, i32) {
    %c0_i32 = arith.constant 0 : i32
    %c0_i32_0 = arith.constant 0 : i32
    return %arg0, %c0_i32 : i32, i32
  }
  func.func @transform_1(%arg0: i32) -> (i32, i32) {
    %c0_i32 = arith.constant 0 : i32
    %c0_i32_0 = arith.constant 0 : i32
    %c0_i32_1 = arith.constant 0 : i32
    return %c0_i32, %c0_i32_0 : i32, i32
  }
  func.func @transform_2(%arg0: i32) -> (i32, i32) {
    %c0_i32 = arith.constant 0 : i32
    %c0_i32_0 = arith.constant 0 : i32
    %c0_i32_1 = arith.constant 0 : i32
    return %c0_i32, %c0_i32_0 : i32, i32
  }
  func.func @transform_3(%arg0: i32) -> (i32, i32) {
    %c0_i32 = arith.constant 0 : i32
    %c0_i32_0 = arith.constant 0 : i32
    %c0_i32_1 = arith.constant 0 : i32
    return %c0_i32, %c0_i32_0 : i32, i32
  }
  func.func @transform_4(%arg0: i32) -> (i32, i32) {
    %c0_i32 = arith.constant 0 : i32
    %c0_i32_0 = arith.constant 0 : i32
    %c0_i32_1 = arith.constant 0 : i32
    return %c0_i32, %c0_i32_0 : i32, i32
  }
  func.func @transform_5(%arg0: i32) -> (i32, i32) {
    %c0_i32 = arith.constant 0 : i32
    %c0_i32_0 = arith.constant 0 : i32
    %c0_i32_1 = arith.constant 0 : i32
    return %c0_i32, %c0_i32_0 : i32, i32
  }
  func.func @transform_6(%arg0: i32) -> (i32, i32) {
    %c0_i32 = arith.constant 0 : i32
    %c0_i32_0 = arith.constant 0 : i32
    %c0_i32_1 = arith.constant 0 : i32
    return %c0_i32, %c0_i32_0 : i32, i32
  }
  func.func @transform_7(%arg0: i32) -> (i32, i32) {
    %c0_i32 = arith.constant 0 : i32
    %c0_i32_0 = arith.constant 0 : i32
    %c0_i32_1 = arith.constant 0 : i32
    return %c0_i32, %c0_i32_0 : i32, i32
  }
  func.func @transform_8(%arg0: i32) -> (i32, i32) {
    %c0_i32 = arith.constant 0 : i32
    %c0_i32_0 = arith.constant 0 : i32
    return %arg0, %c0_i32 : i32, i32
  }
}

module attributes {stable_mosaic.version = 11 : i64} {
  func.func @_phi_stage_kernel(%arg0: i32, %arg1: memref<32x128xbf16, #tpu.memory_space<vmem>>, %arg2: memref<128x128xbf16, #tpu.memory_space<vmem>>, %arg3: memref<1x128xf32, #tpu.memory_space<vmem>>, %arg4: memref<1x128xf32, #tpu.memory_space<vmem>>, %arg5: memref<128x128xbf16, #tpu.memory_space<vmem>>, %arg6: memref<1x128xf32, #tpu.memory_space<vmem>>, %arg7: memref<1x128xf32, #tpu.memory_space<vmem>>, %arg8: memref<128x128xbf16, #tpu.memory_space<vmem>>, %arg9: memref<1x128xf32, #tpu.memory_space<vmem>>, %arg10: memref<1x128xf32, #tpu.memory_space<vmem>>, %arg11: memref<32x128xbf16, #tpu.memory_space<vmem>>) attributes {dimension_semantics = [#tpu.dimension_semantics<parallel>], iteration_bounds = array<i64: 2>, scalar_prefetch = 0 : i64, scratch_operands = 0 : i64, tpu.core_type = #tpu.core_type<tc>, window_params = [{transform_indices = @transform_0, window_bounds = array<i64: 32, 128>}, {pipeline_mode = #tpu.pipeline_mode<synchronous>, transform_indices = @transform_1, window_bounds = array<i64: 128, 128>}, {pipeline_mode = #tpu.pipeline_mode<synchronous>, transform_indices = @transform_2, window_bounds = array<i64: 1, 128>}, {pipeline_mode = #tpu.pipeline_mode<synchronous>, transform_indices = @transform_3, window_bounds = array<i64: 1, 128>}, {pipeline_mode = #tpu.pipeline_mode<synchronous>, transform_indices = @transform_4, window_bounds = array<i64: 128, 128>}, {pipeline_mode = #tpu.pipeline_mode<synchronous>, transform_indices = @transform_5, window_bounds = array<i64: 1, 128>}, {pipeline_mode = #tpu.pipeline_mode<synchronous>, transform_indices = @transform_6, window_bounds = array<i64: 1, 128>}, {pipeline_mode = #tpu.pipeline_mode<synchronous>, transform_indices = @transform_7, window_bounds = array<i64: 128, 128>}, {pipeline_mode = #tpu.pipeline_mode<synchronous>, transform_indices = @transform_8, window_bounds = array<i64: 1, 128>}, {pipeline_mode = #tpu.pipeline_mode<synchronous>, transform_indices = @transform_9, window_bounds = array<i64: 1, 128>}, {transform_indices = @transform_10, window_bounds = array<i64: 32, 128>}]} {
    %c0 = arith.constant 0 : index
    %c0_0 = arith.constant 0 : index
    %0 = vector.load %arg1[%c0, %c0_0] : memref<32x128xbf16, #tpu.memory_space<vmem>>, vector<32x128xbf16>
    %c0_1 = arith.constant 0 : index
    %c0_2 = arith.constant 0 : index
    %1 = vector.load %arg2[%c0_1, %c0_2] : memref<128x128xbf16, #tpu.memory_space<vmem>>, vector<128x128xbf16>
    %cst = arith.constant dense<0.000000e+00> : vector<32x128xf32>
    %2 = tpu.matmul %0, %1, %cst {dimension_numbers = #tpu.dot_dimension_numbers<[1], [0], [0], [1], [0, 0, 1, 1], [], []>} : vector<32x128xbf16>, vector<128x128xbf16>, vector<32x128xf32> -> vector<32x128xf32>
    %c0_3 = arith.constant 0 : index
    %c0_4 = arith.constant 0 : index
    %3 = vector.load %arg3[%c0_3, %c0_4] : memref<1x128xf32, #tpu.memory_space<vmem>>, vector<1x128xf32>
    %4 = vector.broadcast %3 : vector<1x128xf32> to vector<32x128xf32>
    %5 = arith.mulf %2, %4 : vector<32x128xf32>
    %c0_5 = arith.constant 0 : index
    %c0_6 = arith.constant 0 : index
    %6 = vector.load %arg4[%c0_5, %c0_6] : memref<1x128xf32, #tpu.memory_space<vmem>>, vector<1x128xf32>
    %7 = vector.broadcast %6 : vector<1x128xf32> to vector<32x128xf32>
    %8 = arith.addf %5, %7 : vector<32x128xf32>
    %cst_7 = arith.constant 0.000000e+00 : f32
    %9 = vector.broadcast %cst_7 : f32 to vector<32x128xf32>
    %10 = arith.maximumf %8, %9 : vector<32x128xf32>
    %c0_8 = arith.constant 0 : index
    %c0_9 = arith.constant 0 : index
    %11 = vector.load %arg5[%c0_8, %c0_9] : memref<128x128xbf16, #tpu.memory_space<vmem>>, vector<128x128xbf16>
    %12 = arith.truncf %10 : vector<32x128xf32> to vector<32x128xbf16>
    %cst_10 = arith.constant dense<0.000000e+00> : vector<32x128xf32>
    %13 = tpu.matmul %12, %11, %cst_10 {dimension_numbers = #tpu.dot_dimension_numbers<[1], [0], [0], [1], [0, 0, 1, 1], [], []>} : vector<32x128xbf16>, vector<128x128xbf16>, vector<32x128xf32> -> vector<32x128xf32>
    %c0_11 = arith.constant 0 : index
    %c0_12 = arith.constant 0 : index
    %14 = vector.load %arg6[%c0_11, %c0_12] : memref<1x128xf32, #tpu.memory_space<vmem>>, vector<1x128xf32>
    %15 = vector.broadcast %14 : vector<1x128xf32> to vector<32x128xf32>
    %16 = arith.mulf %13, %15 : vector<32x128xf32>
    %c0_13 = arith.constant 0 : index
    %c0_14 = arith.constant 0 : index
    %17 = vector.load %arg7[%c0_13, %c0_14] : memref<1x128xf32, #tpu.memory_space<vmem>>, vector<1x128xf32>
    %18 = vector.broadcast %17 : vector<1x128xf32> to vector<32x128xf32>
    %19 = arith.addf %16, %18 : vector<32x128xf32>
    %cst_15 = arith.constant 0.000000e+00 : f32
    %20 = vector.broadcast %cst_15 : f32 to vector<32x128xf32>
    %21 = arith.maximumf %19, %20 : vector<32x128xf32>
    %c0_16 = arith.constant 0 : index
    %c0_17 = arith.constant 0 : index
    %22 = vector.load %arg8[%c0_16, %c0_17] : memref<128x128xbf16, #tpu.memory_space<vmem>>, vector<128x128xbf16>
    %23 = arith.truncf %21 : vector<32x128xf32> to vector<32x128xbf16>
    %cst_18 = arith.constant dense<0.000000e+00> : vector<32x128xf32>
    %24 = tpu.matmul %23, %22, %cst_18 {dimension_numbers = #tpu.dot_dimension_numbers<[1], [0], [0], [1], [0, 0, 1, 1], [], []>} : vector<32x128xbf16>, vector<128x128xbf16>, vector<32x128xf32> -> vector<32x128xf32>
    %c0_19 = arith.constant 0 : index
    %c0_20 = arith.constant 0 : index
    %25 = vector.load %arg9[%c0_19, %c0_20] : memref<1x128xf32, #tpu.memory_space<vmem>>, vector<1x128xf32>
    %26 = vector.broadcast %25 : vector<1x128xf32> to vector<32x128xf32>
    %27 = arith.mulf %24, %26 : vector<32x128xf32>
    %c0_21 = arith.constant 0 : index
    %c0_22 = arith.constant 0 : index
    %28 = vector.load %arg10[%c0_21, %c0_22] : memref<1x128xf32, #tpu.memory_space<vmem>>, vector<1x128xf32>
    %29 = vector.broadcast %28 : vector<1x128xf32> to vector<32x128xf32>
    %30 = arith.addf %27, %29 : vector<32x128xf32>
    %31 = arith.addf %30, %10 : vector<32x128xf32>
    %32 = arith.truncf %31 : vector<32x128xf32> to vector<32x128xbf16>
    %c0_23 = arith.constant 0 : index
    %c0_24 = arith.constant 0 : index
    %33 = vector.load %arg11[%c0_23, %c0_24] : memref<32x128xbf16, #tpu.memory_space<vmem>>, vector<32x128xbf16>
    tpu.vector_store %arg11[%c0_23, %c0_24], %32 {strides = array<i32>} : memref<32x128xbf16, #tpu.memory_space<vmem>>, vector<32x128xbf16>,
    return
  }
  func.func @transform_0(%arg0: i32) -> (i32, i32) {
    %c0_i32 = arith.constant 0 : i32
    %c0_i32_0 = arith.constant 0 : i32
    return %arg0, %c0_i32 : i32, i32
  }
  func.func @transform_1(%arg0: i32) -> (i32, i32) {
    %c0_i32 = arith.constant 0 : i32
    %c0_i32_0 = arith.constant 0 : i32
    %c0_i32_1 = arith.constant 0 : i32
    return %c0_i32, %c0_i32_0 : i32, i32
  }
  func.func @transform_2(%arg0: i32) -> (i32, i32) {
    %c0_i32 = arith.constant 0 : i32
    %c0_i32_0 = arith.constant 0 : i32
    %c0_i32_1 = arith.constant 0 : i32
    return %c0_i32, %c0_i32_0 : i32, i32
  }
  func.func @transform_3(%arg0: i32) -> (i32, i32) {
    %c0_i32 = arith.constant 0 : i32
    %c0_i32_0 = arith.constant 0 : i32
    %c0_i32_1 = arith.constant 0 : i32
    return %c0_i32, %c0_i32_0 : i32, i32
  }
  func.func @transform_4(%arg0: i32) -> (i32, i32) {
    %c0_i32 = arith.constant 0 : i32
    %c0_i32_0 = arith.constant 0 : i32
    %c0_i32_1 = arith.constant 0 : i32
    return %c0_i32, %c0_i32_0 : i32, i32
  }
  func.func @transform_5(%arg0: i32) -> (i32, i32) {
    %c0_i32 = arith.constant 0 : i32
    %c0_i32_0 = arith.constant 0 : i32
    %c0_i32_1 = arith.constant 0 : i32
    return %c0_i32, %c0_i32_0 : i32, i32
  }
  func.func @transform_6(%arg0: i32) -> (i32, i32) {
    %c0_i32 = arith.constant 0 : i32
    %c0_i32_0 = arith.constant 0 : i32
    %c0_i32_1 = arith.constant 0 : i32
    return %c0_i32, %c0_i32_0 : i32, i32
  }
  func.func @transform_7(%arg0: i32) -> (i32, i32) {
    %c0_i32 = arith.constant 0 : i32
    %c0_i32_0 = arith.constant 0 : i32
    %c0_i32_1 = arith.constant 0 : i32
    return %c0_i32, %c0_i32_0 : i32, i32
  }
  func.func @transform_8(%arg0: i32) -> (i32, i32) {
    %c0_i32 = arith.constant 0 : i32
    %c0_i32_0 = arith.constant 0 : i32
    %c0_i32_1 = arith.constant 0 : i32
    return %c0_i32, %c0_i32_0 : i32, i32
  }
  func.func @transform_9(%arg0: i32) -> (i32, i32) {
    %c0_i32 = arith.constant 0 : i32
    %c0_i32_0 = arith.constant 0 : i32
    %c0_i32_1 = arith.constant 0 : i32
    return %c0_i32, %c0_i32_0 : i32, i32
  }
  func.func @transform_10(%arg0: i32) -> (i32, i32) {
    %c0_i32 = arith.constant 0 : i32
    %c0_i32_0 = arith.constant 0 : i32
    return %arg0, %c0_i32 : i32, i32
  }
}

module attributes {stable_mosaic.version = 11 : i64} {
  func.func @_res_kernel(%arg0: i32, %arg1: memref<16x128xbf16, #tpu.memory_space<vmem>>, %arg2: memref<1x128xf32, #tpu.memory_space<vmem>>, %arg3: memref<128x128xbf16, #tpu.memory_space<vmem>>, %arg4: memref<1x128xf32, #tpu.memory_space<vmem>>, %arg5: memref<1x128xf32, #tpu.memory_space<vmem>>, %arg6: memref<128x128xbf16, #tpu.memory_space<vmem>>, %arg7: memref<1x128xf32, #tpu.memory_space<vmem>>, %arg8: memref<1x128xf32, #tpu.memory_space<vmem>>, %arg9: memref<16x128xbf16, #tpu.memory_space<vmem>>) attributes {dimension_semantics = [#tpu.dimension_semantics<parallel>], iteration_bounds = array<i64: 2>, scalar_prefetch = 0 : i64, scratch_operands = 0 : i64, tpu.core_type = #tpu.core_type<tc>, window_params = [{transform_indices = @transform_0, window_bounds = array<i64: 16, 128>}, {pipeline_mode = #tpu.pipeline_mode<synchronous>, transform_indices = @transform_1, window_bounds = array<i64: 1, 128>}, {pipeline_mode = #tpu.pipeline_mode<synchronous>, transform_indices = @transform_2, window_bounds = array<i64: 128, 128>}, {pipeline_mode = #tpu.pipeline_mode<synchronous>, transform_indices = @transform_3, window_bounds = array<i64: 1, 128>}, {pipeline_mode = #tpu.pipeline_mode<synchronous>, transform_indices = @transform_4, window_bounds = array<i64: 1, 128>}, {pipeline_mode = #tpu.pipeline_mode<synchronous>, transform_indices = @transform_5, window_bounds = array<i64: 128, 128>}, {pipeline_mode = #tpu.pipeline_mode<synchronous>, transform_indices = @transform_6, window_bounds = array<i64: 1, 128>}, {pipeline_mode = #tpu.pipeline_mode<synchronous>, transform_indices = @transform_7, window_bounds = array<i64: 1, 128>}, {transform_indices = @transform_8, window_bounds = array<i64: 16, 128>}]} {
    %c0 = arith.constant 0 : index
    %c0_0 = arith.constant 0 : index
    %0 = vector.load %arg1[%c0, %c0_0] : memref<16x128xbf16, #tpu.memory_space<vmem>>, vector<16x128xbf16>
    %1 = arith.extf %0 : vector<16x128xbf16> to vector<16x128xf32>
    %c0_1 = arith.constant 0 : index
    %c0_2 = arith.constant 0 : index
    %2 = vector.load %arg2[%c0_1, %c0_2] : memref<1x128xf32, #tpu.memory_space<vmem>>, vector<1x128xf32>
    %3 = vector.broadcast %2 : vector<1x128xf32> to vector<16x128xf32>
    %4 = arith.mulf %1, %3 : vector<16x128xf32>
    %c0_3 = arith.constant 0 : index
    %c0_4 = arith.constant 0 : index
    %5 = vector.load %arg3[%c0_3, %c0_4] : memref<128x128xbf16, #tpu.memory_space<vmem>>, vector<128x128xbf16>
    %6 = arith.truncf %4 : vector<16x128xf32> to vector<16x128xbf16>
    %cst = arith.constant dense<0.000000e+00> : vector<16x128xf32>
    %7 = tpu.matmul %6, %5, %cst {dimension_numbers = #tpu.dot_dimension_numbers<[1], [0], [0], [1], [0, 0, 1, 1], [], []>} : vector<16x128xbf16>, vector<128x128xbf16>, vector<16x128xf32> -> vector<16x128xf32>
    %c0_5 = arith.constant 0 : index
    %c0_6 = arith.constant 0 : index
    %8 = vector.load %arg4[%c0_5, %c0_6] : memref<1x128xf32, #tpu.memory_space<vmem>>, vector<1x128xf32>
    %9 = vector.broadcast %8 : vector<1x128xf32> to vector<16x128xf32>
    %10 = arith.mulf %7, %9 : vector<16x128xf32>
    %c0_7 = arith.constant 0 : index
    %c0_8 = arith.constant 0 : index
    %11 = vector.load %arg5[%c0_7, %c0_8] : memref<1x128xf32, #tpu.memory_space<vmem>>, vector<1x128xf32>
    %12 = vector.broadcast %11 : vector<1x128xf32> to vector<16x128xf32>
    %13 = arith.addf %10, %12 : vector<16x128xf32>
    %cst_9 = arith.constant 0.000000e+00 : f32
    %14 = vector.broadcast %cst_9 : f32 to vector<16x128xf32>
    %15 = arith.maximumf %13, %14 : vector<16x128xf32>
    %c0_10 = arith.constant 0 : index
    %c0_11 = arith.constant 0 : index
    %16 = vector.load %arg6[%c0_10, %c0_11] : memref<128x128xbf16, #tpu.memory_space<vmem>>, vector<128x128xbf16>
    %17 = arith.truncf %15 : vector<16x128xf32> to vector<16x128xbf16>
    %cst_12 = arith.constant dense<0.000000e+00> : vector<16x128xf32>
    %18 = tpu.matmul %17, %16, %cst_12 {dimension_numbers = #tpu.dot_dimension_numbers<[1], [0], [0], [1], [0, 0, 1, 1], [], []>} : vector<16x128xbf16>, vector<128x128xbf16>, vector<16x128xf32> -> vector<16x128xf32>
    %c0_13 = arith.constant 0 : index
    %c0_14 = arith.constant 0 : index
    %19 = vector.load %arg7[%c0_13, %c0_14] : memref<1x128xf32, #tpu.memory_space<vmem>>, vector<1x128xf32>
    %20 = vector.broadcast %19 : vector<1x128xf32> to vector<16x128xf32>
    %21 = arith.mulf %18, %20 : vector<16x128xf32>
    %c0_15 = arith.constant 0 : index
    %c0_16 = arith.constant 0 : index
    %22 = vector.load %arg8[%c0_15, %c0_16] : memref<1x128xf32, #tpu.memory_space<vmem>>, vector<1x128xf32>
    %23 = vector.broadcast %22 : vector<1x128xf32> to vector<16x128xf32>
    %24 = arith.addf %21, %23 : vector<16x128xf32>
    %25 = arith.addf %24, %4 : vector<16x128xf32>
    %26 = arith.truncf %25 : vector<16x128xf32> to vector<16x128xbf16>
    %c0_17 = arith.constant 0 : index
    %c0_18 = arith.constant 0 : index
    %27 = vector.load %arg9[%c0_17, %c0_18] : memref<16x128xbf16, #tpu.memory_space<vmem>>, vector<16x128xbf16>
    tpu.vector_store %arg9[%c0_17, %c0_18], %26 {strides = array<i32>} : memref<16x128xbf16, #tpu.memory_space<vmem>>, vector<16x128xbf16>,
    return
  }
  func.func @transform_0(%arg0: i32) -> (i32, i32) {
    %c0_i32 = arith.constant 0 : i32
    %c0_i32_0 = arith.constant 0 : i32
    return %arg0, %c0_i32 : i32, i32
  }
  func.func @transform_1(%arg0: i32) -> (i32, i32) {
    %c0_i32 = arith.constant 0 : i32
    %c0_i32_0 = arith.constant 0 : i32
    %c0_i32_1 = arith.constant 0 : i32
    return %c0_i32, %c0_i32_0 : i32, i32
  }
  func.func @transform_2(%arg0: i32) -> (i32, i32) {
    %c0_i32 = arith.constant 0 : i32
    %c0_i32_0 = arith.constant 0 : i32
    %c0_i32_1 = arith.constant 0 : i32
    return %c0_i32, %c0_i32_0 : i32, i32
  }
  func.func @transform_3(%arg0: i32) -> (i32, i32) {
    %c0_i32 = arith.constant 0 : i32
    %c0_i32_0 = arith.constant 0 : i32
    %c0_i32_1 = arith.constant 0 : i32
    return %c0_i32, %c0_i32_0 : i32, i32
  }
  func.func @transform_4(%arg0: i32) -> (i32, i32) {
    %c0_i32 = arith.constant 0 : i32
    %c0_i32_0 = arith.constant 0 : i32
    %c0_i32_1 = arith.constant 0 : i32
    return %c0_i32, %c0_i32_0 : i32, i32
  }
  func.func @transform_5(%arg0: i32) -> (i32, i32) {
    %c0_i32 = arith.constant 0 : i32
    %c0_i32_0 = arith.constant 0 : i32
    %c0_i32_1 = arith.constant 0 : i32
    return %c0_i32, %c0_i32_0 : i32, i32
  }
  func.func @transform_6(%arg0: i32) -> (i32, i32) {
    %c0_i32 = arith.constant 0 : i32
    %c0_i32_0 = arith.constant 0 : i32
    %c0_i32_1 = arith.constant 0 : i32
    return %c0_i32, %c0_i32_0 : i32, i32
  }
  func.func @transform_7(%arg0: i32) -> (i32, i32) {
    %c0_i32 = arith.constant 0 : i32
    %c0_i32_0 = arith.constant 0 : i32
    %c0_i32_1 = arith.constant 0 : i32
    return %c0_i32, %c0_i32_0 : i32, i32
  }
  func.func @transform_8(%arg0: i32) -> (i32, i32) {
    %c0_i32 = arith.constant 0 : i32
    %c0_i32_0 = arith.constant 0 : i32
    return %arg0, %c0_i32 : i32, i32
  }
}

module attributes {stable_mosaic.version = 11 : i64} {
  func.func @_phi_stage_kernel(%arg0: i32, %arg1: memref<16x128xbf16, #tpu.memory_space<vmem>>, %arg2: memref<128x256xbf16, #tpu.memory_space<vmem>>, %arg3: memref<1x256xf32, #tpu.memory_space<vmem>>, %arg4: memref<1x256xf32, #tpu.memory_space<vmem>>, %arg5: memref<256x256xbf16, #tpu.memory_space<vmem>>, %arg6: memref<1x256xf32, #tpu.memory_space<vmem>>, %arg7: memref<1x256xf32, #tpu.memory_space<vmem>>, %arg8: memref<256x256xbf16, #tpu.memory_space<vmem>>, %arg9: memref<1x256xf32, #tpu.memory_space<vmem>>, %arg10: memref<1x256xf32, #tpu.memory_space<vmem>>, %arg11: memref<16x256xbf16, #tpu.memory_space<vmem>>) attributes {dimension_semantics = [#tpu.dimension_semantics<parallel>], iteration_bounds = array<i64: 2>, scalar_prefetch = 0 : i64, scratch_operands = 0 : i64, tpu.core_type = #tpu.core_type<tc>, window_params = [{transform_indices = @transform_0, window_bounds = array<i64: 16, 128>}, {pipeline_mode = #tpu.pipeline_mode<synchronous>, transform_indices = @transform_1, window_bounds = array<i64: 128, 256>}, {pipeline_mode = #tpu.pipeline_mode<synchronous>, transform_indices = @transform_2, window_bounds = array<i64: 1, 256>}, {pipeline_mode = #tpu.pipeline_mode<synchronous>, transform_indices = @transform_3, window_bounds = array<i64: 1, 256>}, {pipeline_mode = #tpu.pipeline_mode<synchronous>, transform_indices = @transform_4, window_bounds = array<i64: 256, 256>}, {pipeline_mode = #tpu.pipeline_mode<synchronous>, transform_indices = @transform_5, window_bounds = array<i64: 1, 256>}, {pipeline_mode = #tpu.pipeline_mode<synchronous>, transform_indices = @transform_6, window_bounds = array<i64: 1, 256>}, {pipeline_mode = #tpu.pipeline_mode<synchronous>, transform_indices = @transform_7, window_bounds = array<i64: 256, 256>}, {pipeline_mode = #tpu.pipeline_mode<synchronous>, transform_indices = @transform_8, window_bounds = array<i64: 1, 256>}, {pipeline_mode = #tpu.pipeline_mode<synchronous>, transform_indices = @transform_9, window_bounds = array<i64: 1, 256>}, {transform_indices = @transform_10, window_bounds = array<i64: 16, 256>}]} {
    %c0 = arith.constant 0 : index
    %c0_0 = arith.constant 0 : index
    %0 = vector.load %arg1[%c0, %c0_0] : memref<16x128xbf16, #tpu.memory_space<vmem>>, vector<16x128xbf16>
    %c0_1 = arith.constant 0 : index
    %c0_2 = arith.constant 0 : index
    %1 = vector.load %arg2[%c0_1, %c0_2] : memref<128x256xbf16, #tpu.memory_space<vmem>>, vector<128x256xbf16>
    %cst = arith.constant dense<0.000000e+00> : vector<16x256xf32>
    %2 = tpu.matmul %0, %1, %cst {dimension_numbers = #tpu.dot_dimension_numbers<[1], [0], [0], [1], [0, 0, 1, 1], [], []>} : vector<16x128xbf16>, vector<128x256xbf16>, vector<16x256xf32> -> vector<16x256xf32>
    %c0_3 = arith.constant 0 : index
    %c0_4 = arith.constant 0 : index
    %3 = vector.load %arg3[%c0_3, %c0_4] : memref<1x256xf32, #tpu.memory_space<vmem>>, vector<1x256xf32>
    %4 = vector.broadcast %3 : vector<1x256xf32> to vector<16x256xf32>
    %5 = arith.mulf %2, %4 : vector<16x256xf32>
    %c0_5 = arith.constant 0 : index
    %c0_6 = arith.constant 0 : index
    %6 = vector.load %arg4[%c0_5, %c0_6] : memref<1x256xf32, #tpu.memory_space<vmem>>, vector<1x256xf32>
    %7 = vector.broadcast %6 : vector<1x256xf32> to vector<16x256xf32>
    %8 = arith.addf %5, %7 : vector<16x256xf32>
    %cst_7 = arith.constant 0.000000e+00 : f32
    %9 = vector.broadcast %cst_7 : f32 to vector<16x256xf32>
    %10 = arith.maximumf %8, %9 : vector<16x256xf32>
    %c0_8 = arith.constant 0 : index
    %c0_9 = arith.constant 0 : index
    %11 = vector.load %arg5[%c0_8, %c0_9] : memref<256x256xbf16, #tpu.memory_space<vmem>>, vector<256x256xbf16>
    %12 = arith.truncf %10 : vector<16x256xf32> to vector<16x256xbf16>
    %cst_10 = arith.constant dense<0.000000e+00> : vector<16x256xf32>
    %13 = tpu.matmul %12, %11, %cst_10 {dimension_numbers = #tpu.dot_dimension_numbers<[1], [0], [0], [1], [0, 0, 1, 1], [], []>} : vector<16x256xbf16>, vector<256x256xbf16>, vector<16x256xf32> -> vector<16x256xf32>
    %c0_11 = arith.constant 0 : index
    %c0_12 = arith.constant 0 : index
    %14 = vector.load %arg6[%c0_11, %c0_12] : memref<1x256xf32, #tpu.memory_space<vmem>>, vector<1x256xf32>
    %15 = vector.broadcast %14 : vector<1x256xf32> to vector<16x256xf32>
    %16 = arith.mulf %13, %15 : vector<16x256xf32>
    %c0_13 = arith.constant 0 : index
    %c0_14 = arith.constant 0 : index
    %17 = vector.load %arg7[%c0_13, %c0_14] : memref<1x256xf32, #tpu.memory_space<vmem>>, vector<1x256xf32>
    %18 = vector.broadcast %17 : vector<1x256xf32> to vector<16x256xf32>
    %19 = arith.addf %16, %18 : vector<16x256xf32>
    %cst_15 = arith.constant 0.000000e+00 : f32
    %20 = vector.broadcast %cst_15 : f32 to vector<16x256xf32>
    %21 = arith.maximumf %19, %20 : vector<16x256xf32>
    %c0_16 = arith.constant 0 : index
    %c0_17 = arith.constant 0 : index
    %22 = vector.load %arg8[%c0_16, %c0_17] : memref<256x256xbf16, #tpu.memory_space<vmem>>, vector<256x256xbf16>
    %23 = arith.truncf %21 : vector<16x256xf32> to vector<16x256xbf16>
    %cst_18 = arith.constant dense<0.000000e+00> : vector<16x256xf32>
    %24 = tpu.matmul %23, %22, %cst_18 {dimension_numbers = #tpu.dot_dimension_numbers<[1], [0], [0], [1], [0, 0, 1, 1], [], []>} : vector<16x256xbf16>, vector<256x256xbf16>, vector<16x256xf32> -> vector<16x256xf32>
    %c0_19 = arith.constant 0 : index
    %c0_20 = arith.constant 0 : index
    %25 = vector.load %arg9[%c0_19, %c0_20] : memref<1x256xf32, #tpu.memory_space<vmem>>, vector<1x256xf32>
    %26 = vector.broadcast %25 : vector<1x256xf32> to vector<16x256xf32>
    %27 = arith.mulf %24, %26 : vector<16x256xf32>
    %c0_21 = arith.constant 0 : index
    %c0_22 = arith.constant 0 : index
    %28 = vector.load %arg10[%c0_21, %c0_22] : memref<1x256xf32, #tpu.memory_space<vmem>>, vector<1x256xf32>
    %29 = vector.broadcast %28 : vector<1x256xf32> to vector<16x256xf32>
    %30 = arith.addf %27, %29 : vector<16x256xf32>
    %31 = arith.addf %30, %10 : vector<16x256xf32>
    %32 = arith.truncf %31 : vector<16x256xf32> to vector<16x256xbf16>
    %c0_23 = arith.constant 0 : index
    %c0_24 = arith.constant 0 : index
    %33 = vector.load %arg11[%c0_23, %c0_24] : memref<16x256xbf16, #tpu.memory_space<vmem>>, vector<16x256xbf16>
    tpu.vector_store %arg11[%c0_23, %c0_24], %32 {strides = array<i32>} : memref<16x256xbf16, #tpu.memory_space<vmem>>, vector<16x256xbf16>,
    return
  }
  func.func @transform_0(%arg0: i32) -> (i32, i32) {
    %c0_i32 = arith.constant 0 : i32
    %c0_i32_0 = arith.constant 0 : i32
    return %arg0, %c0_i32 : i32, i32
  }
  func.func @transform_1(%arg0: i32) -> (i32, i32) {
    %c0_i32 = arith.constant 0 : i32
    %c0_i32_0 = arith.constant 0 : i32
    %c0_i32_1 = arith.constant 0 : i32
    return %c0_i32, %c0_i32_0 : i32, i32
  }
  func.func @transform_2(%arg0: i32) -> (i32, i32) {
    %c0_i32 = arith.constant 0 : i32
    %c0_i32_0 = arith.constant 0 : i32
    %c0_i32_1 = arith.constant 0 : i32
    return %c0_i32, %c0_i32_0 : i32, i32
  }
  func.func @transform_3(%arg0: i32) -> (i32, i32) {
    %c0_i32 = arith.constant 0 : i32
    %c0_i32_0 = arith.constant 0 : i32
    %c0_i32_1 = arith.constant 0 : i32
    return %c0_i32, %c0_i32_0 : i32, i32
  }
  func.func @transform_4(%arg0: i32) -> (i32, i32) {
    %c0_i32 = arith.constant 0 : i32
    %c0_i32_0 = arith.constant 0 : i32
    %c0_i32_1 = arith.constant 0 : i32
    return %c0_i32, %c0_i32_0 : i32, i32
  }
  func.func @transform_5(%arg0: i32) -> (i32, i32) {
    %c0_i32 = arith.constant 0 : i32
    %c0_i32_0 = arith.constant 0 : i32
    %c0_i32_1 = arith.constant 0 : i32
    return %c0_i32, %c0_i32_0 : i32, i32
  }
  func.func @transform_6(%arg0: i32) -> (i32, i32) {
    %c0_i32 = arith.constant 0 : i32
    %c0_i32_0 = arith.constant 0 : i32
    %c0_i32_1 = arith.constant 0 : i32
    return %c0_i32, %c0_i32_0 : i32, i32
  }
  func.func @transform_7(%arg0: i32) -> (i32, i32) {
    %c0_i32 = arith.constant 0 : i32
    %c0_i32_0 = arith.constant 0 : i32
    %c0_i32_1 = arith.constant 0 : i32
    return %c0_i32, %c0_i32_0 : i32, i32
  }
  func.func @transform_8(%arg0: i32) -> (i32, i32) {
    %c0_i32 = arith.constant 0 : i32
    %c0_i32_0 = arith.constant 0 : i32
    %c0_i32_1 = arith.constant 0 : i32
    return %c0_i32, %c0_i32_0 : i32, i32
  }
  func.func @transform_9(%arg0: i32) -> (i32, i32) {
    %c0_i32 = arith.constant 0 : i32
    %c0_i32_0 = arith.constant 0 : i32
    %c0_i32_1 = arith.constant 0 : i32
    return %c0_i32, %c0_i32_0 : i32, i32
  }
  func.func @transform_10(%arg0: i32) -> (i32, i32) {
    %c0_i32 = arith.constant 0 : i32
    %c0_i32_0 = arith.constant 0 : i32
    return %arg0, %c0_i32 : i32, i32
  }
}

module attributes {stable_mosaic.version = 11 : i64} {
  func.func @_res_kernel(%arg0: i32, %arg1: memref<16x256xbf16, #tpu.memory_space<vmem>>, %arg2: memref<1x256xf32, #tpu.memory_space<vmem>>, %arg3: memref<256x256xbf16, #tpu.memory_space<vmem>>, %arg4: memref<1x256xf32, #tpu.memory_space<vmem>>, %arg5: memref<1x256xf32, #tpu.memory_space<vmem>>, %arg6: memref<256x256xbf16, #tpu.memory_space<vmem>>, %arg7: memref<1x256xf32, #tpu.memory_space<vmem>>, %arg8: memref<1x256xf32, #tpu.memory_space<vmem>>, %arg9: memref<16x256xbf16, #tpu.memory_space<vmem>>) attributes {dimension_semantics = [#tpu.dimension_semantics<parallel>], iteration_bounds = array<i64: 1>, scalar_prefetch = 0 : i64, scratch_operands = 0 : i64, tpu.core_type = #tpu.core_type<tc>, window_params = [{transform_indices = @transform_0, window_bounds = array<i64: 16, 256>}, {pipeline_mode = #tpu.pipeline_mode<synchronous>, transform_indices = @transform_1, window_bounds = array<i64: 1, 256>}, {pipeline_mode = #tpu.pipeline_mode<synchronous>, transform_indices = @transform_2, window_bounds = array<i64: 256, 256>}, {pipeline_mode = #tpu.pipeline_mode<synchronous>, transform_indices = @transform_3, window_bounds = array<i64: 1, 256>}, {pipeline_mode = #tpu.pipeline_mode<synchronous>, transform_indices = @transform_4, window_bounds = array<i64: 1, 256>}, {pipeline_mode = #tpu.pipeline_mode<synchronous>, transform_indices = @transform_5, window_bounds = array<i64: 256, 256>}, {pipeline_mode = #tpu.pipeline_mode<synchronous>, transform_indices = @transform_6, window_bounds = array<i64: 1, 256>}, {pipeline_mode = #tpu.pipeline_mode<synchronous>, transform_indices = @transform_7, window_bounds = array<i64: 1, 256>}, {transform_indices = @transform_8, window_bounds = array<i64: 16, 256>}]} {
    %c0 = arith.constant 0 : index
    %c0_0 = arith.constant 0 : index
    %0 = vector.load %arg1[%c0, %c0_0] : memref<16x256xbf16, #tpu.memory_space<vmem>>, vector<16x256xbf16>
    %1 = arith.extf %0 : vector<16x256xbf16> to vector<16x256xf32>
    %c0_1 = arith.constant 0 : index
    %c0_2 = arith.constant 0 : index
    %2 = vector.load %arg2[%c0_1, %c0_2] : memref<1x256xf32, #tpu.memory_space<vmem>>, vector<1x256xf32>
    %3 = vector.broadcast %2 : vector<1x256xf32> to vector<16x256xf32>
    %4 = arith.mulf %1, %3 : vector<16x256xf32>
    %c0_3 = arith.constant 0 : index
    %c0_4 = arith.constant 0 : index
    %5 = vector.load %arg3[%c0_3, %c0_4] : memref<256x256xbf16, #tpu.memory_space<vmem>>, vector<256x256xbf16>
    %6 = arith.truncf %4 : vector<16x256xf32> to vector<16x256xbf16>
    %cst = arith.constant dense<0.000000e+00> : vector<16x256xf32>
    %7 = tpu.matmul %6, %5, %cst {dimension_numbers = #tpu.dot_dimension_numbers<[1], [0], [0], [1], [0, 0, 1, 1], [], []>} : vector<16x256xbf16>, vector<256x256xbf16>, vector<16x256xf32> -> vector<16x256xf32>
    %c0_5 = arith.constant 0 : index
    %c0_6 = arith.constant 0 : index
    %8 = vector.load %arg4[%c0_5, %c0_6] : memref<1x256xf32, #tpu.memory_space<vmem>>, vector<1x256xf32>
    %9 = vector.broadcast %8 : vector<1x256xf32> to vector<16x256xf32>
    %10 = arith.mulf %7, %9 : vector<16x256xf32>
    %c0_7 = arith.constant 0 : index
    %c0_8 = arith.constant 0 : index
    %11 = vector.load %arg5[%c0_7, %c0_8] : memref<1x256xf32, #tpu.memory_space<vmem>>, vector<1x256xf32>
    %12 = vector.broadcast %11 : vector<1x256xf32> to vector<16x256xf32>
    %13 = arith.addf %10, %12 : vector<16x256xf32>
    %cst_9 = arith.constant 0.000000e+00 : f32
    %14 = vector.broadcast %cst_9 : f32 to vector<16x256xf32>
    %15 = arith.maximumf %13, %14 : vector<16x256xf32>
    %c0_10 = arith.constant 0 : index
    %c0_11 = arith.constant 0 : index
    %16 = vector.load %arg6[%c0_10, %c0_11] : memref<256x256xbf16, #tpu.memory_space<vmem>>, vector<256x256xbf16>
    %17 = arith.truncf %15 : vector<16x256xf32> to vector<16x256xbf16>
    %cst_12 = arith.constant dense<0.000000e+00> : vector<16x256xf32>
    %18 = tpu.matmul %17, %16, %cst_12 {dimension_numbers = #tpu.dot_dimension_numbers<[1], [0], [0], [1], [0, 0, 1, 1], [], []>} : vector<16x256xbf16>, vector<256x256xbf16>, vector<16x256xf32> -> vector<16x256xf32>
    %c0_13 = arith.constant 0 : index
    %c0_14 = arith.constant 0 : index
    %19 = vector.load %arg7[%c0_13, %c0_14] : memref<1x256xf32, #tpu.memory_space<vmem>>, vector<1x256xf32>
    %20 = vector.broadcast %19 : vector<1x256xf32> to vector<16x256xf32>
    %21 = arith.mulf %18, %20 : vector<16x256xf32>
    %c0_15 = arith.constant 0 : index
    %c0_16 = arith.constant 0 : index
    %22 = vector.load %arg8[%c0_15, %c0_16] : memref<1x256xf32, #tpu.memory_space<vmem>>, vector<1x256xf32>
    %23 = vector.broadcast %22 : vector<1x256xf32> to vector<16x256xf32>
    %24 = arith.addf %21, %23 : vector<16x256xf32>
    %25 = arith.addf %24, %4 : vector<16x256xf32>
    %26 = arith.truncf %25 : vector<16x256xf32> to vector<16x256xbf16>
    %c0_17 = arith.constant 0 : index
    %c0_18 = arith.constant 0 : index
    %27 = vector.load %arg9[%c0_17, %c0_18] : memref<16x256xbf16, #tpu.memory_space<vmem>>, vector<16x256xbf16>
    tpu.vector_store %arg9[%c0_17, %c0_18], %26 {strides = array<i32>} : memref<16x256xbf16, #tpu.memory_space<vmem>>, vector<16x256xbf16>,
    return
  }
  func.func @transform_0(%arg0: i32) -> (i32, i32) {
    %c0_i32 = arith.constant 0 : i32
    %c0_i32_0 = arith.constant 0 : i32
    return %arg0, %c0_i32 : i32, i32
  }
  func.func @transform_1(%arg0: i32) -> (i32, i32) {
    %c0_i32 = arith.constant 0 : i32
    %c0_i32_0 = arith.constant 0 : i32
    %c0_i32_1 = arith.constant 0 : i32
    return %c0_i32, %c0_i32_0 : i32, i32
  }
  func.func @transform_2(%arg0: i32) -> (i32, i32) {
    %c0_i32 = arith.constant 0 : i32
    %c0_i32_0 = arith.constant 0 : i32
    %c0_i32_1 = arith.constant 0 : i32
    return %c0_i32, %c0_i32_0 : i32, i32
  }
  func.func @transform_3(%arg0: i32) -> (i32, i32) {
    %c0_i32 = arith.constant 0 : i32
    %c0_i32_0 = arith.constant 0 : i32
    %c0_i32_1 = arith.constant 0 : i32
    return %c0_i32, %c0_i32_0 : i32, i32
  }
  func.func @transform_4(%arg0: i32) -> (i32, i32) {
    %c0_i32 = arith.constant 0 : i32
    %c0_i32_0 = arith.constant 0 : i32
    %c0_i32_1 = arith.constant 0 : i32
    return %c0_i32, %c0_i32_0 : i32, i32
  }
  func.func @transform_5(%arg0: i32) -> (i32, i32) {
    %c0_i32 = arith.constant 0 : i32
    %c0_i32_0 = arith.constant 0 : i32
    %c0_i32_1 = arith.constant 0 : i32
    return %c0_i32, %c0_i32_0 : i32, i32
  }
  func.func @transform_6(%arg0: i32) -> (i32, i32) {
    %c0_i32 = arith.constant 0 : i32
    %c0_i32_0 = arith.constant 0 : i32
    %c0_i32_1 = arith.constant 0 : i32
    return %c0_i32, %c0_i32_0 : i32, i32
  }
  func.func @transform_7(%arg0: i32) -> (i32, i32) {
    %c0_i32 = arith.constant 0 : i32
    %c0_i32_0 = arith.constant 0 : i32
    %c0_i32_1 = arith.constant 0 : i32
    return %c0_i32, %c0_i32_0 : i32, i32
  }
  func.func @transform_8(%arg0: i32) -> (i32, i32) {
    %c0_i32 = arith.constant 0 : i32
    %c0_i32_0 = arith.constant 0 : i32
    return %arg0, %c0_i32 : i32, i32
  }
}

module attributes {stable_mosaic.version = 11 : i64} {
  func.func @_classifier_kernel(%arg0: memref<2x256xbf16, #tpu.memory_space<vmem>>, %arg1: memref<256x128xbf16, #tpu.memory_space<vmem>>, %arg2: memref<1x128xf32, #tpu.memory_space<vmem>>, %arg3: memref<1x128xf32, #tpu.memory_space<vmem>>, %arg4: memref<128x128xbf16, #tpu.memory_space<vmem>>, %arg5: memref<1x128xf32, #tpu.memory_space<vmem>>, %arg6: memref<1x128xf32, #tpu.memory_space<vmem>>, %arg7: memref<2x128xf32, #tpu.memory_space<vmem>>) attributes {dimension_semantics = [], scalar_prefetch = 0 : i64, scratch_operands = 0 : i64, tpu.core_type = #tpu.core_type<tc>} {
    %c0 = arith.constant 0 : index
    %c0_0 = arith.constant 0 : index
    %0 = vector.load %arg0[%c0, %c0_0] : memref<2x256xbf16, #tpu.memory_space<vmem>>, vector<2x256xbf16>
    %c0_1 = arith.constant 0 : index
    %c0_2 = arith.constant 0 : index
    %1 = vector.load %arg1[%c0_1, %c0_2] : memref<256x128xbf16, #tpu.memory_space<vmem>>, vector<256x128xbf16>
    %cst = arith.constant dense<0.000000e+00> : vector<2x128xf32>
    %2 = tpu.matmul %0, %1, %cst {dimension_numbers = #tpu.dot_dimension_numbers<[1], [0], [0], [1], [0, 0, 1, 1], [], []>} : vector<2x256xbf16>, vector<256x128xbf16>, vector<2x128xf32> -> vector<2x128xf32>
    %c0_3 = arith.constant 0 : index
    %c0_4 = arith.constant 0 : index
    %3 = vector.load %arg2[%c0_3, %c0_4] : memref<1x128xf32, #tpu.memory_space<vmem>>, vector<1x128xf32>
    %4 = vector.broadcast %3 : vector<1x128xf32> to vector<2x128xf32>
    %5 = arith.mulf %2, %4 : vector<2x128xf32>
    %c0_5 = arith.constant 0 : index
    %c0_6 = arith.constant 0 : index
    %6 = vector.load %arg3[%c0_5, %c0_6] : memref<1x128xf32, #tpu.memory_space<vmem>>, vector<1x128xf32>
    %7 = vector.broadcast %6 : vector<1x128xf32> to vector<2x128xf32>
    %8 = arith.addf %5, %7 : vector<2x128xf32>
    %cst_7 = arith.constant 0.000000e+00 : f32
    %9 = vector.broadcast %cst_7 : f32 to vector<2x128xf32>
    %10 = arith.maximumf %8, %9 : vector<2x128xf32>
    %c0_8 = arith.constant 0 : index
    %c0_9 = arith.constant 0 : index
    %11 = vector.load %arg4[%c0_8, %c0_9] : memref<128x128xbf16, #tpu.memory_space<vmem>>, vector<128x128xbf16>
    %12 = arith.truncf %10 : vector<2x128xf32> to vector<2x128xbf16>
    %cst_10 = arith.constant dense<0.000000e+00> : vector<2x128xf32>
    %13 = tpu.matmul %12, %11, %cst_10 {dimension_numbers = #tpu.dot_dimension_numbers<[1], [0], [0], [1], [0, 0, 1, 1], [], []>} : vector<2x128xbf16>, vector<128x128xbf16>, vector<2x128xf32> -> vector<2x128xf32>
    %c0_11 = arith.constant 0 : index
    %c0_12 = arith.constant 0 : index
    %14 = vector.load %arg5[%c0_11, %c0_12] : memref<1x128xf32, #tpu.memory_space<vmem>>, vector<1x128xf32>
    %15 = vector.broadcast %14 : vector<1x128xf32> to vector<2x128xf32>
    %16 = arith.mulf %13, %15 : vector<2x128xf32>
    %c0_13 = arith.constant 0 : index
    %c0_14 = arith.constant 0 : index
    %17 = vector.load %arg6[%c0_13, %c0_14] : memref<1x128xf32, #tpu.memory_space<vmem>>, vector<1x128xf32>
    %18 = vector.broadcast %17 : vector<1x128xf32> to vector<2x128xf32>
    %19 = arith.addf %16, %18 : vector<2x128xf32>
    %cst_15 = arith.constant 0.000000e+00 : f32
    %20 = vector.broadcast %cst_15 : f32 to vector<2x128xf32>
    %21 = arith.maximumf %19, %20 : vector<2x128xf32>
    %c0_16 = arith.constant 0 : index
    %c0_17 = arith.constant 0 : index
    %22 = vector.load %arg7[%c0_16, %c0_17] : memref<2x128xf32, #tpu.memory_space<vmem>>, vector<2x128xf32>
    tpu.vector_store %arg7[%c0_16, %c0_17], %21 {strides = array<i32>} : memref<2x128xf32, #tpu.memory_space<vmem>>, vector<2x128xf32>,
    return
  }
}

</mosaic_0001>

<bundles_post_ra>
// kernel: custom-call.6
= control target key start
LH: loop header
LB: loop body
LE: loop exit
PB: predicated region body
PF: predicated region fallthrough
CT: control target
= control target key end

     0   :  { %s6_s0 = inlined_call_operand.vmem [shape: f32[2,128], index: 0, kind: output, shape index: {}]  }

// kernel: pointmlp_encoder_forward.7
= control target key start
LH: loop header
LB: loop body
LE: loop exit
PB: predicated region body
PF: predicated region fallthrough
CT: control target
= control target key end

     0   :  { %s1468_s21 = smov 0   ;;  %s1836_s0 = inlined_call_operand.vmem [shape: f32[256,1], index: 0, kind: input, shape index: {}]   ;;  %s1837_s1 = inlined_call_operand.vmem [shape: f32[1,128], index: 1, kind: input, shape index: {}]   ;;  %s1838_s2 = inlined_call_operand.vmem [shape: f32[1,128], index: 2, kind: input, shape index: {}]   ;;  %s1839_s3 = inlined_call_operand.vmem [shape: bf16[128,128], index: 3, kind: input, shape index: {}]   ;;  %s1840_s4 = inlined_call_operand.vmem [shape: f32[1,128], index: 4, kind: input, shape index: {}]   ;;  %s1841_s5 = inlined_call_operand.vmem [shape: f32[1,128], index: 5, kind: input, shape index: {}]   ;;  %s1842_s6 = inlined_call_operand.vmem [shape: bf16[128,128], index: 6, kind: input, shape index: {}]   ;;  %s1843_s7 = inlined_call_operand.vmem [shape: f32[1,128], index: 7, kind: input, shape index: {}]   ;;  %s1844_s8 = inlined_call_operand.vmem [shape: f32[1,128], index: 8, kind: input, shape index: {}]   ;;  %s1845_s9 = inlined_call_operand.vmem [shape: bf16[128,128], index: 9, kind: input, shape index: {}]   ;;  %s1846_s10 = inlined_call_operand.vmem [shape: f32[1,128], index: 10, kind: input, shape index: {}]   ;;  %s1847_s11 = inlined_call_operand.vmem [shape: f32[1,128], index: 11, kind: input, shape index: {}]   ;;  %s1848_s12 = inlined_call_operand.vmem [shape: bf16[256,128], index: 12, kind: output, shape index: {}]  }
   0x1 LB: > { %s1172_s22 = sadd.s32 4294967295, %s1400_s21   ;;  %p1176_p0 = scmp.ge.s32.totalorder %s1400_s21, 1  ;;  %s1400_s21 = sphi %s1468_s21, %s22_s21  }
   0x2   : > { %p363_p1 = scmp.lt.s32.totalorder %s1400_s21, 3 }
   0x4   : > { %p364_p2 = pnand %p1176_p0, %p363_p1 }
   0x5   : > { %s1177_s23 = sshll.u32 (!%p364_p2), %s1172_s22, 4 }
   0x6   : > { %367 = sbr.rel (%p364_p2) target bundleno = 657 (0x291), region = 68  ;;  %p406_p3 = scmp.lt.s32.totalorder (!%p364_p2), %s1177_s23, 31 }
   0xb   : > { %v1402_v0 = vmov 0   ;;  %s1850_s23 = smov (!%p406_p3, %s1177_s23), 31  ;;  %v1286_v7 = vld [vmem:[%s1839_s3 + $0x38] sm:$0xff]  ;;  %v1285_v8 = vld [vmem:[%s1839_s3 + $0x30] sm:$0xff]  ;;  %v1284_v11 = vld [vmem:[%s1839_s3 + $0x28] sm:$0xff] }
   0xc   : > { %1384 = vset.pattern.permute.xlu1 %v1402_v0  ;;  %1383 = vset.pattern.permute.xlu0 %v1402_v0  ;;  %s1178_s24 = sshll.u32 %s1850_s23, 3  ;;  %v1283_v13 = vld [vmem:[%s1839_s3 + $0x20] sm:$0xff]  ;;  %v1282_v16 = vld [vmem:[%s1839_s3 + $0x18] sm:$0xff]  ;;  %v1281_v22 = vld [vmem:[%s1839_s3 + $0x10] sm:$0xff] }
   0xd   : > { %1385 = vset.pattern.permute.xlu2 %v1402_v0  ;;  %s1482_s27 = scalar_lea.vmem %s1836_s0, %s1178_s24  ;;  %625 = vmatpush.bf16.msra.mxu0 %v1286_v7  ;;  %v1280_v23 = vld [vmem:[%s1839_s3 + $0x8] sm:$0xff]  ;;  %v1279_v25 = vld [vmem:[%s1839_s3] sm:$0xff] }
   0xe   : > { %v419_v1 = vld [vmem:[%s1482_s27 + $0x10] sm:$0xff]  ;;  %v417_v2 = vld [vmem:[%s1482_s27] sm:$0xff]  ;;  %v420_v4 = vld [vmem:[%s1482_s27 + $0x18] sm:$0xff]  ;;  %1350 = vmatpush.bf16.msra.mxu3 %v1286_v7 }
   0xf   : > { %446 = vperm.xlu1 %1384, %v419_v1   ;;  %436 = vperm.xlu0 %1383, %v417_v2   ;;  %v421_v3 = vld [vmem:[%s1482_s27 + $0x20] sm:$0xff]  ;;  %v418_v5 = vld [vmem:[%s1482_s27 + $0x8] sm:$0xff]  ;;  %v424_v9 = vld [vmem:[%s1482_s27 + $0x38] sm:$0xff] }
  0x10   : > { %456 = vperm.xlu2 %1385, %v421_v3   ;;  %v422_v6 = vld [vmem:[%s1482_s27 + $0x28] sm:$0xff]  ;;  %v423_v10 = vld [vmem:[%s1482_s27 + $0x30] sm:$0xff]  ;;  %v429_v12 = vld [vmem:[%s1482_s27 + $0x60] sm:$0xff] }
  0x11   : > { %626 = vmatpush.bf16.msra.mxu0 %v1285_v8  ;;  %v425_v14 = vld [vmem:[%s1482_s27 + $0x40] sm:$0xff]  ;;  %v430_v15 = vld [vmem:[%s1482_s27 + $0x68] sm:$0xff]  ;;  %v432_v18 = vld [vmem:[%s1482_s27 + $0x78] sm:$0xff] }
  0x12   : > { %1351 = vmatpush.bf16.msra.mxu3 %v1285_v8  ;;  %v426_v17 = vld [vmem:[%s1482_s27 + $0x48] sm:$0xff]  ;;  %v431_v19 = vld [vmem:[%s1482_s27 + $0x70] sm:$0xff]  ;;  %v428_v21 = vld [vmem:[%s1482_s27 + $0x58] sm:$0xff] }
  0x13   : > { %v427_v20 = vld [vmem:[%s1482_s27 + $0x50] sm:$0xff]  ;;  %v1386_v30 = vld [vmem:[%s1837_s1] ss:$0 sm:$0xff]  ;;  %s1180_s27 = sshll.u32 %s1850_s23, 2 }
  0x14   : > { %v1387_v32 = vld [vmem:[%s1838_s2] ss:$0 sm:$0xff]  ;;  %s1767_s13 = scalar_lea.vmem %s1848_s12, %s1180_s27 }
  0x15   : > { %627 = vmatpush.bf16.msra.mxu0 %v1284_v11 }
  0x16   : > { %1352 = vmatpush.bf16.msra.mxu3 %v1284_v11 }
  0x17   : > { %451 = vperm.xlu1 %1384, %v420_v4   ;;  %441 = vperm.xlu0 %1383, %v418_v5  }
  0x18   : > { %461 = vperm.xlu2 %1385, %v422_v6  }
  0x19   : > { %628 = vmatpush.bf16.msra.mxu0 %v1283_v13 }
  0x1a   : > { %1353 = vmatpush.bf16.msra.mxu3 %v1283_v13 }
  0x1d   : > { %629 = vmatpush.bf16.msra.mxu0 %v1282_v16 }
  0x1e   : > { %1354 = vmatpush.bf16.msra.mxu3 %v1282_v16 }
  0x1f   : > { %471 = vperm.xlu1 %1384, %v424_v9   ;;  %466 = vperm.xlu0 %1383, %v423_v10  }
  0x20   : > { %496 = vperm.xlu2 %1385, %v429_v12  }
  0x21   : > { %630 = vmatpush.bf16.msra.mxu0 %v1281_v22 }
  0x22   : > { %1355 = vmatpush.bf16.msra.mxu3 %v1281_v22  ;;  %v1291_v22 = vld [vmem:[%s1842_s6 + $0x20] sm:$0xff] }
  0x25   : > { %631 = vmatpush.bf16.msra.mxu0 %v1280_v23 }
  0x26   : > { %1356 = vmatpush.bf16.msra.mxu3 %v1280_v23  ;;  %v1290_v23 = vld [vmem:[%s1842_s6 + $0x18] sm:$0xff] }
  0x27   : > { %476 = vperm.xlu1 %1384, %v425_v14   ;;  %501 = vperm.xlu0 %1383, %v430_v15  }
  0x28   : > { %481 = vperm.xlu2 %1385, %v426_v17  }
  0x29   : > { %632 = vmatpush.bf16.msra.mxu0 %v1279_v25 }
  0x2a   : > { %1357 = vmatpush.bf16.msra.mxu3 %v1279_v25  ;;  %v1288_v25 = vld [vmem:[%s1842_s6 + $0x8] sm:$0xff] }
  0x2f   : > { %511 = vperm.xlu1 %1384, %v432_v18   ;;  %506 = vperm.xlu0 %1383, %v431_v19   ;;  %v1294_v19 = vld [vmem:[%s1842_s6 + $0x38] sm:$0xff] }
  0x30   : > { %486 = vperm.xlu2 %1385, %v427_v20   ;;  %802 = vmatpush.bf16.msra.mxu1 %v1294_v19  ;;  %v1293_v20 = vld [vmem:[%s1842_s6 + $0x30] sm:$0xff] }
  0x31   : > { %1358 = vmatpush.bf16.msrb.mxu3 %v1294_v19 }
  0x34   : > { %803 = vmatpush.bf16.msra.mxu1 %v1293_v20 }
  0x35   : > { %1359 = vmatpush.bf16.msrb.mxu3 %v1293_v20  ;;  %v1302_v20 = vld [vmem:[%s1845_s9 + $0x38] sm:$0xff] }
  0x36   : > { %979 = vmatpush.bf16.msra.mxu2 %v1302_v20 }
  0x37   : > { %491 = vperm.xlu0 %1383, %v428_v21   ;;  %v1292_v21 = vld [vmem:[%s1842_s6 + $0x28] sm:$0xff] }
  0x38   : > { %804 = vmatpush.bf16.msra.mxu1 %v1292_v21 }
  0x39   : > { %1360 = vmatpush.bf16.msrb.mxu3 %v1292_v21  ;;  %v1301_v21 = vld [vmem:[%s1845_s9 + $0x30] sm:$0xff] }
  0x3a   : > { %980 = vmatpush.bf16.msra.mxu2 %v1301_v21 }
  0x3c   : > { %805 = vmatpush.bf16.msra.mxu1 %v1291_v22 }
  0x3d   : > { %1361 = vmatpush.bf16.msrb.mxu3 %v1291_v22 }
  0x40   : > { %806 = vmatpush.bf16.msra.mxu1 %v1290_v23 }
  0x41   : > { %1362 = vmatpush.bf16.msrb.mxu3 %v1290_v23  ;;  %v1300_v23 = vld [vmem:[%s1845_s9 + $0x28] sm:$0xff] }
  0x42   : > { %981 = vmatpush.bf16.msra.mxu2 %v1300_v23 }
  0x6a   : > { %v457_v24 = vpop.permute.xlu2 %456 }
  0x6b   : > { %v521_v0 = vmul.f32 %v1386_v30, %v457_v24  ;;  %v1289_v24 = vld [vmem:[%s1842_s6 + $0x10] sm:$0xff] }
  0x6c   : > { %807 = vmatpush.bf16.msra.mxu1 %v1289_v24  ;;  %1363 = vmatpush.bf16.msrb.mxu3 %v1289_v24 }
  0x6d   : > { %v541_v4 = vadd.f32 %v1387_v32, %v521_v0 }
  0x70   : > { %808 = vmatpush.bf16.msra.mxu1 %v1288_v25  ;;  %1364 = vmatpush.bf16.msrb.mxu3 %v1288_v25 }
  0x72   : > { %v462_v26 = vpop.permute.xlu2 %461 }
  0x73   : > { %v522_v1 = vmul.f32 %v1386_v30, %v462_v26  ;;  %v1287_v26 = vld [vmem:[%s1842_s6] sm:$0xff] }
  0x74   : > { %809 = vmatpush.bf16.msra.mxu1 %v1287_v26  ;;  %1365 = vmatpush.bf16.msrb.mxu3 %v1287_v26 }
  0x75   : > { %v542_v6 = vadd.f32 %v1387_v32, %v522_v1 }
  0x77   : > { %v571_v11 = vpack.c.bf16 %v542_v6, %v541_v4 }
  0x7a   : > { %v497_v27 = vpop.permute.xlu2 %496 }
  0x7b   : > { %v529_v47 = vmul.f32 %v1386_v30, %v497_v27 }
  0x7d   : > { %v549_v50 = vadd.f32 %v1387_v32, %v529_v47 }
  0x81   : > { %v447_v28 = vpop.permute.xlu1 %446  ;;  %v437_v29 = vpop.permute.xlu0 %436 }
  0x82   : > { %v482_v31 = vpop.permute.xlu2 %481  ;;  %v517_v35 = vmul.f32 %v1386_v30, %v437_v29  ;;  %v519_v48 = vmul.f32 %v1386_v30, %v447_v28  ;;  %v1560_v28 = vld [vmem:[%s1840_s4] ss:$0 sm:$0xff] }
  0x83   : > { %v526_v33 = vmul.f32 %v1386_v30, %v482_v31 }
  0x84   : > { %v537_v40 = vadd.f32 %v1387_v32, %v517_v35  ;;  %v539_v53 = vadd.f32 %v1387_v32, %v519_v48 }
  0x85   : > { %v1530_v34 = vadd.f32 %v1387_v32, %v526_v33 }
  0x89   : > { %v452_v36 = vpop.permute.xlu1 %451  ;;  %v442_v37 = vpop.permute.xlu0 %441 }
  0x8a   : > { %v518_v38 = vmul.f32 %v1386_v30, %v442_v37  ;;  %v487_v39 = vpop.permute.xlu2 %486  ;;  %v520_v49 = vmul.f32 %v1386_v30, %v452_v36 }
  0x8b   : > { %v527_v42 = vmul.f32 %v1386_v30, %v487_v39 }
  0x8c   : > { %v538_v41 = vadd.f32 %v1387_v32, %v518_v38  ;;  %v540_v54 = vadd.f32 %v1387_v32, %v520_v49 }
  0x8d   : > { %v547_v44 = vadd.f32 %v1387_v32, %v527_v42 }
  0x8e   : > { %v569_v43 = vpack.c.bf16 %v538_v41, %v537_v40  ;;  %v570_v59 = vpack.c.bf16 %v540_v54, %v539_v53 }
  0x90   : > { %633 = vmatmul.bf16.vlgmr.msra.gmra.mxu0 %v569_v43 }
  0x91   : > { %v472_v45 = vpop.permute.xlu1 %471  ;;  %v467_v46 = vpop.permute.xlu0 %466 }
  0x92   : > { %v524_v14 = vmul.f32 %v1386_v30, %v472_v45  ;;  %v523_v15 = vmul.f32 %v1386_v30, %v467_v46 }
  0x94   : > { %v544_v16 = vadd.f32 %v1387_v32, %v524_v14  ;;  %v543_v17 = vadd.f32 %v1387_v32, %v523_v15 }
  0x96   : > { %v572_v18 = vpack.c.bf16 %v544_v16, %v543_v17 }
  0x99   : > { %v477_v51 = vpop.permute.xlu1 %476  ;;  %v502_v52 = vpop.permute.xlu0 %501 }
  0x9a   : > { %v525_v55 = vmul.f32 %v1386_v30, %v477_v51  ;;  %v530_v56 = vmul.f32 %v1386_v30, %v502_v52 }
  0x9c   : > { %v545_v57 = vadd.f32 %v1387_v32, %v525_v55  ;;  %v550_v58 = vadd.f32 %v1387_v32, %v530_v56 }
  0x9e   : > { %v575_v60 = vpack.c.bf16 %v550_v58, %v549_v50  ;;  %v573_v61 = vpack.c.bf16 %v1530_v34, %v545_v57 }
  0xa0   : > { %638 = vmatmul.bf16.gmra.mxu0 %v570_v59  ;;  %663 = vmatmul.bf16.vlgmr.msra.gmra.mxu3 %v575_v60 }
  0xa1   : > { %v507_v62 = vpop.permute.xlu0 %506  ;;  %v512_v63 = vpop.permute.xlu1 %511  ;;  %1366 = vmatpush.bf16.msra.mxu3 %v1302_v20 }
  0xa2   : > { %v532_v2 = vmul.f32 %v1386_v30, %v512_v63  ;;  %v531_v3 = vmul.f32 %v1386_v30, %v507_v62 }
  0xa4   : > { %v552_v7 = vadd.f32 %v1387_v32, %v532_v2  ;;  %v551_v8 = vadd.f32 %v1387_v32, %v531_v3 }
  0xa5   : > { %1367 = vmatpush.bf16.msra.mxu3 %v1301_v21 }
  0xa6   : > { %v576_v12 = vpack.c.bf16 %v552_v7, %v551_v8 }
  0xa9   : > { %v492_v5 = vpop.permute.xlu0 %491  ;;  %1368 = vmatpush.bf16.msra.mxu3 %v1300_v23 }
  0xaa   : > { %v528_v9 = vmul.f32 %v1386_v30, %v492_v5  ;;  %v1566_v30 = vld [vmem:[%s1841_s5] ss:$0 sm:$0xff] }
  0xac   : > { %v548_v10 = vadd.f32 %v1387_v32, %v528_v9 }
  0xae   : > { %v574_v13 = vpack.c.bf16 %v548_v10, %v547_v44 }
  0xb0   : > { %643 = vmatmul.bf16.gmra.mxu0 %v571_v11  ;;  %668 = vmatmul.bf16.gmra.mxu3 %v576_v12 }
  0xc0   : > { %648 = vmatmul.bf16.gmra.mxu0 %v572_v18 }
  0xd0   : > { %653 = vmatmul.bf16.gmra.mxu0 %v573_v61 }
  0xe0   : > { %658 = vmatmul.bf16.gmra.mxu0 %v574_v13 }
 0x10d   : > { %v634_v27 = vpop.f32.mrf.mxu0 }
 0x10e   : > { %v678_v29 = vmul.f32 %v1560_v28, %v634_v27 }
 0x110   : > { %v1569_v32 = vadd.f32 %v1566_v30, %v678_v29  ;;  %v1299_v29 = vld [vmem:[%s1845_s9 + $0x20] sm:$0xff] }
 0x111   : > { %982 = vmatpush.bf16.msra.mxu2 %v1299_v29  ;;  %1369 = vmatpush.bf16.msra.mxu3 %v1299_v29 }
 0x112   : > { %v714_v35 = vmax.f32 %v1569_v32, 0.0 }
 0x115   : > { %v636_v31 = vpop.f32.mrf.mxu0 }
 0x116   : > { %v679_v33 = vmul.f32 %v1560_v28, %v636_v31 }
 0x118   : > { %v1573_v34 = vadd.f32 %v1566_v30, %v679_v33 }
 0x11a   : > { %v715_v36 = vmax.f32 %v1573_v34, 0.0 }
 0x11c   : > { %v746_v37 = vpack.c.bf16 %v715_v36, %v714_v35 }
 0x11d   : > { %v639_v38 = vpop.f32.mrf.mxu0 }
 0x11e   : > { %810 = vmatmul.bf16.vlgmr.msra.gmra.mxu1 %v746_v37  ;;  %v680_v39 = vmul.f32 %v1560_v28, %v639_v38 }
 0x120   : > { %v1583_v42 = vadd.f32 %v1566_v30, %v680_v39 }
 0x122   : > { %v716_v46 = vmax.f32 %v1583_v42, 0.0 }
 0x123   : > { %v664_v40 = vpop.f32.mrf.mxu3 }
 0x124   : > { %v690_v44 = vmul.f32 %v1560_v28, %v664_v40 }
 0x125   : > { %v641_v41 = vpop.f32.mrf.mxu0 }
 0x126   : > { %v681_v43 = vmul.f32 %v1560_v28, %v641_v41  ;;  %v1593_v49 = vadd.f32 %v1566_v30, %v690_v44 }
 0x128   : > { %v1588_v45 = vadd.f32 %v1566_v30, %v681_v43  ;;  %v726_v54 = vmax.f32 %v1593_v49, 0.0 }
 0x12a   : > { %v717_v47 = vmax.f32 %v1588_v45, 0.0 }
 0x12b   : > { %v666_v48 = vpop.f32.mrf.mxu3 }
 0x12c   : > { %v691_v50 = vmul.f32 %v1560_v28, %v666_v48  ;;  %v747_v51 = vpack.c.bf16 %v717_v47, %v716_v46 }
 0x12d   : > { %v644_v52 = vpop.f32.mrf.mxu0 }
 0x12e   : > { %v1601_v53 = vadd.f32 %v1566_v30, %v691_v50  ;;  %815 = vmatmul.bf16.gmra.mxu1 %v747_v51  ;;  %v682_v56 = vmul.f32 %v1560_v28, %v644_v52  ;;  %v1298_v52 = vld [vmem:[%s1845_s9 + $0x18] sm:$0xff] }
 0x12f   : > { %983 = vmatpush.bf16.msra.mxu2 %v1298_v52  ;;  %1370 = vmatpush.bf16.msra.mxu3 %v1298_v52 }
 0x130   : > { %v727_v55 = vmax.f32 %v1601_v53, 0.0  ;;  %v1611_v60 = vadd.f32 %v1566_v30, %v682_v56  ;;  %v1295_v56 = vld [vmem:[%s1845_s9] sm:$0xff] }
 0x132   : > { %v752_v57 = vpack.c.bf16 %v727_v55, %v726_v54  ;;  %v718_v0 = vmax.f32 %v1611_v60, 0.0 }
 0x133   : > { %v669_v58 = vpop.f32.mrf.mxu3 }
 0x134   : > { %840 = vmatmul.bf16.vlgmr.msrb.gmra.mxu3 %v752_v57  ;;  %v692_v62 = vmul.f32 %v1560_v28, %v669_v58  ;;  %v1706_v58 = vld [vmem:[%s1843_s7] ss:$0 sm:$0xff] }
 0x135   : > { %v646_v59 = vpop.f32.mrf.mxu0 }
 0x136   : > { %v683_v61 = vmul.f32 %v1560_v28, %v646_v59  ;;  %v1621_v3 = vadd.f32 %v1566_v30, %v692_v62 }
 0x138   : > { %v1616_v63 = vadd.f32 %v1566_v30, %v683_v61  ;;  %v728_v8 = vmax.f32 %v1621_v3, 0.0  ;;  %v1712_v61 = vld [vmem:[%s1844_s8] ss:$0 sm:$0xff] }
 0x13a   : > { %v719_v1 = vmax.f32 %v1616_v63, 0.0 }
 0x13b   : > { %v671_v2 = vpop.f32.mrf.mxu3 }
 0x13c   : > { %v693_v4 = vmul.f32 %v1560_v28, %v671_v2  ;;  %v748_v5 = vpack.c.bf16 %v719_v1, %v718_v0 }
 0x13d   : > { %v649_v6 = vpop.f32.mrf.mxu0 }
 0x13e   : > { %v1629_v7 = vadd.f32 %v1566_v30, %v693_v4  ;;  %820 = vmatmul.bf16.gmra.mxu1 %v748_v5  ;;  %v684_v10 = vmul.f32 %v1560_v28, %v649_v6 }
 0x140   : > { %v729_v9 = vmax.f32 %v1629_v7, 0.0  ;;  %v1639_v13 = vadd.f32 %v1566_v30, %v684_v10 }
 0x142   : > { %v753_v11 = vpack.c.bf16 %v729_v9, %v728_v8  ;;  %v720_v16 = vmax.f32 %v1639_v13, 0.0 }
 0x144   : > { %845 = vmatmul.bf16.gmra.mxu3 %v753_v11 }
 0x145   : > { %v651_v12 = vpop.f32.mrf.mxu0 }
 0x146   : > { %v685_v14 = vmul.f32 %v1560_v28, %v651_v12 }
 0x148   : > { %v1643_v15 = vadd.f32 %v1566_v30, %v685_v14 }
 0x14a   : > { %v721_v17 = vmax.f32 %v1643_v15, 0.0 }
 0x14c   : > { %v749_v18 = vpack.c.bf16 %v721_v17, %v720_v16 }
 0x14d   : > { %v654_v19 = vpop.f32.mrf.mxu0 }
 0x14e   : > { %825 = vmatmul.bf16.gmra.mxu1 %v749_v18  ;;  %v686_v22 = vmul.f32 %v1560_v28, %v654_v19 }
 0x150   : > { %v1662_v25 = vadd.f32 %v1566_v30, %v686_v22 }
 0x152   : > { %v722_v31 = vmax.f32 %v1662_v25, 0.0 }
 0x155   : > { %v656_v24 = vpop.f32.mrf.mxu0 }
 0x156   : > { %v687_v26 = vmul.f32 %v1560_v28, %v656_v24 }
 0x158   : > { %v1666_v27 = vadd.f32 %v1566_v30, %v687_v26 }
 0x15a   : > { %v723_v33 = vmax.f32 %v1666_v27, 0.0 }
 0x15c   : > { %v750_v37 = vpack.c.bf16 %v723_v33, %v722_v31 }
 0x15d   : > { %v659_v38 = vpop.f32.mrf.mxu0 }
 0x15e   : > { %830 = vmatmul.bf16.gmra.mxu1 %v750_v37  ;;  %v688_v39 = vmul.f32 %v1560_v28, %v659_v38 }
 0x160   : > { %v1679_v41 = vadd.f32 %v1566_v30, %v688_v39 }
 0x162   : > { %v724_v48 = vmax.f32 %v1679_v41, 0.0 }
 0x165   : > { %v661_v40 = vpop.f32.mrf.mxu0 }
 0x166   : > { %v689_v43 = vmul.f32 %v1560_v28, %v661_v40  ;;  %v1297_v28 = vld [vmem:[%s1845_s9 + $0x10] sm:$0xff] }
 0x167   : > { %984 = vmatpush.bf16.msra.mxu2 %v1297_v28  ;;  %1371 = vmatpush.bf16.msra.mxu3 %v1297_v28 }
 0x168   : > { %v1683_v44 = vadd.f32 %v1566_v30, %v689_v43  ;;  %v1296_v30 = vld [vmem:[%s1845_s9 + $0x8] sm:$0xff] }
 0x16a   : > { %v725_v50 = vmax.f32 %v1683_v44, 0.0 }
 0x16b   : > { %985 = vmatpush.bf16.msra.mxu2 %v1296_v30  ;;  %1372 = vmatpush.bf16.msra.mxu3 %v1296_v30 }
 0x16c   : > { %v751_v51 = vpack.c.bf16 %v725_v50, %v724_v48 }
 0x16e   : > { %835 = vmatmul.bf16.gmra.mxu1 %v751_v51 }
 0x16f   : > { %986 = vmatpush.bf16.msra.mxu2 %v1295_v56  ;;  %1373 = vmatpush.bf16.msra.mxu3 %v1295_v56 }
 0x19b   : > { %v811_v57 = vpop.f32.mrf.mxu1 }
 0x19c   : > { %v855_v59 = vmul.f32 %v1706_v58, %v811_v57 }
 0x19e   : > { %v875_v2 = vadd.f32 %v1712_v61, %v855_v59 }
 0x1a0   : > { %v891_v6 = vmax.f32 %v875_v2, 0.0 }
 0x1a3   : > { %v813_v62 = vpop.f32.mrf.mxu1 }
 0x1a4   : > { %v856_v4 = vmul.f32 %v1706_v58, %v813_v62 }
 0x1a6   : > { %v876_v5 = vadd.f32 %v1712_v61, %v856_v4 }
 0x1a8   : > { %v892_v10 = vmax.f32 %v876_v5, 0.0 }
 0x1aa   : > { %v923_v11 = vpack.c.bf16 %v892_v10, %v891_v6 }
 0x1ab   : > { %v816_v12 = vpop.f32.mrf.mxu1 }
 0x1ac   : > { %987 = vmatmul.bf16.vlgmr.msra.gmra.mxu2 %v923_v11  ;;  %v857_v14 = vmul.f32 %v1706_v58, %v816_v12 }
 0x1ae   : > { %v877_v19 = vadd.f32 %v1712_v61, %v857_v14 }
 0x1b0   : > { %v893_v23 = vmax.f32 %v877_v19, 0.0 }
 0x1b3   : > { %v818_v18 = vpop.f32.mrf.mxu1 }
 0x1b4   : > { %v858_v20 = vmul.f32 %v1706_v58, %v818_v18 }
 0x1b6   : > { %v878_v21 = vadd.f32 %v1712_v61, %v858_v20 }
 0x1b7   : > { %v841_v22 = vpop.f32.mrf.mxu3 }
 0x1b8   : > { %v894_v24 = vmax.f32 %v878_v21, 0.0  ;;  %v867_v37 = vmul.f32 %v1706_v58, %v841_v22 }
 0x1ba   : > { %v924_v26 = vpack.c.bf16 %v894_v24, %v893_v23  ;;  %v887_v39 = vadd.f32 %v1712_v61, %v867_v37 }
 0x1bb   : > { %v821_v29 = vpop.f32.mrf.mxu1 }
 0x1bc   : > { %992 = vmatmul.bf16.gmra.mxu2 %v924_v26  ;;  %v859_v40 = vmul.f32 %v1706_v58, %v821_v29  ;;  %v903_v28 = vmax.f32 %v887_v39, 0.0 }
 0x1be   : > { %v879_v30 = vadd.f32 %v1712_v61, %v859_v40 }
 0x1bf   : > { %v843_v38 = vpop.f32.mrf.mxu3 }
 0x1c0   : > { %v868_v43 = vmul.f32 %v1706_v58, %v843_v38  ;;  %v895_v4 = vmax.f32 %v879_v30, 0.0 }
 0x1c2   : > { %v888_v51 = vadd.f32 %v1712_v61, %v868_v43 }
 0x1c3   : > { %v823_v52 = vpop.f32.mrf.mxu1 }
 0x1c4   : > { %v904_v56 = vmax.f32 %v888_v51, 0.0  ;;  %v860_v57 = vmul.f32 %v1706_v58, %v823_v52 }
 0x1c6   : > { %v929_v59 = vpack.c.bf16 %v904_v56, %v903_v28  ;;  %v880_v62 = vadd.f32 %v1712_v61, %v860_v57 }
 0x1c7   : > { %v846_v2 = vpop.f32.mrf.mxu3 }
 0x1c8   : > { %v896_v5 = vmax.f32 %v880_v62, 0.0  ;;  %1017 = vmatmul.bf16.vlgmr.msra.gmra.mxu3 %v929_v59  ;;  %v869_v11 = vmul.f32 %v1706_v58, %v846_v2 }
 0x1ca   : > { %v925_v6 = vpack.c.bf16 %v896_v5, %v895_v4  ;;  %v889_v14 = vadd.f32 %v1712_v61, %v869_v11 }
 0x1cb   : > { %v826_v10 = vpop.f32.mrf.mxu1 }
 0x1cc   : > { %997 = vmatmul.bf16.gmra.mxu2 %v925_v6  ;;  %v861_v18 = vmul.f32 %v1706_v58, %v826_v10  ;;  %v905_v22 = vmax.f32 %v889_v14, 0.0 }
 0x1ce   : > { %v881_v23 = vadd.f32 %v1712_v61, %v861_v18 }
 0x1cf   : > { %v848_v12 = vpop.f32.mrf.mxu3 }
 0x1d0   : > { %v870_v19 = vmul.f32 %v1706_v58, %v848_v12  ;;  %v897_v38 = vmax.f32 %v881_v23, 0.0 }
 0x1d2   : > { %v890_v20 = vadd.f32 %v1712_v61, %v870_v19 }
 0x1d3   : > { %v828_v21 = vpop.f32.mrf.mxu1 }
 0x1d4   : > { %v906_v24 = vmax.f32 %v890_v20, 0.0  ;;  %v862_v26 = vmul.f32 %v1706_v58, %v828_v21  ;;  %v1748_v20 = vld [vmem:[%s1846_s10] ss:$0 sm:$0xff] }
 0x1d6   : > { %v882_v29 = vadd.f32 %v1712_v61, %v862_v26  ;;  %v930_v37 = vpack.c.bf16 %v906_v24, %v905_v22  ;;  %v1754_v22 = vld [vmem:[%s1847_s11] ss:$0 sm:$0xff] }
 0x1d8   : > { %v898_v39 = vmax.f32 %v882_v29, 0.0  ;;  %1022 = vmatmul.bf16.gmra.mxu3 %v930_v37 }
 0x1da   : > { %v926_v40 = vpack.c.bf16 %v898_v39, %v897_v38 }
 0x1db   : > { %v831_v43 = vpop.f32.mrf.mxu1 }
 0x1dc   : > { %1002 = vmatmul.bf16.gmra.mxu2 %v926_v40  ;;  %v863_v51 = vmul.f32 %v1706_v58, %v831_v43 }
 0x1de   : > { %v883_v28 = vadd.f32 %v1712_v61, %v863_v51 }
 0x1e0   : > { %v899_v57 = vmax.f32 %v883_v28, 0.0 }
 0x1e3   : > { %v833_v52 = vpop.f32.mrf.mxu1 }
 0x1e4   : > { %v864_v30 = vmul.f32 %v1706_v58, %v833_v52 }
 0x1e6   : > { %v884_v56 = vadd.f32 %v1712_v61, %v864_v30 }
 0x1e8   : > { %v900_v59 = vmax.f32 %v884_v56, 0.0 }
 0x1ea   : > { %v927_v62 = vpack.c.bf16 %v900_v59, %v899_v57 }
 0x1eb   : > { %v836_v2 = vpop.f32.mrf.mxu1 }
 0x1ec   : > { %1007 = vmatmul.bf16.gmra.mxu2 %v927_v62  ;;  %v865_v4 = vmul.f32 %v1706_v58, %v836_v2 }
 0x1ee   : > { %v885_v6 = vadd.f32 %v1712_v61, %v865_v4 }
 0x1f0   : > { %v901_v12 = vmax.f32 %v885_v6, 0.0 }
 0x1f3   : > { %v838_v5 = vpop.f32.mrf.mxu1 }
 0x1f4   : > { %v866_v10 = vmul.f32 %v1706_v58, %v838_v5 }
 0x1f6   : > { %v886_v11 = vadd.f32 %v1712_v61, %v866_v10 }
 0x1f8   : > { %v902_v14 = vmax.f32 %v886_v11, 0.0 }
 0x1fa   : > { %v928_v18 = vpack.c.bf16 %v902_v14, %v901_v12 }
 0x1fc   : > { %1012 = vmatmul.bf16.gmra.mxu2 %v928_v18 }
 0x22f   : > { %v988_v19 = vpop.f32.mrf.mxu2 }
 0x230   : > { %v1032_v21 = vmul.f32 %v1748_v20, %v988_v19 }
 0x232   : > { %v1052_v61 = vadd.f32 %v1754_v22, %v1032_v21 }
 0x234   : > { %v1068_v26 = vadd.f32 %v1052_v61, %v714_v35 }
 0x237   : > { %v990_v58 = vpop.f32.mrf.mxu2 }
 0x238   : > { %v1033_v23 = vmul.f32 %v1748_v20, %v990_v58 }
 0x23a   : > { %v1053_v24 = vadd.f32 %v1754_v22, %v1033_v23 }
 0x23c   : > { %v1069_v29 = vadd.f32 %v1053_v24, %v715_v36 }
 0x23e   : > { %v1306_v37 = vpack.c.bf16 %v1069_v29, %v1068_v26 }
 0x23f   : > { %v993_v38 = vpop.f32.mrf.mxu2 }
 0x240   : > { %1307 = vst [vmem:[%s1767_s13] sm:$0xff] %v1306_v37   ;;  %v1034_v39 = vmul.f32 %v1748_v20, %v993_v38 }
 0x242   : > { %v1054_v43 = vadd.f32 %v1754_v22, %v1034_v39 }
 0x244   : > { %v1070_v36 = vadd.f32 %v1054_v43, %v716_v46 }
 0x247   : > { %v995_v40 = vpop.f32.mrf.mxu2 }
 0x248   : > { %v1035_v32 = vmul.f32 %v1748_v20, %v995_v40 }
 0x24a   : > { %v1055_v34 = vadd.f32 %v1754_v22, %v1035_v32 }
 0x24b   : > { %v1018_v35 = vpop.f32.mrf.mxu3 }
 0x24c   : > { %v1071_v51 = vadd.f32 %v1055_v34, %v717_v47  ;;  %v1044_v30 = vmul.f32 %v1748_v20, %v1018_v35 }
 0x24e   : > { %v1311_v52 = vpack.c.bf16 %v1071_v51, %v1070_v36  ;;  %v1064_v57 = vadd.f32 %v1754_v22, %v1044_v30 }
 0x24f   : > { %v998_v28 = vpop.f32.mrf.mxu2 }
 0x250   : > { %1343 = vst [vmem:[%s1767_s13 + $0x8] sm:$0xff] %v1311_v52   ;;  %v1036_v59 = vmul.f32 %v1748_v20, %v998_v28  ;;  %v1080_v45 = vadd.f32 %v1064_v57, %v726_v54 }
 0x252   : > { %v1056_v47 = vadd.f32 %v1754_v22, %v1036_v59 }
 0x253   : > { %v1020_v56 = vpop.f32.mrf.mxu3 }
 0x254   : > { %v1045_v62 = vmul.f32 %v1748_v20, %v1020_v56  ;;  %v1072_v11 = vadd.f32 %v1056_v47, %v718_v0 }
 0x256   : > { %v1065_v42 = vadd.f32 %v1754_v22, %v1045_v62 }
 0x257   : > { %v1000_v46 = vpop.f32.mrf.mxu2 }
 0x258   : > { %v1081_v2 = vadd.f32 %v1065_v42, %v727_v55  ;;  %v1037_v4 = vmul.f32 %v1748_v20, %v1000_v46 }
 0x25a   : > { %v1336_v5 = vpack.c.bf16 %v1081_v2, %v1080_v45  ;;  %v1057_v6 = vadd.f32 %v1754_v22, %v1037_v4 }
 0x25b   : > { %v1023_v10 = vpop.f32.mrf.mxu3 }
 0x25c   : > { %1348 = vst [vmem:[%s1767_s13 + $0x30] sm:$0xff] %v1336_v5   ;;  %v1073_v12 = vadd.f32 %v1057_v6, %v719_v1  ;;  %v1046_v53 = vmul.f32 %v1748_v20, %v1023_v10 }
 0x25e   : > { %v1316_v49 = vpack.c.bf16 %v1073_v12, %v1072_v11  ;;  %v1066_v14 = vadd.f32 %v1754_v22, %v1046_v53 }
 0x25f   : > { %v1003_v54 = vpop.f32.mrf.mxu2 }
 0x260   : > { %1344 = vst [vmem:[%s1767_s13 + $0x10] sm:$0xff] %v1316_v49   ;;  %v1038_v18 = vmul.f32 %v1748_v20, %v1003_v54  ;;  %v1082_v63 = vadd.f32 %v1066_v14, %v728_v8 }
 0x262   : > { %v1058_v1 = vadd.f32 %v1754_v22, %v1038_v18 }
 0x263   : > { %v1025_v55 = vpop.f32.mrf.mxu3 }
 0x264   : > { %v1047_v19 = vmul.f32 %v1748_v20, %v1025_v55  ;;  %v1074_v24 = vadd.f32 %v1058_v1, %v720_v16 }
 0x266   : > { %v1067_v60 = vadd.f32 %v1754_v22, %v1047_v19 }
 0x267   : > { %v1005_v0 = vpop.f32.mrf.mxu2 }
 0x268   : > { %v1083_v21 = vadd.f32 %v1067_v60, %v729_v9  ;;  %v1039_v58 = vmul.f32 %v1748_v20, %v1005_v0 }
 0x26a   : > { %v1341_v61 = vpack.c.bf16 %v1083_v21, %v1082_v63  ;;  %v1059_v23 = vadd.f32 %v1754_v22, %v1039_v58 }
 0x26c   : > { %1349 = vst [vmem:[%s1767_s13 + $0x38] sm:$0xff] %v1341_v61   ;;  %v1075_v26 = vadd.f32 %v1059_v23, %v721_v17 }
 0x26e   : > { %v1321_v3 = vpack.c.bf16 %v1075_v26, %v1074_v24 }
 0x26f   : > { %v1008_v8 = vpop.f32.mrf.mxu2 }
 0x270   : > { %1345 = vst [vmem:[%s1767_s13 + $0x18] sm:$0xff] %v1321_v3   ;;  %v1040_v29 = vmul.f32 %v1748_v20, %v1008_v8 }
 0x272   : > { %v1060_v9 = vadd.f32 %v1754_v22, %v1040_v29 }
 0x274   : > { %v1076_v13 = vadd.f32 %v1060_v9, %v722_v31 }
 0x277   : > { %v1010_v7 = vpop.f32.mrf.mxu2 }
 0x278   : > { %v1041_v37 = vmul.f32 %v1748_v20, %v1010_v7 }
 0x27a   : > { %v1061_v38 = vadd.f32 %v1754_v22, %v1041_v37 }
 0x27c   : > { %v1077_v15 = vadd.f32 %v1061_v38, %v723_v33 }
 0x27e   : > { %v1326_v16 = vpack.c.bf16 %v1077_v15, %v1076_v13 }
 0x27f   : > { %v1013_v17 = vpop.f32.mrf.mxu2 }
 0x280   : > { %1346 = vst [vmem:[%s1767_s13 + $0x20] sm:$0xff] %v1326_v16   ;;  %v1042_v39 = vmul.f32 %v1748_v20, %v1013_v17 }
 0x282   : > { %v1062_v43 = vadd.f32 %v1754_v22, %v1042_v39 }
 0x284   : > { %v1078_v35 = vadd.f32 %v1062_v43, %v724_v48 }
 0x287   : > { %v1015_v40 = vpop.f32.mrf.mxu2 }
 0x288   : > { %v1043_v32 = vmul.f32 %v1748_v20, %v1015_v40 }
 0x28a   : > { %v1063_v34 = vadd.f32 %v1754_v22, %v1043_v32 }
 0x28c   : > { %v1079_v25 = vadd.f32 %v1063_v34, %v725_v50 }
 0x28e   : > { %v1331_v27 = vpack.c.bf16 %v1079_v25, %v1078_v35 }
 0x290   : > { %1347 = vst [vmem:[%s1767_s13 + $0x28] sm:$0xff] %v1331_v27  }
 0x291 PF: > { %s22_s21 = sadd.s32 1, %s1400_s21  }
 0x292   : > { %p19_p4 = scmp.ge.s32.totalorder %s22_s21, 4  }
 0x294   :  { %21 = sbr.rel (!%p19_p4) target bundleno = 1 (0x1), region = 98 }

// kernel: pointmlp_encoder_forward.8
= control target key start
LH: loop header
LB: loop body
LE: loop exit
PB: predicated region body
PF: predicated region fallthrough
CT: control target
= control target key end

     0   :  { %s792_s27 = smov 0   ;;  %s887_s0 = inlined_call_operand.vmem [shape: bf16[64,128], index: 0, kind: input, shape index: {}]   ;;  %s888_s1 = inlined_call_operand.vmem [shape: f32[1,128], index: 1, kind: input, shape index: {}]   ;;  %s889_s2 = inlined_call_operand.vmem [shape: bf16[128,128], index: 2, kind: input, shape index: {}]   ;;  %s890_s3 = inlined_call_operand.vmem [shape: f32[1,128], index: 3, kind: input, shape index: {}]   ;;  %s891_s4 = inlined_call_operand.vmem [shape: f32[1,128], index: 4, kind: input, shape index: {}]   ;;  %s892_s5 = inlined_call_operand.vmem [shape: bf16[128,128], index: 5, kind: input, shape index: {}]   ;;  %s893_s6 = inlined_call_operand.vmem [shape: f32[1,128], index: 6, kind: input, shape index: {}]   ;;  %s894_s7 = inlined_call_operand.vmem [shape: f32[1,128], index: 7, kind: input, shape index: {}]   ;;  %s895_s8 = inlined_call_operand.vmem [shape: bf16[64,128], index: 8, kind: output, shape index: {}]  }
   0x1 LB: > { %s599_s28 = sadd.s32 4294967295, %s745_s27   ;;  %p603_p0 = scmp.ge.s32.totalorder %s745_s27, 1  ;;  %s745_s27 = sphi %s792_s27, %s18_s27  }
   0x2   : > { %p263_p1 = scmp.lt.s32.totalorder %s745_s27, 3 }
   0x4   : > { %p264_p2 = pnand %p603_p0, %p263_p1 }
   0x5   : > { %s604_s9 = sshll.u32 (!%p264_p2), %s599_s28, 2 }
   0x6   : > { %267 = sbr.rel (%p264_p2) target bundleno = 340 (0x154), region = 52  ;;  %p298_p3 = scmp.lt.s32.totalorder (!%p264_p2), %s604_s9, 7 }
   0xb   : > { %v681_v0 = vld [vmem:[%s889_s2 + $0x38] sm:$0xff]  ;;  %v680_v1 = vld [vmem:[%s889_s2 + $0x30] sm:$0xff]  ;;  %v679_v4 = vld [vmem:[%s889_s2 + $0x28] sm:$0xff]  ;;  %s897_s9 = smov (!%p298_p3, %s604_s9), 7 }
   0xc   : > { %391 = vmatpush.bf16.msra.mxu0 %v681_v0  ;;  %710 = vmatpush.bf16.msra.mxu2 %v681_v0  ;;  %v689_v2 = vld [vmem:[%s892_s5 + $0x38] sm:$0xff]  ;;  %v688_v3 = vld [vmem:[%s892_s5 + $0x30] sm:$0xff]  ;;  %v687_v5 = vld [vmem:[%s892_s5 + $0x28] sm:$0xff]  ;;  %s605_s22 = sshll.u32 %s897_s9, 2 }
   0xd   : > { %496 = vmatpush.bf16.msra.mxu1 %v689_v2  ;;  %718 = vmatpush.bf16.msra.mxu3 %v689_v2  ;;  %v678_v6 = vld [vmem:[%s889_s2 + $0x20] sm:$0xff]  ;;  %v677_v8 = vld [vmem:[%s889_s2 + $0x18] sm:$0xff]  ;;  %s301_s30 = scalar_lea.vmem %s887_s0, %s605_s22  ;;  %v676_v9 = vld [vmem:[%s889_s2 + $0x10] sm:$0xff]  ;;  %s307_s17 = scalar_lea.vmem %s895_s8, %s605_s22 }
   0xe   : > { %v686_v7 = vld [vmem:[%s892_s5 + $0x20] sm:$0xff]  ;;  %v708_v11 = vld [vmem:[%s301_s30 + $0x8] sm:$0xff]   ;;  %v685_v25 = vld [vmem:[%s892_s5 + $0x18] sm:$0xff] }
   0xf   : > { %v691_v10 = vld [vmem:[%s301_s30] sm:$0xff]   ;;  %v696_v15 = vunpack.c.l.bf16 %v708_v11  ;;  %v697_v16 = vunpack.c.h.bf16 %v708_v11  ;;  %v675_v17 = vld [vmem:[%s889_s2 + $0x8] sm:$0xff]  ;;  %v684_v26 = vld [vmem:[%s892_s5 + $0x10] sm:$0xff] }
  0x10   : > { %392 = vmatpush.bf16.msra.mxu0 %v680_v1  ;;  %711 = vmatpush.bf16.msra.mxu2 %v680_v1  ;;  %v692_v12 = vunpack.c.l.bf16 %v691_v10  ;;  %v693_v13 = vunpack.c.h.bf16 %v691_v10  ;;  %v734_v14 = vld [vmem:[%s888_s1] ss:$0 sm:$0xff]  ;;  %v683_v27 = vld [vmem:[%s892_s5 + $0x8] sm:$0xff] }
  0x11   : > { %497 = vmatpush.bf16.msra.mxu1 %v688_v3  ;;  %719 = vmatpush.bf16.msra.mxu3 %v688_v3  ;;  %v844_v20 = vmul.f32 %v734_v14, %v696_v15  ;;  %v846_v21 = vmul.f32 %v734_v14, %v697_v16  ;;  %v674_v22 = vld [vmem:[%s889_s2] sm:$0xff] }
  0x12   : > { %v321_v18 = vmul.f32 %v734_v14, %v692_v12  ;;  %v322_v19 = vmul.f32 %v734_v14, %v693_v13  ;;  %v682_v28 = vld [vmem:[%s892_s5] sm:$0xff] }
  0x13   : > { %v342_v24 = vpack.c.bf16 %v846_v21, %v844_v20  ;;  %v735_v30 = vld [vmem:[%s890_s3] ss:$0 sm:$0xff] }
  0x14   : > { %393 = vmatpush.bf16.msra.mxu0 %v679_v4  ;;  %712 = vmatpush.bf16.msra.mxu2 %v679_v4  ;;  %v341_v23 = vpack.c.bf16 %v322_v19, %v321_v18  ;;  %v736_v32 = vld [vmem:[%s891_s4] ss:$0 sm:$0xff] }
  0x15   : > { %498 = vmatpush.bf16.msra.mxu1 %v687_v5  ;;  %720 = vmatpush.bf16.msra.mxu3 %v687_v5  ;;  %v737_v50 = vld [vmem:[%s893_s6] ss:$0 sm:$0xff] }
  0x16   : > { %v738_v52 = vld [vmem:[%s894_s7] ss:$0 sm:$0xff] }
  0x18   : > { %394 = vmatpush.bf16.msra.mxu0 %v678_v6  ;;  %713 = vmatpush.bf16.msra.mxu2 %v678_v6 }
  0x19   : > { %499 = vmatpush.bf16.msra.mxu1 %v686_v7  ;;  %721 = vmatpush.bf16.msra.mxu3 %v686_v7 }
  0x1c   : > { %395 = vmatpush.bf16.msra.mxu0 %v677_v8  ;;  %714 = vmatpush.bf16.msra.mxu2 %v677_v8 }
  0x1d   : > { %500 = vmatpush.bf16.msra.mxu1 %v685_v25  ;;  %722 = vmatpush.bf16.msra.mxu3 %v685_v25 }
  0x20   : > { %396 = vmatpush.bf16.msra.mxu0 %v676_v9  ;;  %715 = vmatpush.bf16.msra.mxu2 %v676_v9 }
  0x21   : > { %501 = vmatpush.bf16.msra.mxu1 %v684_v26  ;;  %723 = vmatpush.bf16.msra.mxu3 %v684_v26 }
  0x24   : > { %397 = vmatpush.bf16.msra.mxu0 %v675_v17  ;;  %716 = vmatpush.bf16.msra.mxu2 %v675_v17 }
  0x25   : > { %502 = vmatpush.bf16.msra.mxu1 %v683_v27  ;;  %724 = vmatpush.bf16.msra.mxu3 %v683_v27 }
  0x28   : > { %398 = vmatpush.bf16.msra.mxu0 %v674_v22  ;;  %717 = vmatpush.bf16.msra.mxu2 %v674_v22 }
  0x29   : > { %503 = vmatpush.bf16.msra.mxu1 %v682_v28  ;;  %725 = vmatpush.bf16.msra.mxu3 %v682_v28 }
  0x2b   : > { %399 = vmatmul.bf16.vlgmr.msra.gmra.mxu0 %v341_v23  ;;  %404 = vmatmul.bf16.vlgmr.msra.gmra.mxu2 %v342_v24 }
  0xa8   : > { %v400_v29 = vpop.f32.mrf.mxu0 }
  0xa9   : > { %v414_v31 = vmul.f32 %v735_v30, %v400_v29 }
  0xab   : > { %v422_v34 = vadd.f32 %v736_v32, %v414_v31 }
  0xad   : > { %v426_v37 = vmax.f32 %v422_v34, 0.0 }
  0xae   : > { %v405_v33 = vpop.f32.mrf.mxu2 }
  0xaf   : > { %v416_v38 = vmul.f32 %v735_v30, %v405_v33 }
  0xb0   : > { %v402_v35 = vpop.f32.mrf.mxu0 }
  0xb1   : > { %v415_v36 = vmul.f32 %v735_v30, %v402_v35  ;;  %v424_v42 = vadd.f32 %v736_v32, %v416_v38 }
  0xb3   : > { %v423_v39 = vadd.f32 %v736_v32, %v415_v36  ;;  %v428_v46 = vmax.f32 %v424_v42, 0.0 }
  0xb5   : > { %v427_v40 = vmax.f32 %v423_v39, 0.0 }
  0xb6   : > { %v407_v41 = vpop.f32.mrf.mxu2 }
  0xb7   : > { %v417_v43 = vmul.f32 %v735_v30, %v407_v41  ;;  %v446_v44 = vpack.c.bf16 %v427_v40, %v426_v37 }
  0xb9   : > { %v425_v45 = vadd.f32 %v736_v32, %v417_v43  ;;  %504 = vmatmul.bf16.vlgmr.msra.gmra.mxu1 %v446_v44 }
  0xbb   : > { %v429_v47 = vmax.f32 %v425_v45, 0.0 }
  0xbd   : > { %v447_v48 = vpack.c.bf16 %v429_v47, %v428_v46 }
  0xbf   : > { %509 = vmatmul.bf16.vlgmr.msra.gmra.mxu3 %v447_v48 }
 0x136   : > { %v505_v49 = vpop.f32.mrf.mxu1 }
 0x137   : > { %v519_v51 = vmul.f32 %v737_v50, %v505_v49 }
 0x139   : > { %v527_v54 = vadd.f32 %v738_v52, %v519_v51 }
 0x13b   : > { %v531_v58 = vadd.f32 %v527_v54, %v321_v18 }
 0x13e   : > { %v507_v53 = vpop.f32.mrf.mxu1 }
 0x13f   : > { %v520_v55 = vmul.f32 %v737_v50, %v507_v53 }
 0x141   : > { %v528_v56 = vadd.f32 %v738_v52, %v520_v55 }
 0x142   : > { %v510_v57 = vpop.f32.mrf.mxu3 }
 0x143   : > { %v532_v59 = vadd.f32 %v528_v56, %v322_v19  ;;  %v521_v61 = vmul.f32 %v737_v50, %v510_v57 }
 0x145   : > { %v701_v60 = vpack.c.bf16 %v532_v59, %v531_v58  ;;  %v529_v63 = vadd.f32 %v738_v52, %v521_v61 }
 0x147   : > { %702 = vst [vmem:[%s307_s17] sm:$0xff] %v701_v60   ;;  %v533_v2 = vadd.f32 %v529_v63, %v844_v20 }
 0x14a   : > { %v512_v62 = vpop.f32.mrf.mxu3 }
 0x14b   : > { %v522_v0 = vmul.f32 %v737_v50, %v512_v62 }
 0x14d   : > { %v530_v1 = vadd.f32 %v738_v52, %v522_v0 }
 0x14f   : > { %v534_v3 = vadd.f32 %v530_v1, %v846_v21 }
 0x151   : > { %v706_v4 = vpack.c.bf16 %v534_v3, %v533_v2 }
 0x153   : > { %709 = vst [vmem:[%s307_s17 + $0x8] sm:$0xff] %v706_v4  }
 0x154 PF: > { %s18_s27 = sadd.s32 1, %s745_s27  }
 0x155   : > { %p15_p4 = scmp.ge.s32.totalorder %s18_s27, 4  }
 0x157   :  { %17 = sbr.rel (!%p15_p4) target bundleno = 1 (0x1), region = 82 }

// kernel: custom-call.7
= control target key start
LH: loop header
LB: loop body
LE: loop exit
PB: predicated region body
PF: predicated region fallthrough
CT: control target
= control target key end

     0   :  { %s6_s0 = inlined_call_operand.vmem [shape: f32[2,32], index: 0, kind: output, shape index: {}]  }

// kernel: pointmlp_encoder_forward.9
= control target key start
LH: loop header
LB: loop body
LE: loop exit
PB: predicated region body
PF: predicated region fallthrough
CT: control target
= control target key end

     0   :  { %s993_s13 = smov 0   ;;  %s1107_s0 = inlined_call_operand.vmem [shape: bf16[64,128], index: 0, kind: input, shape index: {}]   ;;  %s1108_s1 = inlined_call_operand.vmem [shape: bf16[128,128], index: 1, kind: input, shape index: {}]   ;;  %s1109_s2 = inlined_call_operand.vmem [shape: f32[1,128], index: 2, kind: input, shape index: {}]   ;;  %s1110_s3 = inlined_call_operand.vmem [shape: f32[1,128], index: 3, kind: input, shape index: {}]   ;;  %s1111_s4 = inlined_call_operand.vmem [shape: bf16[128,128], index: 4, kind: input, shape index: {}]   ;;  %s1112_s5 = inlined_call_operand.vmem [shape: f32[1,128], index: 5, kind: input, shape index: {}]   ;;  %s1113_s6 = inlined_call_operand.vmem [shape: f32[1,128], index: 6, kind: input, shape index: {}]   ;;  %s1114_s7 = inlined_call_operand.vmem [shape: bf16[128,128], index: 7, kind: input, shape index: {}]   ;;  %s1115_s8 = inlined_call_operand.vmem [shape: f32[1,128], index: 8, kind: input, shape index: {}]   ;;  %s1116_s9 = inlined_call_operand.vmem [shape: f32[1,128], index: 9, kind: input, shape index: {}]   ;;  %s1117_s10 = inlined_call_operand.vmem [shape: bf16[64,128], index: 10, kind: output, shape index: {}]  }
   0x1 LB: > { %s756_s14 = sadd.s32 4294967295, %s936_s13   ;;  %p760_p0 = scmp.ge.s32.totalorder %s936_s13, 1  ;;  %s936_s13 = sphi %s993_s13, %s20_s13  }
   0x2   : > { %p313_p1 = scmp.lt.s32.totalorder %s936_s13, 3 }
   0x4   : > { %p314_p2 = pnand %p760_p0, %p313_p1 }
   0x5   : > { %s761_s29 = sshll.u32 (!%p314_p2), %s756_s14, 2 }
   0x6   : > { %317 = sbr.rel (%p314_p2) target bundleno = 492 (0x1ec), region = 60  ;;  %p352_p3 = scmp.lt.s32.totalorder (!%p314_p2), %s761_s29, 7 }
   0xb   : > { %v880_v0 = vld [vmem:[%s1108_s1 + $0x38] sm:$0xff]  ;;  %v879_v1 = vld [vmem:[%s1108_s1 + $0x30] sm:$0xff]  ;;  %v878_v4 = vld [vmem:[%s1108_s1 + $0x28] sm:$0xff]  ;;  %s1119_s29 = smov (!%p352_p3, %s761_s29), 7 }
   0xc   : > { %443 = vmatpush.bf16.msra.mxu0 %v880_v0  ;;  %908 = vmatpush.bf16.msra.mxu3 %v880_v0  ;;  %v888_v2 = vld [vmem:[%s1111_s4 + $0x38] sm:$0xff]  ;;  %v887_v3 = vld [vmem:[%s1111_s4 + $0x30] sm:$0xff]  ;;  %v886_v5 = vld [vmem:[%s1111_s4 + $0x28] sm:$0xff]  ;;  %s762_s19 = sshll.u32 %s1119_s29, 2 }
   0xd   : > { %548 = vmatpush.bf16.msra.mxu1 %v888_v2  ;;  %v877_v6 = vld [vmem:[%s1108_s1 + $0x20] sm:$0xff]  ;;  %v876_v8 = vld [vmem:[%s1108_s1 + $0x18] sm:$0xff]  ;;  %v875_v9 = vld [vmem:[%s1108_s1 + $0x10] sm:$0xff]  ;;  %s355_s24 = scalar_lea.vmem %s1107_s0, %s762_s19  ;;  %s361_s30 = scalar_lea.vmem %s1117_s10, %s762_s19 }
   0xe   : > { %v885_v7 = vld [vmem:[%s1111_s4 + $0x20] sm:$0xff]  ;;  %v874_v10 = vld [vmem:[%s1108_s1 + $0x8] sm:$0xff]  ;;  %v884_v14 = vld [vmem:[%s1111_s4 + $0x18] sm:$0xff] }
   0xf   : > { %v873_v11 = vld [vmem:[%s1108_s1] sm:$0xff]  ;;  %v872_v13 = vld [vmem:[%s355_s24 + $0x8] sm:$0xff]  ;;  %v883_v15 = vld [vmem:[%s1111_s4 + $0x10] sm:$0xff] }
  0x10   : > { %444 = vmatpush.bf16.msra.mxu0 %v879_v1  ;;  %909 = vmatpush.bf16.msra.mxu3 %v879_v1  ;;  %v871_v12 = vld [vmem:[%s355_s24] sm:$0xff]  ;;  %v882_v16 = vld [vmem:[%s1111_s4 + $0x8] sm:$0xff]  ;;  %v896_v20 = vld [vmem:[%s1114_s7 + $0x38] sm:$0xff] }
  0x11   : > { %549 = vmatpush.bf16.msra.mxu1 %v887_v3  ;;  %v881_v17 = vld [vmem:[%s1111_s4] sm:$0xff]  ;;  %653 = vmatpush.bf16.msra.mxu2 %v896_v20  ;;  %v895_v21 = vld [vmem:[%s1114_s7 + $0x30] sm:$0xff]  ;;  %v894_v25 = vld [vmem:[%s1114_s7 + $0x28] sm:$0xff] }
  0x12   : > { %v924_v19 = vld [vmem:[%s1109_s2] ss:$0 sm:$0xff]  ;;  %v892_v42 = vld [vmem:[%s1114_s7 + $0x18] sm:$0xff]  ;;  %v891_v43 = vld [vmem:[%s1114_s7 + $0x10] sm:$0xff] }
  0x13   : > { %v925_v23 = vld [vmem:[%s1110_s3] ss:$0 sm:$0xff]  ;;  %v890_v44 = vld [vmem:[%s1114_s7 + $0x8] sm:$0xff] }
  0x14   : > { %445 = vmatpush.bf16.msra.mxu0 %v878_v4  ;;  %910 = vmatpush.bf16.msra.mxu3 %v878_v4  ;;  %v893_v30 = vld [vmem:[%s1114_s7 + $0x20] sm:$0xff] }
  0x15   : > { %550 = vmatpush.bf16.msra.mxu1 %v886_v5  ;;  %654 = vmatpush.bf16.msra.mxu2 %v895_v21  ;;  %v889_v45 = vld [vmem:[%s1114_s7] sm:$0xff] }
  0x16   : > { %v926_v47 = vld [vmem:[%s1112_s5] ss:$0 sm:$0xff] }
  0x17   : > { %v927_v49 = vld [vmem:[%s1113_s6] ss:$0 sm:$0xff] }
  0x18   : > { %446 = vmatpush.bf16.msra.mxu0 %v877_v6  ;;  %911 = vmatpush.bf16.msra.mxu3 %v877_v6  ;;  %v928_v3 = vld [vmem:[%s1115_s8] ss:$0 sm:$0xff] }
  0x19   : > { %551 = vmatpush.bf16.msra.mxu1 %v885_v7  ;;  %655 = vmatpush.bf16.msra.mxu2 %v894_v25  ;;  %v929_v5 = vld [vmem:[%s1116_s9] ss:$0 sm:$0xff] }
  0x1c   : > { %447 = vmatpush.bf16.msra.mxu0 %v876_v8  ;;  %912 = vmatpush.bf16.msra.mxu3 %v876_v8 }
  0x1d   : > { %552 = vmatpush.bf16.msra.mxu1 %v884_v14  ;;  %656 = vmatpush.bf16.msra.mxu2 %v893_v30 }
  0x20   : > { %448 = vmatpush.bf16.msra.mxu0 %v875_v9  ;;  %913 = vmatpush.bf16.msra.mxu3 %v875_v9 }
  0x21   : > { %553 = vmatpush.bf16.msra.mxu1 %v883_v15  ;;  %657 = vmatpush.bf16.msra.mxu2 %v892_v42 }
  0x24   : > { %449 = vmatpush.bf16.msra.mxu0 %v874_v10  ;;  %914 = vmatpush.bf16.msra.mxu3 %v874_v10 }
  0x25   : > { %554 = vmatpush.bf16.msra.mxu1 %v882_v16  ;;  %658 = vmatpush.bf16.msra.mxu2 %v891_v43 }
  0x28   : > { %450 = vmatpush.bf16.msra.mxu0 %v873_v11  ;;  %915 = vmatpush.bf16.msra.mxu3 %v873_v11 }
  0x29   : > { %555 = vmatpush.bf16.msra.mxu1 %v881_v17  ;;  %659 = vmatpush.bf16.msra.mxu2 %v890_v44 }
  0x2b   : > { %451 = vmatmul.bf16.vlgmr.msra.gmra.mxu0 %v871_v12  ;;  %456 = vmatmul.bf16.vlgmr.msra.gmra.mxu3 %v872_v13 }
  0x2d   : > { %660 = vmatpush.bf16.msra.mxu2 %v889_v45 }
  0xa8   : > { %v452_v18 = vpop.f32.mrf.mxu0 }
  0xa9   : > { %v466_v22 = vmul.f32 %v924_v19, %v452_v18 }
  0xab   : > { %v474_v27 = vadd.f32 %v925_v23, %v466_v22 }
  0xad   : > { %v478_v31 = vmax.f32 %v474_v27, 0.0 }
  0xae   : > { %v457_v24 = vpop.f32.mrf.mxu3 }
  0xaf   : > { %v468_v35 = vmul.f32 %v924_v19, %v457_v24 }
  0xb0   : > { %v454_v26 = vpop.f32.mrf.mxu0 }
  0xb1   : > { %v467_v28 = vmul.f32 %v924_v19, %v454_v26  ;;  %v476_v37 = vadd.f32 %v925_v23, %v468_v35 }
  0xb3   : > { %v475_v29 = vadd.f32 %v925_v23, %v467_v28  ;;  %v480_v39 = vmax.f32 %v476_v37, 0.0 }
  0xb5   : > { %v479_v32 = vmax.f32 %v475_v29, 0.0 }
  0xb6   : > { %v459_v34 = vpop.f32.mrf.mxu3 }
  0xb7   : > { %v498_v33 = vpack.c.bf16 %v479_v32, %v478_v31  ;;  %v469_v36 = vmul.f32 %v924_v19, %v459_v34 }
  0xb9   : > { %556 = vmatmul.bf16.vlgmr.msra.gmra.mxu1 %v498_v33  ;;  %v477_v38 = vadd.f32 %v925_v23, %v469_v36 }
  0xbb   : > { %v481_v40 = vmax.f32 %v477_v38, 0.0 }
  0xbd   : > { %v499_v41 = vpack.c.bf16 %v481_v40, %v480_v39 }
  0xc9   : > { %561 = vmatmul.bf16.gmra.mxu1 %v499_v41 }
 0x136   : > { %v557_v46 = vpop.f32.mrf.mxu1 }
 0x137   : > { %v571_v48 = vmul.f32 %v926_v47, %v557_v46 }
 0x139   : > { %v579_v51 = vadd.f32 %v927_v49, %v571_v48 }
 0x13b   : > { %v583_v54 = vmax.f32 %v579_v51, 0.0 }
 0x13e   : > { %v559_v50 = vpop.f32.mrf.mxu1 }
 0x13f   : > { %v572_v52 = vmul.f32 %v926_v47, %v559_v50 }
 0x141   : > { %v580_v53 = vadd.f32 %v927_v49, %v572_v52 }
 0x143   : > { %v584_v55 = vmax.f32 %v580_v53, 0.0 }
 0x145   : > { %v603_v56 = vpack.c.bf16 %v584_v55, %v583_v54 }
 0x146   : > { %v562_v57 = vpop.f32.mrf.mxu1 }
 0x147   : > { %661 = vmatmul.bf16.vlgmr.msra.gmra.mxu2 %v603_v56  ;;  %v573_v58 = vmul.f32 %v926_v47, %v562_v57 }
 0x149   : > { %v581_v60 = vadd.f32 %v927_v49, %v573_v58 }
 0x14b   : > { %v585_v63 = vmax.f32 %v581_v60, 0.0 }
 0x14e   : > { %v564_v59 = vpop.f32.mrf.mxu1 }
 0x14f   : > { %v574_v61 = vmul.f32 %v926_v47, %v564_v59 }
 0x151   : > { %v582_v62 = vadd.f32 %v927_v49, %v574_v61 }
 0x153   : > { %v586_v0 = vmax.f32 %v582_v62, 0.0 }
 0x155   : > { %v604_v1 = vpack.c.bf16 %v586_v0, %v585_v63 }
 0x157   : > { %666 = vmatmul.bf16.gmra.mxu2 %v604_v1 }
 0x1ca   : > { %v662_v2 = vpop.f32.mrf.mxu2 }
 0x1cb   : > { %v676_v4 = vmul.f32 %v928_v3, %v662_v2 }
 0x1cd   : > { %v684_v7 = vadd.f32 %v929_v5, %v676_v4 }
 0x1cf   : > { %v688_v10 = vadd.f32 %v684_v7, %v478_v31 }
 0x1d2   : > { %v664_v6 = vpop.f32.mrf.mxu2 }
 0x1d3   : > { %v677_v8 = vmul.f32 %v928_v3, %v664_v6 }
 0x1d5   : > { %v685_v9 = vadd.f32 %v929_v5, %v677_v8 }
 0x1d7   : > { %v689_v11 = vadd.f32 %v685_v9, %v479_v32 }
 0x1d9   : > { %v900_v12 = vpack.c.bf16 %v689_v11, %v688_v10 }
 0x1da   : > { %v667_v13 = vpop.f32.mrf.mxu2 }
 0x1db   : > { %901 = vst [vmem:[%s361_s30] sm:$0xff] %v900_v12   ;;  %v678_v14 = vmul.f32 %v928_v3, %v667_v13 }
 0x1dd   : > { %v686_v16 = vadd.f32 %v929_v5, %v678_v14 }
 0x1df   : > { %v690_v19 = vadd.f32 %v686_v16, %v480_v39 }
 0x1e2   : > { %v669_v15 = vpop.f32.mrf.mxu2 }
 0x1e3   : > { %v679_v17 = vmul.f32 %v928_v3, %v669_v15 }
 0x1e5   : > { %v687_v18 = vadd.f32 %v929_v5, %v679_v17 }
 0x1e7   : > { %v691_v20 = vadd.f32 %v687_v18, %v481_v40 }
 0x1e9   : > { %v905_v21 = vpack.c.bf16 %v691_v20, %v690_v19 }
 0x1eb   : > { %907 = vst [vmem:[%s361_s30 + $0x8] sm:$0xff] %v905_v21  }
 0x1ec PF: > { %s20_s13 = sadd.s32 1, %s936_s13  }
 0x1ed   : > { %p17_p4 = scmp.ge.s32.totalorder %s20_s13, 4  }
 0x1ef   :  { %19 = sbr.rel (!%p17_p4) target bundleno = 1 (0x1), region = 90 }

// kernel: pointmlp_encoder_forward.10
= control target key start
LH: loop header
LB: loop body
LE: loop exit
PB: predicated region body
PF: predicated region fallthrough
CT: control target
= control target key end

     0   :  { %s731_s27 = smov 0   ;;  %s818_s0 = inlined_call_operand.vmem [shape: bf16[32,128], index: 0, kind: input, shape index: {}]   ;;  %s819_s1 = inlined_call_operand.vmem [shape: f32[1,128], index: 1, kind: input, shape index: {}]   ;;  %s820_s2 = inlined_call_operand.vmem [shape: bf16[128,128], index: 2, kind: input, shape index: {}]   ;;  %s821_s3 = inlined_call_operand.vmem [shape: f32[1,128], index: 3, kind: input, shape index: {}]   ;;  %s822_s4 = inlined_call_operand.vmem [shape: f32[1,128], index: 4, kind: input, shape index: {}]   ;;  %s823_s5 = inlined_call_operand.vmem [shape: bf16[128,128], index: 5, kind: input, shape index: {}]   ;;  %s824_s6 = inlined_call_operand.vmem [shape: f32[1,128], index: 6, kind: input, shape index: {}]   ;;  %s825_s7 = inlined_call_operand.vmem [shape: f32[1,128], index: 7, kind: input, shape index: {}]   ;;  %s826_s8 = inlined_call_operand.vmem [shape: bf16[32,128], index: 8, kind: output, shape index: {}]  }
   0x1 LB: > { %s565_s28 = sadd.s32 4294967295, %s684_s27   ;;  %p569_p0 = scmp.ge.s32.totalorder %s684_s27, 1  ;;  %s684_s27 = sphi %s731_s27, %s18_s27  }
   0x2   : > { %p263_p1 = scmp.lt.s32.totalorder %s684_s27, 3 }
   0x4   : > { %p264_p2 = pnand %p569_p0, %p263_p1 }
   0x5   : > { %s570_s9 = sshll.u32 (!%p264_p2), %s565_s28, 1 }
   0x6   : > { %267 = sbr.rel (%p264_p2) target bundleno = 328 (0x148), region = 52  ;;  %p298_p3 = scmp.lt.s32.totalorder (!%p264_p2), %s570_s9, 3 }
   0xb   : > { %v647_v0 = vld [vmem:[%s820_s2 + $0x38] sm:$0xff]  ;;  %v646_v1 = vld [vmem:[%s820_s2 + $0x30] sm:$0xff]  ;;  %v645_v4 = vld [vmem:[%s820_s2 + $0x28] sm:$0xff]  ;;  %s828_s9 = smov (!%p298_p3, %s570_s9), 3 }
   0xc   : > { %384 = vmatpush.bf16.msra.mxu0 %v647_v0  ;;  %v655_v2 = vld [vmem:[%s823_s5 + $0x38] sm:$0xff]  ;;  %v654_v3 = vld [vmem:[%s823_s5 + $0x30] sm:$0xff]  ;;  %v653_v5 = vld [vmem:[%s823_s5 + $0x28] sm:$0xff]  ;;  %s571_s22 = sshll.u32 %s828_s9, 2 }
   0xd   : > { %477 = vmatpush.bf16.msra.mxu1 %v655_v2  ;;  %v644_v6 = vld [vmem:[%s820_s2 + $0x20] sm:$0xff]  ;;  %v643_v8 = vld [vmem:[%s820_s2 + $0x18] sm:$0xff]  ;;  %s301_s30 = scalar_lea.vmem %s818_s0, %s571_s22  ;;  %v642_v9 = vld [vmem:[%s820_s2 + $0x10] sm:$0xff]  ;;  %s307_s17 = scalar_lea.vmem %s826_s8, %s571_s22 }
   0xe   : > { %v652_v7 = vld [vmem:[%s823_s5 + $0x20] sm:$0xff]  ;;  %v641_v14 = vld [vmem:[%s820_s2 + $0x8] sm:$0xff]  ;;  %v651_v19 = vld [vmem:[%s823_s5 + $0x18] sm:$0xff] }
   0xf   : > { %v657_v10 = vld [vmem:[%s301_s30] sm:$0xff]   ;;  %v650_v20 = vld [vmem:[%s823_s5 + $0x10] sm:$0xff]  ;;  %v649_v21 = vld [vmem:[%s823_s5 + $0x8] sm:$0xff] }
  0x10   : > { %385 = vmatpush.bf16.msra.mxu0 %v646_v1  ;;  %v658_v11 = vunpack.c.l.bf16 %v657_v10  ;;  %v659_v12 = vunpack.c.h.bf16 %v657_v10  ;;  %v673_v13 = vld [vmem:[%s819_s1] ss:$0 sm:$0xff] }
  0x11   : > { %478 = vmatpush.bf16.msra.mxu1 %v654_v3  ;;  %v640_v17 = vld [vmem:[%s820_s2] sm:$0xff] }
  0x12   : > { %v317_v15 = vmul.f32 %v673_v13, %v658_v11  ;;  %v318_v16 = vmul.f32 %v673_v13, %v659_v12  ;;  %v648_v22 = vld [vmem:[%s823_s5] sm:$0xff] }
  0x13   : > { %v674_v24 = vld [vmem:[%s821_s3] ss:$0 sm:$0xff] }
  0x14   : > { %386 = vmatpush.bf16.msra.mxu0 %v645_v4  ;;  %v335_v18 = vpack.c.bf16 %v318_v16, %v317_v15  ;;  %v675_v26 = vld [vmem:[%s822_s4] ss:$0 sm:$0xff] }
  0x15   : > { %479 = vmatpush.bf16.msra.mxu1 %v653_v5  ;;  %v676_v35 = vld [vmem:[%s824_s6] ss:$0 sm:$0xff] }
  0x16   : > { %v677_v37 = vld [vmem:[%s825_s7] ss:$0 sm:$0xff] }
  0x18   : > { %387 = vmatpush.bf16.msra.mxu0 %v644_v6 }
  0x19   : > { %480 = vmatpush.bf16.msra.mxu1 %v652_v7 }
  0x1c   : > { %388 = vmatpush.bf16.msra.mxu0 %v643_v8 }
  0x1d   : > { %481 = vmatpush.bf16.msra.mxu1 %v651_v19 }
  0x20   : > { %389 = vmatpush.bf16.msra.mxu0 %v642_v9 }
  0x21   : > { %482 = vmatpush.bf16.msra.mxu1 %v650_v20 }
  0x24   : > { %390 = vmatpush.bf16.msra.mxu0 %v641_v14 }
  0x25   : > { %483 = vmatpush.bf16.msra.mxu1 %v649_v21 }
  0x28   : > { %391 = vmatpush.bf16.msra.mxu0 %v640_v17 }
  0x29   : > { %484 = vmatpush.bf16.msra.mxu1 %v648_v22 }
  0x2b   : > { %392 = vmatmul.bf16.vlgmr.msra.gmra.mxu0 %v335_v18 }
  0xa8   : > { %v393_v23 = vpop.f32.mrf.mxu0 }
  0xa9   : > { %v402_v25 = vmul.f32 %v674_v24, %v393_v23 }
  0xab   : > { %v408_v28 = vadd.f32 %v675_v26, %v402_v25 }
  0xad   : > { %v410_v31 = vmax.f32 %v408_v28, 0.0 }
  0xb0   : > { %v395_v27 = vpop.f32.mrf.mxu0 }
  0xb1   : > { %v403_v29 = vmul.f32 %v674_v24, %v395_v27 }
  0xb3   : > { %v409_v30 = vadd.f32 %v675_v26, %v403_v29 }
  0xb5   : > { %v411_v32 = vmax.f32 %v409_v30, 0.0 }
  0xb7   : > { %v428_v33 = vpack.c.bf16 %v411_v32, %v410_v31 }
  0xb9   : > { %485 = vmatmul.bf16.vlgmr.msra.gmra.mxu1 %v428_v33 }
 0x136   : > { %v486_v34 = vpop.f32.mrf.mxu1 }
 0x137   : > { %v495_v36 = vmul.f32 %v676_v35, %v486_v34 }
 0x139   : > { %v501_v39 = vadd.f32 %v677_v37, %v495_v36 }
 0x13b   : > { %v503_v42 = vadd.f32 %v501_v39, %v317_v15 }
 0x13e   : > { %v488_v38 = vpop.f32.mrf.mxu1 }
 0x13f   : > { %v496_v40 = vmul.f32 %v676_v35, %v488_v38 }
 0x141   : > { %v502_v41 = vadd.f32 %v677_v37, %v496_v40 }
 0x143   : > { %v504_v43 = vadd.f32 %v502_v41, %v318_v16 }
 0x145   : > { %v663_v44 = vpack.c.bf16 %v504_v43, %v503_v42 }
 0x147   : > { %664 = vst [vmem:[%s307_s17] sm:$0xff] %v663_v44  }
 0x148 PF: > { %s18_s27 = sadd.s32 1, %s684_s27  }
 0x149   : > { %p15_p4 = scmp.ge.s32.totalorder %s18_s27, 4  }
 0x14b   :  { %17 = sbr.rel (!%p15_p4) target bundleno = 1 (0x1), region = 82 }

// kernel: custom-call.8
= control target key start
LH: loop header
LB: loop body
LE: loop exit
PB: predicated region body
PF: predicated region fallthrough
CT: control target
= control target key end

     0   :  { %s6_s0 = inlined_call_operand.vmem [shape: f32[2,16], index: 0, kind: output, shape index: {}]  }

// kernel: pointmlp_encoder_forward.11
= control target key start
LH: loop header
LB: loop body
LE: loop exit
PB: predicated region body
PF: predicated region fallthrough
CT: control target
= control target key end

     0   :  { %s1620_s13 = smov 0   ;;  %s2175_s0 = inlined_call_operand.vmem [shape: bf16[32,128], index: 0, kind: input, shape index: {}]   ;;  %s2176_s1 = inlined_call_operand.vmem [shape: bf16[128,256], index: 1, kind: input, shape index: {}]   ;;  %s2177_s2 = inlined_call_operand.vmem [shape: f32[1,256], index: 2, kind: input, shape index: {}]   ;;  %s2178_s3 = inlined_call_operand.vmem [shape: f32[1,256], index: 3, kind: input, shape index: {}]   ;;  %s2179_s4 = inlined_call_operand.vmem [shape: bf16[256,256], index: 4, kind: input, shape index: {}]   ;;  %s2180_s5 = inlined_call_operand.vmem [shape: f32[1,256], index: 5, kind: input, shape index: {}]   ;;  %s2181_s6 = inlined_call_operand.vmem [shape: f32[1,256], index: 6, kind: input, shape index: {}]   ;;  %s2182_s7 = inlined_call_operand.vmem [shape: bf16[256,256], index: 7, kind: input, shape index: {}]   ;;  %s2183_s8 = inlined_call_operand.vmem [shape: f32[1,256], index: 8, kind: input, shape index: {}]   ;;  %s2184_s9 = inlined_call_operand.vmem [shape: f32[1,256], index: 9, kind: input, shape index: {}]   ;;  %s2185_s10 = inlined_call_operand.vmem [shape: bf16[32,256], index: 10, kind: output, shape index: {}]  }
   0x1 LB: > { %s1131_s14 = sadd.s32 4294967295, %s1563_s13   ;;  %p1135_p0 = scmp.ge.s32.totalorder %s1563_s13, 1  ;;  %s1563_s13 = sphi %s1620_s13, %s20_s13  }
   0x2   : > { %p313_p1 = scmp.lt.s32.totalorder %s1563_s13, 3 }
   0x4   : > { %p314_p2 = pnand %p1135_p0, %p313_p1 }
   0x5   : > { %s1702_s27 = sshll.u32 (!%p314_p2), %s1131_s14, 1 }
   0x6   : > { %317 = sbr.rel (%p314_p2) target bundleno = 489 (0x1e9), region = 60  ;;  %p353_p3 = scmp.lt.s32.totalorder (!%p314_p2), %s1702_s27, 3 }
   0xb   : > { %v1203_v0 = vld [vmem:[%s2176_s1 + $0x70] sm:$0xf]  ;;  %v1484_v1 = vld [vmem:[%s2176_s1 + $0x74] sm:$0xf0]  ;;  %v1483_v2 = vld [vmem:[%s2176_s1 + $0x74] sm:$0xf] }
   0xc   : > { %v1204_v3 = vor.u32 %v1484_v1, %v1203_v0  ;;  %v1205_v4 = vld [vmem:[%s2176_s1 + $0x78] sm:$0xf0]  ;;  %v1195_v5 = vld [vmem:[%s2176_s1 + $0x60] sm:$0xf]  ;;  %v1482_v6 = vld [vmem:[%s2176_s1 + $0x64] sm:$0xf0] }
   0xd   : > { %v1208_v7 = vor.u32 %v1483_v2, %v1205_v4  ;;  %v1481_v8 = vld [vmem:[%s2176_s1 + $0x64] sm:$0xf]  ;;  %v1197_v9 = vld [vmem:[%s2176_s1 + $0x68] sm:$0xf0]  ;;  %v1196_v10 = vor.u32 %v1482_v6, %v1195_v5  ;;  %v1187_v12 = vld [vmem:[%s2176_s1 + $0x50] sm:$0xf] }
   0xe   : > { %469 = vmatpush.bf16.msra.mxu0 %v1204_v3  ;;  %v1200_v11 = vor.u32 %v1481_v8, %v1197_v9  ;;  %v1480_v13 = vld [vmem:[%s2176_s1 + $0x54] sm:$0xf0]  ;;  %v1479_v14 = vld [vmem:[%s2176_s1 + $0x54] sm:$0xf]  ;;  %v1189_v15 = vld [vmem:[%s2176_s1 + $0x58] sm:$0xf0] }
   0xf   : > { %483 = vmatpush.bf16.msra.mxu1 %v1208_v7  ;;  %v1188_v16 = vor.u32 %v1480_v13, %v1187_v12  ;;  %v1192_v17 = vor.u32 %v1479_v14, %v1189_v15  ;;  %v1179_v18 = vld [vmem:[%s2176_s1 + $0x40] sm:$0xf]  ;;  %v1478_v19 = vld [vmem:[%s2176_s1 + $0x44] sm:$0xf0]  ;;  %v1477_v20 = vld [vmem:[%s2176_s1 + $0x44] sm:$0xf] }
  0x10   : > { %v1181_v21 = vld [vmem:[%s2176_s1 + $0x48] sm:$0xf0]  ;;  %v1180_v22 = vor.u32 %v1478_v19, %v1179_v18  ;;  %v1171_v23 = vld [vmem:[%s2176_s1 + $0x30] sm:$0xf]  ;;  %v1500_v25 = vld [vmem:[%s2179_s4 + $0x74] sm:$0xf0] }
  0x11   : > { %v1267_v24 = vld [vmem:[%s2179_s4 + $0x70] sm:$0xf]  ;;  %v1184_v26 = vor.u32 %v1477_v20, %v1181_v21  ;;  %v1476_v27 = vld [vmem:[%s2176_s1 + $0x34] sm:$0xf0]  ;;  %v1475_v31 = vld [vmem:[%s2176_s1 + $0x34] sm:$0xf] }
  0x12   : > { %470 = vmatpush.bf16.msra.mxu0 %v1196_v10  ;;  %v1268_v28 = vor.u32 %v1500_v25, %v1267_v24  ;;  %v1331_v29 = vld [vmem:[%s2179_s4 + $0xf0] sm:$0xf]  ;;  %v1516_v30 = vld [vmem:[%s2179_s4 + $0xf4] sm:$0xf0]  ;;  %v1173_v32 = vld [vmem:[%s2176_s1 + $0x38] sm:$0xf0]  ;;  %v1172_v36 = vor.u32 %v1476_v27, %v1171_v23 }
  0x13   : > { %484 = vmatpush.bf16.msra.mxu1 %v1200_v11  ;;  %v1332_v33 = vor.u32 %v1516_v30, %v1331_v29  ;;  %v1259_v34 = vld [vmem:[%s2179_s4 + $0x60] sm:$0xf]  ;;  %v1498_v35 = vld [vmem:[%s2179_s4 + $0x64] sm:$0xf0]  ;;  %v1176_v40 = vor.u32 %v1475_v31, %v1173_v32  ;;  %v1473_v44 = vld [vmem:[%s2176_s1 + $0x24] sm:$0xf] }
  0x14   : > { %715 = vmatpush.bf16.msra.mxu2 %v1268_v28  ;;  %v1260_v37 = vor.u32 %v1498_v35, %v1259_v34  ;;  %v1323_v38 = vld [vmem:[%s2179_s4 + $0xe0] sm:$0xf]  ;;  %v1514_v39 = vld [vmem:[%s2179_s4 + $0xe4] sm:$0xf0]  ;;  %v1165_v45 = vld [vmem:[%s2176_s1 + $0x28] sm:$0xf0] }
  0x15   : > { %729 = vmatpush.bf16.msra.mxu3 %v1332_v33  ;;  %v1163_v41 = vld [vmem:[%s2176_s1 + $0x20] sm:$0xf]  ;;  %v1474_v42 = vld [vmem:[%s2176_s1 + $0x24] sm:$0xf0]  ;;  %v1324_v43 = vor.u32 %v1514_v39, %v1323_v38  ;;  %v1251_v46 = vld [vmem:[%s2179_s4 + $0x50] sm:$0xf]  ;;  %v1168_v56 = vor.u32 %v1473_v44, %v1165_v45 }
  0x16   : > { %471 = vmatpush.bf16.msra.mxu0 %v1188_v16  ;;  %v1496_v47 = vld [vmem:[%s2179_s4 + $0x54] sm:$0xf0]  ;;  %v1315_v48 = vld [vmem:[%s2179_s4 + $0xd0] sm:$0xf]  ;;  %v1164_v50 = vor.u32 %v1474_v42, %v1163_v41  ;;  %v1471_v53 = vld [vmem:[%s2176_s1 + $0x14] sm:$0xf] }
  0x17   : > { %485 = vmatpush.bf16.msra.mxu1 %v1192_v17  ;;  %v1512_v49 = vld [vmem:[%s2179_s4 + $0xd4] sm:$0xf0]  ;;  %v1155_v51 = vld [vmem:[%s2176_s1 + $0x10] sm:$0xf]  ;;  %v1252_v54 = vor.u32 %v1496_v47, %v1251_v46  ;;  %s2187_s27 = smov (!%p353_p3, %s1702_s27), 3 }
  0x18   : > { %716 = vmatpush.bf16.msra.mxu2 %v1260_v37  ;;  %v1472_v52 = vld [vmem:[%s2176_s1 + $0x14] sm:$0xf0]  ;;  %v1316_v55 = vor.u32 %v1512_v49, %v1315_v48  ;;  %v1243_v57 = vld [vmem:[%s2179_s4 + $0x40] sm:$0xf]  ;;  %v1494_v58 = vld [vmem:[%s2179_s4 + $0x44] sm:$0xf0] }
  0x19   : > { %730 = vmatpush.bf16.msra.mxu3 %v1324_v43  ;;  %v1157_v59 = vld [vmem:[%s2176_s1 + $0x18] sm:$0xf0]  ;;  %v1307_v60 = vld [vmem:[%s2179_s4 + $0xc0] sm:$0xf]  ;;  %v1510_v61 = vld [vmem:[%s2179_s4 + $0xc4] sm:$0xf0]  ;;  %v1244_v62 = vor.u32 %v1494_v58, %v1243_v57  ;;  %v1156_v63 = vor.u32 %v1472_v52, %v1155_v51 }
  0x1a   : > { %472 = vmatpush.bf16.msra.mxu0 %v1180_v22  ;;  %v1147_v0 = vld [vmem:[%s2176_s1] sm:$0xf]  ;;  %v1308_v1 = vor.u32 %v1510_v61, %v1307_v60  ;;  %v1160_v2 = vor.u32 %v1471_v53, %v1157_v59  ;;  %v1470_v3 = vld [vmem:[%s2176_s1 + $0x4] sm:$0xf0]  ;;  %v1469_v4 = vld [vmem:[%s2176_s1 + $0x4] sm:$0xf] }
  0x1b   : > { %486 = vmatpush.bf16.msra.mxu1 %v1184_v26  ;;  %s1137_s19 = sshll.u32 %s2187_s27, 2  ;;  %v1149_v5 = vld [vmem:[%s2176_s1 + $0x8] sm:$0xf0]  ;;  %v1499_v6 = vld [vmem:[%s2179_s4 + $0x74] sm:$0xf]  ;;  %v1148_v10 = vor.u32 %v1470_v3, %v1147_v0  ;;  %s1467_s28 = sshll.u32 %s2187_s27, 3 }
  0x1c   : > { %717 = vmatpush.bf16.msra.mxu2 %v1252_v54  ;;  %v1269_v7 = vld [vmem:[%s2179_s4 + $0x78] sm:$0xf0]  ;;  %v1515_v8 = vld [vmem:[%s2179_s4 + $0xf4] sm:$0xf]  ;;  %s356_s15 = scalar_lea.vmem %s2175_s0, %s1137_s19  ;;  %v1152_v11 = vor.u32 %v1469_v4, %v1149_v5  ;;  %v1497_v14 = vld [vmem:[%s2179_s4 + $0x64] sm:$0xf]  ;;  %s363_s11 = scalar_lea.vmem %s2185_s10, %s1467_s28 }
  0x1d   : > { %731 = vmatpush.bf16.msra.mxu3 %v1316_v55  ;;  %v1333_v9 = vld [vmem:[%s2179_s4 + $0xf8] sm:$0xf0]  ;;  %v1272_v12 = vor.u32 %v1499_v6, %v1269_v7  ;;  %v1261_v15 = vld [vmem:[%s2179_s4 + $0x68] sm:$0xf0]  ;;  %v1468_v16 = vld [vmem:[%s356_s15] sm:$0xff] }
  0x1e   : > { %473 = vmatpush.bf16.msra.mxu0 %v1172_v36  ;;  %v1336_v13 = vor.u32 %v1515_v8, %v1333_v9  ;;  %v1513_v17 = vld [vmem:[%s2179_s4 + $0xe4] sm:$0xf]  ;;  %v1325_v18 = vld [vmem:[%s2179_s4 + $0xe8] sm:$0xf0]  ;;  %v1264_v19 = vor.u32 %v1497_v14, %v1261_v15  ;;  %v1495_v21 = vld [vmem:[%s2179_s4 + $0x54] sm:$0xf] }
  0x1f   : > { %487 = vmatpush.bf16.msra.mxu1 %v1176_v40  ;;  %v1328_v20 = vor.u32 %v1513_v17, %v1325_v18  ;;  %v1253_v22 = vld [vmem:[%s2179_s4 + $0x58] sm:$0xf0]  ;;  %v1511_v23 = vld [vmem:[%s2179_s4 + $0xd4] sm:$0xf]  ;;  %v1493_v27 = vld [vmem:[%s2179_s4 + $0x44] sm:$0xf] }
  0x20   : > { %718 = vmatpush.bf16.msra.mxu2 %v1244_v62  ;;  %v1317_v24 = vld [vmem:[%s2179_s4 + $0xd8] sm:$0xf0]  ;;  %v1256_v25 = vor.u32 %v1495_v21, %v1253_v22  ;;  %v1245_v28 = vld [vmem:[%s2179_s4 + $0x48] sm:$0xf0]  ;;  %v1509_v29 = vld [vmem:[%s2179_s4 + $0xc4] sm:$0xf] }
  0x21   : > { %732 = vmatpush.bf16.msra.mxu3 %v1308_v1  ;;  %v1320_v26 = vor.u32 %v1511_v23, %v1317_v24  ;;  %v1309_v30 = vld [vmem:[%s2179_s4 + $0xc8] sm:$0xf0]  ;;  %v1248_v31 = vor.u32 %v1493_v27, %v1245_v28  ;;  %v1235_v33 = vld [vmem:[%s2179_s4 + $0x30] sm:$0xf]  ;;  %v1492_v34 = vld [vmem:[%s2179_s4 + $0x34] sm:$0xf0] }
  0x22   : > { %474 = vmatpush.bf16.msra.mxu0 %v1164_v50  ;;  %v1312_v32 = vor.u32 %v1509_v29, %v1309_v30  ;;  %v1236_v35 = vor.u32 %v1492_v34, %v1235_v33  ;;  %v1299_v36 = vld [vmem:[%s2179_s4 + $0xb0] sm:$0xf]  ;;  %v1508_v37 = vld [vmem:[%s2179_s4 + $0xb4] sm:$0xf0]  ;;  %v1491_v39 = vld [vmem:[%s2179_s4 + $0x34] sm:$0xf] }
  0x23   : > { %488 = vmatpush.bf16.msra.mxu1 %v1168_v56  ;;  %v1300_v38 = vor.u32 %v1508_v37, %v1299_v36  ;;  %v1237_v40 = vld [vmem:[%s2179_s4 + $0x38] sm:$0xf0]  ;;  %v1507_v42 = vld [vmem:[%s2179_s4 + $0xb4] sm:$0xf]  ;;  %v1227_v45 = vld [vmem:[%s2179_s4 + $0x20] sm:$0xf] }
  0x24   : > { %719 = vmatpush.bf16.msra.mxu2 %v1236_v35  ;;  %v1240_v41 = vor.u32 %v1491_v39, %v1237_v40  ;;  %v1301_v43 = vld [vmem:[%s2179_s4 + $0xb8] sm:$0xf0]  ;;  %v1490_v46 = vld [vmem:[%s2179_s4 + $0x24] sm:$0xf0]  ;;  %v1291_v47 = vld [vmem:[%s2179_s4 + $0xa0] sm:$0xf] }
  0x25   : > { %733 = vmatpush.bf16.msra.mxu3 %v1300_v38  ;;  %v1304_v44 = vor.u32 %v1507_v42, %v1301_v43  ;;  %v1228_v48 = vor.u32 %v1490_v46, %v1227_v45  ;;  %v1506_v49 = vld [vmem:[%s2179_s4 + $0xa4] sm:$0xf0]  ;;  %v1489_v50 = vld [vmem:[%s2179_s4 + $0x24] sm:$0xf]  ;;  %v1229_v51 = vld [vmem:[%s2179_s4 + $0x28] sm:$0xf0] }
  0x26   : > { %475 = vmatpush.bf16.msra.mxu0 %v1156_v63  ;;  %v1292_v52 = vor.u32 %v1506_v49, %v1291_v47  ;;  %v1232_v53 = vor.u32 %v1489_v50, %v1229_v51  ;;  %v1505_v54 = vld [vmem:[%s2179_s4 + $0xa4] sm:$0xf]  ;;  %v1293_v55 = vld [vmem:[%s2179_s4 + $0xa8] sm:$0xf0]  ;;  %v1219_v57 = vld [vmem:[%s2179_s4 + $0x10] sm:$0xf] }
  0x27   : > { %489 = vmatpush.bf16.msra.mxu1 %v1160_v2  ;;  %v1296_v56 = vor.u32 %v1505_v54, %v1293_v55  ;;  %v1488_v58 = vld [vmem:[%s2179_s4 + $0x14] sm:$0xf0]  ;;  %v1283_v59 = vld [vmem:[%s2179_s4 + $0x90] sm:$0xf]  ;;  %v1487_v62 = vld [vmem:[%s2179_s4 + $0x14] sm:$0xf] }
  0x28   : > { %720 = vmatpush.bf16.msra.mxu2 %v1228_v48  ;;  %v1220_v60 = vor.u32 %v1488_v58, %v1219_v57  ;;  %v1504_v61 = vld [vmem:[%s2179_s4 + $0x94] sm:$0xf0]  ;;  %v1221_v63 = vld [vmem:[%s2179_s4 + $0x18] sm:$0xf0]  ;;  %v1503_v2 = vld [vmem:[%s2179_s4 + $0x94] sm:$0xf] }
  0x29   : > { %734 = vmatpush.bf16.msra.mxu3 %v1292_v52  ;;  %v1284_v0 = vor.u32 %v1504_v61, %v1283_v59  ;;  %v1224_v1 = vor.u32 %v1487_v62, %v1221_v63  ;;  %v1285_v3 = vld [vmem:[%s2179_s4 + $0x98] sm:$0xf0]  ;;  %v1211_v5 = vld [vmem:[%s2179_s4] sm:$0xf]  ;;  %v1486_v6 = vld [vmem:[%s2179_s4 + $0x4] sm:$0xf0] }
  0x2a   : > { %476 = vmatpush.bf16.msra.mxu0 %v1148_v10  ;;  %v1288_v4 = vor.u32 %v1503_v2, %v1285_v3  ;;  %v1275_v7 = vld [vmem:[%s2179_s4 + $0x80] sm:$0xf]  ;;  %v1212_v8 = vor.u32 %v1486_v6, %v1211_v5  ;;  %v1502_v9 = vld [vmem:[%s2179_s4 + $0x84] sm:$0xf0]  ;;  %v1485_v10 = vld [vmem:[%s2179_s4 + $0x4] sm:$0xf] }
  0x2b   : > { %490 = vmatpush.bf16.msra.mxu1 %v1152_v11  ;;  %v1213_v11 = vld [vmem:[%s2179_s4 + $0x8] sm:$0xf0]  ;;  %v1501_v14 = vld [vmem:[%s2179_s4 + $0x84] sm:$0xf]  ;;  %v1459_v17 = vld [vmem:[%s2182_s7 + $0xf0] sm:$0xf] }
  0x2c   : > { %721 = vmatpush.bf16.msra.mxu2 %v1220_v60  ;;  %v1277_v15 = vld [vmem:[%s2179_s4 + $0x88] sm:$0xf0]  ;;  %v1548_v18 = vld [vmem:[%s2182_s7 + $0xf4] sm:$0xf0]  ;;  %v1461_v21 = vld [vmem:[%s2182_s7 + $0xf8] sm:$0xf0] }
  0x2d   : > { %477 = vmatmul.bf16.vlgmr.msra.gmra.mxu0 %v1468_v16  ;;  %735 = vmatpush.bf16.msra.mxu3 %v1284_v0  ;;  %v1451_v22 = vld [vmem:[%s2182_s7 + $0xe0] sm:$0xf]  ;;  %v1546_v23 = vld [vmem:[%s2182_s7 + $0xe4] sm:$0xf0]  ;;  %v1395_v27 = vld [vmem:[%s2182_s7 + $0x70] sm:$0xf] }
  0x2e   : > { %743 = vmatpush.bf16.msrb.mxu0 %v1272_v12  ;;  %491 = vmatmul.bf16.vlgmr.msra.gmra.mxu1 %v1468_v16  ;;  %v1276_v12 = vor.u32 %v1502_v9, %v1275_v7  ;;  %v1280_v16 = vor.u32 %v1501_v14, %v1277_v15  ;;  %v1452_v28 = vor.u32 %v1546_v23, %v1451_v22  ;;  %v1532_v29 = vld [vmem:[%s2182_s7 + $0x74] sm:$0xf0]  ;;  %v1531_v30 = vld [vmem:[%s2182_s7 + $0x74] sm:$0xf]  ;;  %v1443_v35 = vld [vmem:[%s2182_s7 + $0xd0] sm:$0xf] }
  0x2f   : > { %757 = vmatpush.bf16.msrb.mxu1 %v1336_v13  ;;  %v1216_v13 = vor.u32 %v1485_v10, %v1213_v11  ;;  %v1396_v33 = vor.u32 %v1532_v29, %v1395_v27  ;;  %v1544_v36 = vld [vmem:[%s2182_s7 + $0xd4] sm:$0xf0]  ;;  %v1543_v37 = vld [vmem:[%s2182_s7 + $0xd4] sm:$0xf]  ;;  %v1445_v38 = vld [vmem:[%s2182_s7 + $0xd8] sm:$0xf0] }
  0x30   : > { %722 = vmatpush.bf16.msra.mxu2 %v1212_v8  ;;  %v1387_v39 = vld [vmem:[%s2182_s7 + $0x60] sm:$0xf]  ;;  %v1530_v40 = vld [vmem:[%s2182_s7 + $0x64] sm:$0xf0]  ;;  %v1529_v42 = vld [vmem:[%s2182_s7 + $0x64] sm:$0xf]  ;;  %v1448_v46 = vor.u32 %v1543_v37, %v1445_v38 }
  0x31   : > { %736 = vmatpush.bf16.msra.mxu3 %v1276_v12  ;;  %v1389_v43 = vld [vmem:[%s2182_s7 + $0x68] sm:$0xf0]  ;;  %v497_v47 = vld [vmem:[%s2177_s2] sm:$0x3]  ;;  %v1542_v8 = vld [vmem:[%s2182_s7 + $0xc4] sm:$0xf0] }
  0x32   : > { %744 = vmatpush.bf16.msrb.mxu0 %v1264_v19  ;;  %v1547_v19 = vld [vmem:[%s2182_s7 + $0xf4] sm:$0xf]  ;;  %v1392_v45 = vor.u32 %v1529_v42, %v1389_v43  ;;  %v499_v49 = vperm.slane %v497_v47, 0  ;;  %v507_v51 = vld [vmem:[%s2178_s3] sm:$0x3]  ;;  %v500_v52 = vperm.slane %v497_v47, 1 }
  0x33   : > { %758 = vmatpush.bf16.msrb.mxu1 %v1328_v20  ;;  %v1460_v20 = vor.u32 %v1548_v18, %v1459_v17  ;;  %v1464_v24 = vor.u32 %v1547_v19, %v1461_v21  ;;  %v509_v54 = vperm.slane %v507_v51, 0  ;;  %v1435_v7 = vld [vmem:[%s2182_s7 + $0xc0] sm:$0xf]  ;;  %v1541_v9 = vld [vmem:[%s2182_s7 + $0xc4] sm:$0xf] }
  0x34   : > { %989 = vmatpush.bf16.msrb.mxu2 %v1396_v33  ;;  %v1436_v10 = vor.u32 %v1542_v8, %v1435_v7  ;;  %v1437_v11 = vld [vmem:[%s2182_s7 + $0xc8] sm:$0xf0]  ;;  %v1528_v14 = vld [vmem:[%s2182_s7 + $0x54] sm:$0xf0]  ;;  %v1527_v15 = vld [vmem:[%s2182_s7 + $0x54] sm:$0xf] }
  0x35   : > { %1003 = vmatpush.bf16.msrb.mxu3 %v1460_v20  ;;  %v1440_v12 = vor.u32 %v1541_v9, %v1437_v11  ;;  %v1381_v17 = vld [vmem:[%s2182_s7 + $0x58] sm:$0xf0]  ;;  %v1427_v19 = vld [vmem:[%s2182_s7 + $0xb0] sm:$0xf]  ;;  %v1540_v20 = vld [vmem:[%s2182_s7 + $0xb4] sm:$0xf0] }
  0x36   : > { %745 = vmatpush.bf16.msrb.mxu0 %v1256_v25  ;;  %v1545_v25 = vld [vmem:[%s2182_s7 + $0xe4] sm:$0xf]  ;;  %v1384_v18 = vor.u32 %v1527_v15, %v1381_v17  ;;  %v1428_v21 = vor.u32 %v1540_v20, %v1427_v19  ;;  %v1539_v22 = vld [vmem:[%s2182_s7 + $0xb4] sm:$0xf]  ;;  %v1429_v23 = vld [vmem:[%s2182_s7 + $0xb8] sm:$0xf0] }
  0x37   : > { %759 = vmatpush.bf16.msrb.mxu1 %v1320_v26  ;;  %v1453_v26 = vld [vmem:[%s2182_s7 + $0xe8] sm:$0xf0]  ;;  %v1537_v33 = vld [vmem:[%s2182_s7 + $0xa4] sm:$0xf]  ;;  %v1363_v37 = vld [vmem:[%s2182_s7 + $0x30] sm:$0xf] }
  0x38   : > { %v1373_v29 = vld [vmem:[%s2182_s7 + $0x48] sm:$0xf0]  ;;  %v1524_v38 = vld [vmem:[%s2182_s7 + $0x34] sm:$0xf0]  ;;  %v1411_v43 = vld [vmem:[%s2182_s7 + $0x90] sm:$0xf] }
  0x39   : > { %1004 = vmatpush.bf16.msrb.mxu3 %v1452_v28  ;;  %v1525_v28 = vld [vmem:[%s2182_s7 + $0x44] sm:$0xf]  ;;  %v1413_v47 = vld [vmem:[%s2182_s7 + $0x98] sm:$0xf0]  ;;  %v1519_v7 = vld [vmem:[%s2182_s7 + $0x14] sm:$0xf] }
  0x3a   : > { %746 = vmatpush.bf16.msrb.mxu0 %v1248_v31  ;;  %v1397_v31 = vld [vmem:[%s2182_s7 + $0x78] sm:$0xf0]  ;;  %v1339_v11 = vld [vmem:[%s2182_s7] sm:$0xf]  ;;  %v1341_v15 = vld [vmem:[%s2182_s7 + $0x8] sm:$0xf0] }
  0x3b   : > { %760 = vmatpush.bf16.msrb.mxu1 %v1312_v32  ;;  %v1456_v32 = vor.u32 %v1545_v25, %v1453_v26  ;;  %v1400_v34 = vor.u32 %v1531_v30, %v1397_v31  ;;  %v1371_v25 = vld [vmem:[%s2182_s7 + $0x40] sm:$0xf]  ;;  %v1526_v26 = vld [vmem:[%s2182_s7 + $0x44] sm:$0xf0]  ;;  %v1376_v30 = vor.u32 %v1525_v28, %v1373_v29  ;;  %v1349_v9 = vld [vmem:[%s2182_s7 + $0x18] sm:$0xf0] }
  0x3c   : > { %v1372_v27 = vor.u32 %v1526_v26, %v1371_v25  ;;  %v1419_v31 = vld [vmem:[%s2182_s7 + $0xa0] sm:$0xf] }
  0x3d   : > { %v771_v19 = vld [vmem:[%s2180_s5] sm:$0x3] }
  0x3e   : > { %747 = vmatpush.bf16.msrb.mxu0 %v1240_v41  ;;  %v1388_v41 = vor.u32 %v1530_v40, %v1387_v39  ;;  %v1364_v39 = vor.u32 %v1524_v38, %v1363_v37  ;;  %v1523_v40 = vld [vmem:[%s2182_s7 + $0x34] sm:$0xf] }
  0x3f   : > { %761 = vmatpush.bf16.msrb.mxu1 %v1304_v44  ;;  %v1444_v44 = vor.u32 %v1544_v36, %v1443_v35  ;;  %v1421_v35 = vld [vmem:[%s2182_s7 + $0xa8] sm:$0xf0] }
  0x40   : > { %990 = vmatpush.bf16.msrb.mxu2 %v1388_v41  ;;  %v1424_v36 = vor.u32 %v1537_v33, %v1421_v35  ;;  %v1365_v41 = vld [vmem:[%s2182_s7 + $0x38] sm:$0xf0] }
  0x41   : > { %1005 = vmatpush.bf16.msrb.mxu3 %v1444_v44  ;;  %v1368_v42 = vor.u32 %v1523_v40, %v1365_v41  ;;  %v1536_v44 = vld [vmem:[%s2182_s7 + $0x94] sm:$0xf0] }
  0x42   : > { %748 = vmatpush.bf16.msrb.mxu0 %v1232_v53 }
  0x43   : > { %762 = vmatpush.bf16.msrb.mxu1 %v1296_v56  ;;  %v510_v56 = vperm.slane %v507_v51, 1  ;;  %v1521_v51 = vld [vmem:[%s2182_s7 + $0x24] sm:$0xf] }
  0x45   : > { %1006 = vmatpush.bf16.msrb.mxu3 %v1436_v10  ;;  %v1352_v10 = vor.u32 %v1519_v7, %v1349_v9 }
  0x46   : > { %749 = vmatpush.bf16.msrb.mxu0 %v1224_v1 }
  0x47   : > { %763 = vmatpush.bf16.msrb.mxu1 %v1288_v4 }
  0x49   : > { %1007 = vmatpush.bf16.msrb.mxu3 %v1428_v21  ;;  %v774_v21 = vperm.slane %v771_v19, 1 }
  0x4a   : > { %750 = vmatpush.bf16.msrb.mxu0 %v1216_v13  ;;  %v1379_v13 = vld [vmem:[%s2182_s7 + $0x50] sm:$0xf] }
  0x4b   : > { %764 = vmatpush.bf16.msrb.mxu1 %v1280_v16  ;;  %v1380_v16 = vor.u32 %v1528_v14, %v1379_v13  ;;  %v1517_v13 = vld [vmem:[%s2182_s7 + $0x4] sm:$0xf] }
  0x4d   : > { %991 = vmatpush.bf16.msrb.mxu2 %v1380_v16  ;;  %v1344_v16 = vor.u32 %v1517_v13, %v1341_v15 }
  0x4e   : > { %1017 = vmatpush.bf16.msra.mxu0 %v1400_v34 }
  0x4f   : > { %1031 = vmatpush.bf16.msra.mxu1 %v1464_v24  ;;  %v1432_v24 = vor.u32 %v1539_v22, %v1429_v23  ;;  %v781_v22 = vld [vmem:[%s2181_s6] sm:$0x3] }
  0x50   : > { %v784_v26 = vperm.slane %v781_v22, 1  ;;  %v783_v35 = vperm.slane %v781_v22, 0 }
  0x51   : > { %992 = vmatpush.bf16.msrb.mxu2 %v1372_v27 }
  0x52   : > { %1018 = vmatpush.bf16.msra.mxu0 %v1392_v45  ;;  %v1412_v45 = vor.u32 %v1536_v44, %v1411_v43 }
  0x53   : > { %1032 = vmatpush.bf16.msra.mxu1 %v1456_v32  ;;  %v1538_v32 = vld [vmem:[%s2182_s7 + $0xa4] sm:$0xf0] }
  0x54   : > { %v1420_v34 = vor.u32 %v1538_v32, %v1419_v31 }
  0x55   : > { %993 = vmatpush.bf16.msrb.mxu2 %v1364_v39 }
  0x56   : > { %1019 = vmatpush.bf16.msra.mxu0 %v1384_v18  ;;  %1008 = vmatpush.bf16.msrb.mxu3 %v1420_v34 }
  0x57   : > { %1033 = vmatpush.bf16.msra.mxu1 %v1448_v46  ;;  %v1535_v46 = vld [vmem:[%s2182_s7 + $0x94] sm:$0xf] }
  0x5a   : > { %1020 = vmatpush.bf16.msra.mxu0 %v1376_v30  ;;  %1009 = vmatpush.bf16.msrb.mxu3 %v1412_v45  ;;  %v773_v30 = vperm.slane %v771_v19, 0 }
  0x5b   : > { %1034 = vmatpush.bf16.msra.mxu1 %v1440_v12  ;;  %v1518_v12 = vld [vmem:[%s2182_s7 + $0x4] sm:$0xf0] }
  0x5c   : > { %v1340_v14 = vor.u32 %v1518_v12, %v1339_v11 }
  0x5e   : > { %1021 = vmatpush.bf16.msra.mxu0 %v1368_v42 }
  0x5f   : > { %1035 = vmatpush.bf16.msra.mxu1 %v1432_v24 }
  0x63   : > { %1036 = vmatpush.bf16.msra.mxu1 %v1424_v36 }
  0xaa   : > { %v478_v48 = vpop.f32.mrf.mxu0 }
  0xab   : > { %v492_v50 = vpop.f32.mrf.mxu1  ;;  %v503_v53 = vmul.f32 %v499_v49, %v478_v48  ;;  %v1416_v48 = vor.u32 %v1535_v46, %v1413_v47 }
  0xac   : > { %v504_v55 = vmul.f32 %v500_v52, %v492_v50  ;;  %v1522_v50 = vld [vmem:[%s2182_s7 + $0x24] sm:$0xf0] }
  0xad   : > { %v1996_v58 = vadd.f32 %v509_v54, %v503_v53  ;;  %v1357_v53 = vld [vmem:[%s2182_s7 + $0x28] sm:$0xf0]  ;;  %1037 = vmatpush.bf16.msra.mxu1 %v1416_v48 }
  0xae   : > { %v1998_v61 = vadd.f32 %v510_v56, %v504_v55  ;;  %v1403_v55 = vld [vmem:[%s2182_s7 + $0x80] sm:$0xf] }
  0xaf   : > { %v517_v1 = vmax.f32 %v1996_v58, 0.0 }
  0xb0   : > { %v518_v3 = vmax.f32 %v1998_v61, 0.0 }
  0xb2   : > { %v480_v57 = vpop.f32.mrf.mxu0 }
  0xb3   : > { %v505_v59 = vmul.f32 %v499_v49, %v480_v57  ;;  %v494_v60 = vpop.f32.mrf.mxu1  ;;  %v1355_v49 = vld [vmem:[%s2182_s7 + $0x20] sm:$0xf]  ;;  %v1533_v57 = vld [vmem:[%s2182_s7 + $0x84] sm:$0xf] }
  0xb4   : > { %v506_v62 = vmul.f32 %v500_v52, %v494_v60  ;;  %v1356_v52 = vor.u32 %v1522_v50, %v1355_v49  ;;  %v1405_v60 = vld [vmem:[%s2182_s7 + $0x88] sm:$0xf0]  ;;  %v1045_v50 = vld [vmem:[%s2183_s8] sm:$0x3] }
  0xb5   : > { %v2000_v63 = vadd.f32 %v509_v54, %v505_v59  ;;  %v1360_v54 = vor.u32 %v1521_v51, %v1357_v53  ;;  %v1048_v53 = vperm.slane %v1045_v50, 1 }
  0xb6   : > { %v2002_v0 = vadd.f32 %v510_v56, %v506_v62  ;;  %v1534_v56 = vld [vmem:[%s2182_s7 + $0x84] sm:$0xf0]  ;;  %994 = vmatpush.bf16.msrb.mxu2 %v1356_v52  ;;  %v1408_v62 = vor.u32 %v1533_v57, %v1405_v60 }
  0xb7   : > { %v519_v2 = vmax.f32 %v2000_v63, 0.0  ;;  %v1404_v59 = vor.u32 %v1534_v56, %v1403_v55  ;;  %1022 = vmatpush.bf16.msra.mxu0 %v1360_v54  ;;  %v1055_v54 = vld [vmem:[%s2184_s9] sm:$0x3] }
  0xb8   : > { %v520_v4 = vmax.f32 %v2002_v0, 0.0  ;;  %1038 = vmatpush.bf16.msra.mxu1 %v1408_v62  ;;  %v1058_v57 = vperm.slane %v1055_v54, 1 }
  0xb9   : > { %v553_v5 = vpack.c.bf16 %v519_v2, %v517_v1  ;;  %1010 = vmatpush.bf16.msrb.mxu3 %v1404_v59  ;;  %v1047_v59 = vperm.slane %v1045_v50, 0 }
  0xba   : > { %v554_v6 = vpack.c.bf16 %v520_v4, %v518_v3 }
  0xbb   : > { %723 = vmatmul.bf16.vlgmr.msra.gmra.mxu2 %v553_v5  ;;  %751 = vmatmul.bf16.vlgmr.msrb.gmra.mxu0 %v553_v5  ;;  %v1347_v5 = vld [vmem:[%s2182_s7 + $0x10] sm:$0xf] }
  0xbc   : > { %737 = vmatmul.bf16.vlgmr.msra.gmra.mxu3 %v554_v6  ;;  %765 = vmatmul.bf16.vlgmr.msrb.gmra.mxu1 %v554_v6  ;;  %v1520_v6 = vld [vmem:[%s2182_s7 + $0x14] sm:$0xf0] }
  0xbd   : > { %v1348_v8 = vor.u32 %v1520_v6, %v1347_v5  ;;  %1023 = vmatpush.bf16.msra.mxu0 %v1352_v10  ;;  %v1057_v5 = vperm.slane %v1055_v54, 0 }
  0xbf   : > { %995 = vmatpush.bf16.msrb.mxu2 %v1348_v8 }
  0xc1   : > { %1024 = vmatpush.bf16.msra.mxu0 %v1344_v16 }
  0xc3   : > { %996 = vmatpush.bf16.msrb.mxu2 %v1340_v14 }
 0x138   : > { %v752_v17 = vpop.f32.mrf.mxu0 }
 0x139   : > { %v766_v18 = vpop.f32.mrf.mxu1 }
 0x13a   : > { %v767_v20 = vadd.f32 %v766_v18, %v752_v17 }
 0x13c   : > { %v778_v25 = vmul.f32 %v774_v21, %v767_v20 }
 0x13e   : > { %v724_v23 = vpop.f32.mrf.mxu2  ;;  %v788_v32 = vadd.f32 %v784_v26, %v778_v25 }
 0x13f   : > { %v738_v24 = vpop.f32.mrf.mxu3 }
 0x140   : > { %v754_v27 = vpop.f32.mrf.mxu0  ;;  %v739_v29 = vadd.f32 %v738_v24, %v724_v23  ;;  %v792_v39 = vmax.f32 %v788_v32, 0.0 }
 0x141   : > { %v768_v28 = vpop.f32.mrf.mxu1 }
 0x142   : > { %v769_v31 = vadd.f32 %v768_v28, %v754_v27  ;;  %v777_v34 = vmul.f32 %v773_v30, %v739_v29 }
 0x144   : > { %v780_v33 = vmul.f32 %v774_v21, %v769_v31  ;;  %v787_v42 = vadd.f32 %v783_v35, %v777_v34 }
 0x146   : > { %v790_v36 = vadd.f32 %v784_v26, %v780_v33  ;;  %v726_v37 = vpop.f32.mrf.mxu2  ;;  %v791_v46 = vmax.f32 %v787_v42, 0.0 }
 0x147   : > { %v740_v38 = vpop.f32.mrf.mxu3 }
 0x148   : > { %v794_v40 = vmax.f32 %v790_v36, 0.0  ;;  %v741_v41 = vadd.f32 %v740_v38, %v726_v37 }
 0x14a   : > { %v779_v43 = vmul.f32 %v773_v30, %v741_v41  ;;  %v828_v44 = vpack.c.bf16 %v794_v40, %v792_v39 }
 0x14c   : > { %v789_v45 = vadd.f32 %v783_v35, %v779_v43  ;;  %1011 = vmatmul.bf16.vlgmr.msrb.gmra.mxu3 %v828_v44  ;;  %1039 = vmatmul.bf16.vlgmr.msra.gmra.mxu1 %v828_v44 }
 0x14e   : > { %v793_v47 = vmax.f32 %v789_v45, 0.0 }
 0x150   : > { %v827_v48 = vpack.c.bf16 %v793_v47, %v791_v46 }
 0x152   : > { %997 = vmatmul.bf16.vlgmr.msrb.gmra.mxu2 %v827_v48  ;;  %1025 = vmatmul.bf16.vlgmr.msra.gmra.mxu0 %v827_v48 }
 0x1c9   : > { %v1040_v49 = vpop.f32.mrf.mxu1 }
 0x1cf   : > { %v1026_v51 = vpop.f32.mrf.mxu0  ;;  %v1012_v55 = vpop.f32.mrf.mxu3 }
 0x1d0   : > { %v1041_v52 = vadd.f32 %v1040_v49, %v1026_v51 }
 0x1d1   : > { %v1042_v6 = vpop.f32.mrf.mxu1 }
 0x1d2   : > { %v1052_v56 = vmul.f32 %v1048_v53, %v1041_v52 }
 0x1d4   : > { %v1062_v8 = vadd.f32 %v1058_v57, %v1052_v56 }
 0x1d5   : > { %v998_v60 = vpop.f32.mrf.mxu2 }
 0x1d6   : > { %v1013_v62 = vadd.f32 %v1012_v55, %v998_v60  ;;  %v1066_v12 = vadd.f32 %v1062_v8, %v518_v3 }
 0x1d7   : > { %v1028_v7 = vpop.f32.mrf.mxu0  ;;  %v1014_v15 = vpop.f32.mrf.mxu3 }
 0x1d8   : > { %v1051_v9 = vmul.f32 %v1047_v59, %v1013_v62  ;;  %v1043_v10 = vadd.f32 %v1042_v6, %v1028_v7 }
 0x1da   : > { %v1061_v11 = vadd.f32 %v1057_v5, %v1051_v9  ;;  %v1054_v14 = vmul.f32 %v1048_v53, %v1043_v10 }
 0x1dc   : > { %v1065_v13 = vadd.f32 %v1061_v11, %v517_v1  ;;  %v1064_v19 = vadd.f32 %v1058_v57, %v1054_v14 }
 0x1dd   : > { %v1000_v16 = vpop.f32.mrf.mxu2 }
 0x1de   : > { %v1069_v17 = vpack.c.bf16 %v1066_v12, %v1065_v13  ;;  %v1015_v18 = vadd.f32 %v1014_v15, %v1000_v16  ;;  %v1068_v61 = vadd.f32 %v1064_v19, %v520_v4 }
 0x1e0   : > { %1071 = vst [vmem:[%s363_s11] sm:$0xff] %v1069_v17  ;;  %v1053_v20 = vmul.f32 %v1047_v59, %v1015_v18 }
 0x1e2   : > { %v1063_v21 = vadd.f32 %v1057_v5, %v1053_v20 }
 0x1e4   : > { %v1067_v58 = vadd.f32 %v1063_v21, %v519_v2 }
 0x1e6   : > { %v1070_v1 = vpack.c.bf16 %v1068_v61, %v1067_v58 }
 0x1e8   : > { %1072 = vst [vmem:[%s363_s11 + $0x8] sm:$0xff] %v1070_v1 }
 0x1e9 PF: > { %s20_s13 = sadd.s32 1, %s1563_s13  }
 0x1ea   : > { %p17_p4 = scmp.ge.s32.totalorder %s20_s13, 4  }
 0x1ec   :  { %19 = sbr.rel (!%p17_p4) target bundleno = 1 (0x1), region = 90 }

// kernel: pointmlp_encoder_forward.12
= control target key start
LH: loop header
LB: loop body
LE: loop exit
PB: predicated region body
PF: predicated region fallthrough
CT: control target
= control target key end

     0   :  { %s1393_s2 = inlined_call_operand.vmem [shape: bf16[256,256], index: 2, kind: input, shape index: {}]   ;;  %s1394_s0 = inlined_call_operand.vmem [shape: bf16[16,256], index: 0, kind: input, shape index: {}]   ;;  %s1395_s1 = inlined_call_operand.vmem [shape: f32[1,256], index: 1, kind: input, shape index: {}]   ;;  %s1396_s5 = inlined_call_operand.vmem [shape: bf16[256,256], index: 5, kind: input, shape index: {}]   ;;  %s1397_s3 = inlined_call_operand.vmem [shape: f32[1,256], index: 3, kind: input, shape index: {}]   ;;  %s1398_s4 = inlined_call_operand.vmem [shape: f32[1,256], index: 4, kind: input, shape index: {}]   ;;  %s1399_s6 = inlined_call_operand.vmem [shape: f32[1,256], index: 6, kind: input, shape index: {}]   ;;  %s1400_s7 = inlined_call_operand.vmem [shape: f32[1,256], index: 7, kind: input, shape index: {}]   ;;  %s1401_s8 = inlined_call_operand.vmem [shape: bf16[16,256], index: 8, kind: output, shape index: {}]  }
   0x1   :  { %v659_v0 = vld [vmem:[%s1393_s2 + $0x70] sm:$0xf]  ;;  %v872_v1 = vld [vmem:[%s1393_s2 + $0x74] sm:$0xf0]  ;;  %v871_v5 = vld [vmem:[%s1393_s2 + $0x74] sm:$0xf] }
   0x2   :  { %v723_v2 = vld [vmem:[%s1393_s2 + $0xf0] sm:$0xf]  ;;  %v660_v3 = vor.u32 %v872_v1, %v659_v0  ;;  %v888_v4 = vld [vmem:[%s1393_s2 + $0xf4] sm:$0xf0]  ;;  %v661_v6 = vld [vmem:[%s1393_s2 + $0x78] sm:$0xf0] }
   0x3   :  { %v724_v7 = vor.u32 %v888_v4, %v723_v2  ;;  %v664_v8 = vor.u32 %v871_v5, %v661_v6  ;;  %v887_v9 = vld [vmem:[%s1393_s2 + $0xf4] sm:$0xf]  ;;  %v725_v10 = vld [vmem:[%s1393_s2 + $0xf8] sm:$0xf0]  ;;  %v651_v11 = vld [vmem:[%s1393_s2 + $0x60] sm:$0xf] }
   0x4   :  { %239 = vmatpush.bf16.msra.mxu0 %v660_v3  ;;  %v728_v12 = vor.u32 %v887_v9, %v725_v10  ;;  %v870_v13 = vld [vmem:[%s1393_s2 + $0x64] sm:$0xf0]  ;;  %v715_v14 = vld [vmem:[%s1393_s2 + $0xe0] sm:$0xf]  ;;  %v869_v18 = vld [vmem:[%s1393_s2 + $0x64] sm:$0xf] }
   0x5   :  { %v886_v15 = vld [vmem:[%s1393_s2 + $0xe4] sm:$0xf0]  ;;  %253 = vmatpush.bf16.msra.mxu1 %v724_v7  ;;  %267 = vmatpush.bf16.msra.mxu2 %v664_v8  ;;  %v652_v16 = vor.u32 %v870_v13, %v651_v11  ;;  %v653_v19 = vld [vmem:[%s1393_s2 + $0x68] sm:$0xf0]  ;;  %v885_v20 = vld [vmem:[%s1393_s2 + $0xe4] sm:$0xf] }
   0x6   :  { %v716_v17 = vor.u32 %v886_v15, %v715_v14  ;;  %281 = vmatpush.bf16.msra.mxu3 %v728_v12  ;;  %v656_v21 = vor.u32 %v869_v18, %v653_v19  ;;  %v717_v22 = vld [vmem:[%s1393_s2 + $0xe8] sm:$0xf0]  ;;  %v643_v23 = vld [vmem:[%s1393_s2 + $0x50] sm:$0xf]  ;;  %v868_v24 = vld [vmem:[%s1393_s2 + $0x54] sm:$0xf0] }
   0x7   :  { %v720_v25 = vor.u32 %v885_v20, %v717_v22  ;;  %v707_v26 = vld [vmem:[%s1393_s2 + $0xd0] sm:$0xf]  ;;  %v884_v27 = vld [vmem:[%s1393_s2 + $0xd4] sm:$0xf0]  ;;  %v867_v28 = vld [vmem:[%s1393_s2 + $0x54] sm:$0xf]  ;;  %v644_v29 = vor.u32 %v868_v24, %v643_v23 }
   0x8   :  { %240 = vmatpush.bf16.msra.mxu0 %v652_v16  ;;  %v645_v30 = vld [vmem:[%s1393_s2 + $0x58] sm:$0xf0]  ;;  %v883_v31 = vld [vmem:[%s1393_s2 + $0xd4] sm:$0xf]  ;;  %v708_v33 = vor.u32 %v884_v27, %v707_v26  ;;  %v635_v35 = vld [vmem:[%s1393_s2 + $0x40] sm:$0xf] }
   0x9   :  { %v709_v32 = vld [vmem:[%s1393_s2 + $0xd8] sm:$0xf0]  ;;  %254 = vmatpush.bf16.msra.mxu1 %v716_v17  ;;  %268 = vmatpush.bf16.msra.mxu2 %v656_v21  ;;  %v648_v34 = vor.u32 %v867_v28, %v645_v30  ;;  %v866_v36 = vld [vmem:[%s1393_s2 + $0x44] sm:$0xf0]  ;;  %v699_v37 = vld [vmem:[%s1393_s2 + $0xc0] sm:$0xf] }
   0xa   :  { %282 = vmatpush.bf16.msra.mxu3 %v720_v25  ;;  %v712_v38 = vor.u32 %v883_v31, %v709_v32  ;;  %v882_v39 = vld [vmem:[%s1393_s2 + $0xc4] sm:$0xf0]  ;;  %v865_v40 = vld [vmem:[%s1393_s2 + $0x44] sm:$0xf]  ;;  %v637_v41 = vld [vmem:[%s1393_s2 + $0x48] sm:$0xf0]  ;;  %v636_v44 = vor.u32 %v866_v36, %v635_v35 }
   0xb   :  { %v881_v42 = vld [vmem:[%s1393_s2 + $0xc4] sm:$0xf]  ;;  %v701_v43 = vld [vmem:[%s1393_s2 + $0xc8] sm:$0xf0]  ;;  %v700_v45 = vor.u32 %v882_v39, %v699_v37  ;;  %v640_v46 = vor.u32 %v865_v40, %v637_v41  ;;  %v627_v47 = vld [vmem:[%s1393_s2 + $0x30] sm:$0xf] }
   0xc   :  { %241 = vmatpush.bf16.msra.mxu0 %v644_v29  ;;  %v864_v48 = vld [vmem:[%s1393_s2 + $0x34] sm:$0xf0]  ;;  %v691_v49 = vld [vmem:[%s1393_s2 + $0xb0] sm:$0xf]  ;;  %v704_v50 = vor.u32 %v881_v42, %v701_v43  ;;  %v863_v52 = vld [vmem:[%s1393_s2 + $0x34] sm:$0xf] }
   0xd   :  { %255 = vmatpush.bf16.msra.mxu1 %v708_v33  ;;  %269 = vmatpush.bf16.msra.mxu2 %v648_v34  ;;  %v880_v51 = vld [vmem:[%s1393_s2 + $0xb4] sm:$0xf0]  ;;  %v629_v53 = vld [vmem:[%s1393_s2 + $0x38] sm:$0xf0]  ;;  %v879_v54 = vld [vmem:[%s1393_s2 + $0xb4] sm:$0xf]  ;;  %v628_v56 = vor.u32 %v864_v48, %v627_v47 }
   0xe   :  { %283 = vmatpush.bf16.msra.mxu3 %v712_v38  ;;  %v693_v55 = vld [vmem:[%s1393_s2 + $0xb8] sm:$0xf0]  ;;  %v692_v57 = vor.u32 %v880_v51, %v691_v49  ;;  %v632_v58 = vor.u32 %v863_v52, %v629_v53  ;;  %v619_v59 = vld [vmem:[%s1393_s2 + $0x20] sm:$0xf]  ;;  %v862_v60 = vld [vmem:[%s1393_s2 + $0x24] sm:$0xf0] }
   0xf   :  { %v683_v61 = vld [vmem:[%s1393_s2 + $0xa0] sm:$0xf]  ;;  %v696_v62 = vor.u32 %v879_v54, %v693_v55  ;;  %v878_v63 = vld [vmem:[%s1393_s2 + $0xa4] sm:$0xf0]  ;;  %v861_v0 = vld [vmem:[%s1393_s2 + $0x24] sm:$0xf]  ;;  %v620_v4 = vor.u32 %v862_v60, %v619_v59 }
  0x10   :  { %242 = vmatpush.bf16.msra.mxu0 %v636_v44  ;;  %v621_v1 = vld [vmem:[%s1393_s2 + $0x28] sm:$0xf0]  ;;  %v877_v2 = vld [vmem:[%s1393_s2 + $0xa4] sm:$0xf]  ;;  %v611_v5 = vld [vmem:[%s1393_s2 + $0x10] sm:$0xf]  ;;  %v684_v7 = vor.u32 %v878_v63, %v683_v61 }
  0x11   :  { %256 = vmatpush.bf16.msra.mxu1 %v700_v45  ;;  %270 = vmatpush.bf16.msra.mxu2 %v640_v46  ;;  %v685_v3 = vld [vmem:[%s1393_s2 + $0xa8] sm:$0xf0]  ;;  %v860_v6 = vld [vmem:[%s1393_s2 + $0x14] sm:$0xf0]  ;;  %v624_v8 = vor.u32 %v861_v0, %v621_v1  ;;  %v675_v9 = vld [vmem:[%s1393_s2 + $0x90] sm:$0xf] }
  0x12   :  { %284 = vmatpush.bf16.msra.mxu3 %v704_v50  ;;  %v876_v10 = vld [vmem:[%s1393_s2 + $0x94] sm:$0xf0]  ;;  %v859_v11 = vld [vmem:[%s1393_s2 + $0x14] sm:$0xf]  ;;  %v688_v12 = vor.u32 %v877_v2, %v685_v3  ;;  %v613_v13 = vld [vmem:[%s1393_s2 + $0x18] sm:$0xf0]  ;;  %v612_v16 = vor.u32 %v860_v6, %v611_v5 }
  0x13   :  { %v29_v14 = vld [vmem:[%s1394_s0] sm:$0xff]  ;;  %v30_v15 = vld [vmem:[%s1394_s0 + $0x8] sm:$0xff]  ;;  %v875_v17 = vld [vmem:[%s1393_s2 + $0x94] sm:$0xf]  ;;  %v676_v27 = vor.u32 %v876_v10, %v675_v9  ;;  %v616_v28 = vor.u32 %v859_v11, %v613_v13 }
  0x14   :  { %243 = vmatpush.bf16.msra.mxu0 %v628_v56  ;;  %v677_v18 = vld [vmem:[%s1393_s2 + $0x98] sm:$0xf0]  ;;  %v31_v19 = vunpack.c.l.bf16 %v29_v14  ;;  %v33_v20 = vunpack.c.l.bf16 %v30_v15  ;;  %v35_v21 = vld [vmem:[%s1395_s1] sm:$0x3]  ;;  %v32_v24 = vunpack.c.h.bf16 %v29_v14  ;;  %v34_v25 = vunpack.c.h.bf16 %v30_v15  ;;  %v858_v29 = vld [vmem:[%s1393_s2 + $0x4] sm:$0xf0] }
  0x15   :  { %257 = vmatpush.bf16.msra.mxu1 %v692_v57  ;;  %271 = vmatpush.bf16.msra.mxu2 %v632_v58  ;;  %v603_v22 = vld [vmem:[%s1393_s2] sm:$0xf]  ;;  %v37_v23 = vperm.slane %v35_v21, 0  ;;  %v38_v26 = vperm.slane %v35_v21, 1  ;;  %v874_v31 = vld [vmem:[%s1393_s2 + $0x84] sm:$0xf0]  ;;  %v680_v32 = vor.u32 %v875_v17, %v677_v18 }
  0x16   :  { %285 = vmatpush.bf16.msra.mxu3 %v696_v62  ;;  %v667_v30 = vld [vmem:[%s1393_s2 + $0x80] sm:$0xf]  ;;  %v857_v33 = vld [vmem:[%s1393_s2 + $0x4] sm:$0xf]  ;;  %v605_v34 = vld [vmem:[%s1393_s2 + $0x8] sm:$0xf0]  ;;  %v604_v41 = vor.u32 %v858_v29, %v603_v22 }
  0x17   :  { %v873_v35 = vld [vmem:[%s1393_s2 + $0x84] sm:$0xf]  ;;  %v669_v36 = vld [vmem:[%s1393_s2 + $0x88] sm:$0xf0]  ;;  %v1167_v37 = vmul.f32 %v37_v23, %v31_v19  ;;  %v1169_v38 = vmul.f32 %v37_v23, %v33_v20  ;;  %v787_v39 = vld [vmem:[%s1396_s5 + $0x70] sm:$0xf]  ;;  %v1177_v42 = vmul.f32 %v38_v26, %v32_v24  ;;  %v1179_v43 = vmul.f32 %v38_v26, %v34_v25 }
  0x18   :  { %244 = vmatpush.bf16.msra.mxu0 %v620_v4  ;;  %v904_v40 = vld [vmem:[%s1396_s5 + $0x74] sm:$0xf0]  ;;  %v903_v44 = vld [vmem:[%s1396_s5 + $0x74] sm:$0xf]  ;;  %v789_v45 = vld [vmem:[%s1396_s5 + $0x78] sm:$0xf0]  ;;  %v668_v46 = vor.u32 %v874_v31, %v667_v30  ;;  %v608_v47 = vor.u32 %v857_v33, %v605_v34  ;;  %v672_v48 = vor.u32 %v873_v35, %v669_v36 }
  0x19   :  { %258 = vmatpush.bf16.msra.mxu1 %v684_v7  ;;  %272 = vmatpush.bf16.msra.mxu2 %v624_v8  ;;  %v788_v49 = vor.u32 %v904_v40, %v787_v39  ;;  %v779_v50 = vld [vmem:[%s1396_s5 + $0x60] sm:$0xf]  ;;  %v851_v51 = vld [vmem:[%s1396_s5 + $0xf0] sm:$0xf]  ;;  %v920_v52 = vld [vmem:[%s1396_s5 + $0xf4] sm:$0xf0]  ;;  %v77_v53 = vpack.c.bf16 %v1169_v38, %v1167_v37  ;;  %v792_v54 = vor.u32 %v903_v44, %v789_v45 }
  0x1a   :  { %286 = vmatpush.bf16.msra.mxu3 %v688_v12  ;;  %v902_v55 = vld [vmem:[%s1396_s5 + $0x64] sm:$0xf0]  ;;  %v919_v56 = vld [vmem:[%s1396_s5 + $0xf4] sm:$0xf]  ;;  %v853_v57 = vld [vmem:[%s1396_s5 + $0xf8] sm:$0xf0]  ;;  %v78_v58 = vpack.c.bf16 %v1179_v43, %v1177_v42  ;;  %v852_v61 = vor.u32 %v920_v52, %v851_v51 }
  0x1b   :  { %v901_v59 = vld [vmem:[%s1396_s5 + $0x64] sm:$0xf]  ;;  %v781_v60 = vld [vmem:[%s1396_s5 + $0x68] sm:$0xf0]  ;;  %v780_v62 = vor.u32 %v902_v55, %v779_v50  ;;  %v856_v63 = vor.u32 %v919_v56, %v853_v57  ;;  %v771_v0 = vld [vmem:[%s1396_s5 + $0x50] sm:$0xf] }
  0x1c   :  { %245 = vmatpush.bf16.msra.mxu0 %v612_v16  ;;  %v843_v1 = vld [vmem:[%s1396_s5 + $0xe0] sm:$0xf]  ;;  %v918_v2 = vld [vmem:[%s1396_s5 + $0xe4] sm:$0xf0]  ;;  %v784_v3 = vor.u32 %v901_v59, %v781_v60  ;;  %v900_v4 = vld [vmem:[%s1396_s5 + $0x54] sm:$0xf0] }
  0x1d   :  { %259 = vmatpush.bf16.msra.mxu1 %v676_v27  ;;  %273 = vmatpush.bf16.msra.mxu2 %v616_v28  ;;  %v917_v5 = vld [vmem:[%s1396_s5 + $0xe4] sm:$0xf]  ;;  %v845_v6 = vld [vmem:[%s1396_s5 + $0xe8] sm:$0xf0]  ;;  %v899_v7 = vld [vmem:[%s1396_s5 + $0x54] sm:$0xf]  ;;  %v844_v9 = vor.u32 %v918_v2, %v843_v1  ;;  %v772_v10 = vor.u32 %v900_v4, %v771_v0 }
  0x1e   :  { %287 = vmatpush.bf16.msra.mxu3 %v680_v32  ;;  %v773_v8 = vld [vmem:[%s1396_s5 + $0x58] sm:$0xf0]  ;;  %v848_v11 = vor.u32 %v917_v5, %v845_v6  ;;  %v763_v13 = vld [vmem:[%s1396_s5 + $0x40] sm:$0xf]  ;;  %v898_v14 = vld [vmem:[%s1396_s5 + $0x44] sm:$0xf0] }
  0x1f   :  { %v776_v12 = vor.u32 %v899_v7, %v773_v8  ;;  %v897_v15 = vld [vmem:[%s1396_s5 + $0x44] sm:$0xf]  ;;  %v764_v16 = vor.u32 %v898_v14, %v763_v13  ;;  %v765_v17 = vld [vmem:[%s1396_s5 + $0x48] sm:$0xf0]  ;;  %v835_v19 = vld [vmem:[%s1396_s5 + $0xd0] sm:$0xf] }
  0x20   :  { %246 = vmatpush.bf16.msra.mxu0 %v604_v41  ;;  %v768_v18 = vor.u32 %v897_v15, %v765_v17  ;;  %v916_v20 = vld [vmem:[%s1396_s5 + $0xd4] sm:$0xf0]  ;;  %v915_v21 = vld [vmem:[%s1396_s5 + $0xd4] sm:$0xf]  ;;  %v837_v23 = vld [vmem:[%s1396_s5 + $0xd8] sm:$0xf0] }
  0x21   :  { %260 = vmatpush.bf16.msra.mxu1 %v668_v46  ;;  %274 = vmatpush.bf16.msra.mxu2 %v608_v47  ;;  %v836_v22 = vor.u32 %v916_v20, %v835_v19  ;;  %v840_v24 = vor.u32 %v915_v21, %v837_v23  ;;  %v755_v25 = vld [vmem:[%s1396_s5 + $0x30] sm:$0xf]  ;;  %v896_v26 = vld [vmem:[%s1396_s5 + $0x34] sm:$0xf0]  ;;  %v895_v28 = vld [vmem:[%s1396_s5 + $0x34] sm:$0xf] }
  0x22   :  { %288 = vmatpush.bf16.msra.mxu3 %v672_v48  ;;  %v756_v27 = vor.u32 %v896_v26, %v755_v25  ;;  %v757_v29 = vld [vmem:[%s1396_s5 + $0x38] sm:$0xf0]  ;;  %v827_v31 = vld [vmem:[%s1396_s5 + $0xc0] sm:$0xf]  ;;  %v914_v32 = vld [vmem:[%s1396_s5 + $0xc4] sm:$0xf0] }
  0x23   :  { %247 = vmatmul.bf16.vlgmr.msra.gmra.mxu0 %v77_v53  ;;  %v760_v30 = vor.u32 %v895_v28, %v757_v29  ;;  %v828_v33 = vor.u32 %v914_v32, %v827_v31  ;;  %v913_v34 = vld [vmem:[%s1396_s5 + $0xc4] sm:$0xf]  ;;  %v829_v35 = vld [vmem:[%s1396_s5 + $0xc8] sm:$0xf0]  ;;  %v747_v39 = vld [vmem:[%s1396_s5 + $0x20] sm:$0xf] }
  0x24   :  { %513 = vmatpush.bf16.msrb.mxu0 %v788_v49  ;;  %261 = vmatmul.bf16.vlgmr.msra.gmra.mxu1 %v78_v58  ;;  %v832_v36 = vor.u32 %v913_v34, %v829_v35  ;;  %v894_v40 = vld [vmem:[%s1396_s5 + $0x24] sm:$0xf0]  ;;  %v893_v41 = vld [vmem:[%s1396_s5 + $0x24] sm:$0xf]  ;;  %v749_v45 = vld [vmem:[%s1396_s5 + $0x28] sm:$0xf0] }
  0x25   :  { %541 = vmatpush.bf16.msrb.mxu2 %v792_v54  ;;  %289 = vmatmul.bf16.vlgmr.msra.gmra.mxu3 %v78_v58  ;;  %v748_v44 = vor.u32 %v894_v40, %v747_v39  ;;  %v752_v46 = vor.u32 %v893_v41, %v749_v45  ;;  %v819_v47 = vld [vmem:[%s1396_s5 + $0xb0] sm:$0xf]  ;;  %v912_v48 = vld [vmem:[%s1396_s5 + $0xb4] sm:$0xf0]  ;;  %v911_v50 = vld [vmem:[%s1396_s5 + $0xb4] sm:$0xf] }
  0x26   :  { %275 = vmatmul.bf16.vlgmr.msra.gmra.mxu2 %v77_v53  ;;  %527 = vmatpush.bf16.msrb.mxu1 %v852_v61  ;;  %v820_v49 = vor.u32 %v912_v48, %v819_v47  ;;  %v821_v51 = vld [vmem:[%s1396_s5 + $0xb8] sm:$0xf0]  ;;  %v739_v53 = vld [vmem:[%s1396_s5 + $0x10] sm:$0xf]  ;;  %v892_v54 = vld [vmem:[%s1396_s5 + $0x14] sm:$0xf0] }
  0x27   :  { %555 = vmatpush.bf16.msrb.mxu3 %v856_v63  ;;  %v824_v52 = vor.u32 %v911_v50, %v821_v51  ;;  %v740_v55 = vor.u32 %v892_v54, %v739_v53  ;;  %v891_v56 = vld [vmem:[%s1396_s5 + $0x14] sm:$0xf]  ;;  %v741_v57 = vld [vmem:[%s1396_s5 + $0x18] sm:$0xf0]  ;;  %v811_v59 = vld [vmem:[%s1396_s5 + $0xa0] sm:$0xf] }
  0x28   :  { %514 = vmatpush.bf16.msrb.mxu0 %v780_v62  ;;  %v744_v58 = vor.u32 %v891_v56, %v741_v57  ;;  %v910_v60 = vld [vmem:[%s1396_s5 + $0xa4] sm:$0xf0]  ;;  %v909_v61 = vld [vmem:[%s1396_s5 + $0xa4] sm:$0xf]  ;;  %v813_v63 = vld [vmem:[%s1396_s5 + $0xa8] sm:$0xf0] }
  0x29   :  { %542 = vmatpush.bf16.msrb.mxu2 %v784_v3  ;;  %v812_v62 = vor.u32 %v910_v60, %v811_v59  ;;  %v816_v0 = vor.u32 %v909_v61, %v813_v63  ;;  %v731_v1 = vld [vmem:[%s1396_s5] sm:$0xf]  ;;  %v890_v2 = vld [vmem:[%s1396_s5 + $0x4] sm:$0xf0]  ;;  %v889_v3 = vld [vmem:[%s1396_s5 + $0x4] sm:$0xf] }
  0x2a   :  { %528 = vmatpush.bf16.msrb.mxu1 %v844_v9  ;;  %v732_v4 = vor.u32 %v890_v2, %v731_v1  ;;  %v733_v5 = vld [vmem:[%s1396_s5 + $0x8] sm:$0xf0]  ;;  %v803_v7 = vld [vmem:[%s1396_s5 + $0x90] sm:$0xf]  ;;  %v908_v8 = vld [vmem:[%s1396_s5 + $0x94] sm:$0xf0] }
  0x2b   :  { %556 = vmatpush.bf16.msrb.mxu3 %v848_v11  ;;  %v736_v6 = vor.u32 %v889_v3, %v733_v5  ;;  %v907_v9 = vld [vmem:[%s1396_s5 + $0x94] sm:$0xf]  ;;  %v805_v11 = vld [vmem:[%s1396_s5 + $0x98] sm:$0xf0]  ;;  %v795_v13 = vld [vmem:[%s1396_s5 + $0x80] sm:$0xf] }
  0x2c   :  { %515 = vmatpush.bf16.msrb.mxu0 %v772_v10  ;;  %v804_v10 = vor.u32 %v908_v8, %v803_v7  ;;  %v906_v14 = vld [vmem:[%s1396_s5 + $0x84] sm:$0xf0]  ;;  %v905_v15 = vld [vmem:[%s1396_s5 + $0x84] sm:$0xf]  ;;  %v797_v17 = vld [vmem:[%s1396_s5 + $0x88] sm:$0xf0] }
  0x2d   :  { %543 = vmatpush.bf16.msrb.mxu2 %v776_v12  ;;  %v808_v12 = vor.u32 %v907_v9, %v805_v11  ;;  %v295_v21 = vld [vmem:[%s1397_s3] sm:$0x3] }
  0x2e   :  { %529 = vmatpush.bf16.msrb.mxu1 %v836_v22  ;;  %v297_v23 = vperm.slane %v295_v21, 0  ;;  %v569_v56 = vld [vmem:[%s1399_s6] sm:$0x3] }
  0x2f   :  { %557 = vmatpush.bf16.msrb.mxu3 %v840_v24  ;;  %v305_v24 = vld [vmem:[%s1398_s4] sm:$0x3]  ;;  %v571_v59 = vperm.slane %v569_v56, 0 }
  0x30   :  { %516 = vmatpush.bf16.msrb.mxu0 %v764_v16  ;;  %v796_v16 = vor.u32 %v906_v14, %v795_v13  ;;  %v308_v40 = vperm.slane %v305_v24, 1  ;;  %v579_v60 = vld [vmem:[%s1400_s7] sm:$0x3] }
  0x31   :  { %544 = vmatpush.bf16.msrb.mxu2 %v768_v18  ;;  %v800_v18 = vor.u32 %v905_v15, %v797_v17  ;;  %v581_v63 = vperm.slane %v579_v60, 0  ;;  %v582_v3 = vperm.slane %v579_v60, 1 }
  0x32   :  { %530 = vmatpush.bf16.msrb.mxu1 %v828_v33  ;;  %v298_v33 = vperm.slane %v295_v21, 1 }
  0x33   :  { %558 = vmatpush.bf16.msrb.mxu3 %v832_v36 }
  0x34   :  { %517 = vmatpush.bf16.msrb.mxu0 %v756_v27  ;;  %v307_v27 = vperm.slane %v305_v24, 0 }
  0x35   :  { %545 = vmatpush.bf16.msrb.mxu2 %v760_v30 }
  0x36   :  { %531 = vmatpush.bf16.msrb.mxu1 %v820_v49 }
  0x37   :  { %559 = vmatpush.bf16.msrb.mxu3 %v824_v52 }
  0x38   :  { %518 = vmatpush.bf16.msrb.mxu0 %v748_v44 }
  0x39   :  { %546 = vmatpush.bf16.msrb.mxu2 %v752_v46 }
  0x3a   :  { %532 = vmatpush.bf16.msrb.mxu1 %v812_v62 }
  0x3b   :  { %560 = vmatpush.bf16.msrb.mxu3 %v816_v0  ;;  %v572_v0 = vperm.slane %v569_v56, 1 }
  0x3c   :  { %519 = vmatpush.bf16.msrb.mxu0 %v740_v55 }
  0x3d   :  { %547 = vmatpush.bf16.msrb.mxu2 %v744_v58 }
  0x3e   :  { %533 = vmatpush.bf16.msrb.mxu1 %v804_v10 }
  0x3f   :  { %561 = vmatpush.bf16.msrb.mxu3 %v808_v12 }
  0x40   :  { %520 = vmatpush.bf16.msrb.mxu0 %v732_v4 }
  0x41   :  { %548 = vmatpush.bf16.msrb.mxu2 %v736_v6 }
  0x42   :  { %534 = vmatpush.bf16.msrb.mxu1 %v796_v16 }
  0x43   :  { %562 = vmatpush.bf16.msrb.mxu3 %v800_v18 }
  0xa0   :  { %v248_v19 = vpop.f32.mrf.mxu0 }
  0xa1   :  { %v262_v20 = vpop.f32.mrf.mxu1 }
  0xa2   :  { %v263_v22 = vadd.f32 %v262_v20, %v248_v19 }
  0xa4   :  { %v301_v26 = vmul.f32 %v297_v23, %v263_v22 }
  0xa6   :  { %v311_v34 = vadd.f32 %v307_v27, %v301_v26 }
  0xa8   :  { %v290_v28 = vpop.f32.mrf.mxu3  ;;  %v250_v29 = vpop.f32.mrf.mxu0  ;;  %v315_v44 = vmax.f32 %v311_v34, 0.0 }
  0xa9   :  { %v276_v25 = vpop.f32.mrf.mxu2  ;;  %v264_v30 = vpop.f32.mrf.mxu1 }
  0xaa   :  { %v265_v31 = vadd.f32 %v264_v30, %v250_v29  ;;  %v291_v32 = vadd.f32 %v290_v28, %v276_v25 }
  0xac   :  { %v303_v35 = vmul.f32 %v297_v23, %v265_v31  ;;  %v302_v39 = vmul.f32 %v298_v33, %v291_v32 }
  0xae   :  { %v313_v36 = vadd.f32 %v307_v27, %v303_v35  ;;  %v312_v49 = vadd.f32 %v308_v40, %v302_v39 }
  0xb0   :  { %v317_v45 = vmax.f32 %v313_v36, 0.0  ;;  %v292_v46 = vpop.f32.mrf.mxu3  ;;  %v316_v52 = vmax.f32 %v312_v49, 0.0 }
  0xb1   :  { %v278_v41 = vpop.f32.mrf.mxu2 }
  0xb2   :  { %v293_v47 = vadd.f32 %v292_v46, %v278_v41  ;;  %v351_v48 = vpack.c.bf16 %v317_v45, %v315_v44 }
  0xb4   :  { %v304_v50 = vmul.f32 %v298_v33, %v293_v47  ;;  %521 = vmatmul.bf16.vlgmr.msrb.gmra.mxu0 %v351_v48  ;;  %549 = vmatmul.bf16.vlgmr.msrb.gmra.mxu2 %v351_v48 }
  0xb6   :  { %v314_v51 = vadd.f32 %v308_v40, %v304_v50 }
  0xb8   :  { %v318_v53 = vmax.f32 %v314_v51, 0.0 }
  0xba   :  { %v352_v54 = vpack.c.bf16 %v318_v53, %v316_v52 }
  0xbc   :  { %535 = vmatmul.bf16.vlgmr.msrb.gmra.mxu1 %v352_v54  ;;  %563 = vmatmul.bf16.vlgmr.msrb.gmra.mxu3 %v352_v54 }
 0x131   :  { %v522_v55 = vpop.f32.mrf.mxu0 }
 0x137   :  { %v550_v61 = vpop.f32.mrf.mxu2 }
 0x139   :  { %v536_v57 = vpop.f32.mrf.mxu1  ;;  %v524_v4 = vpop.f32.mrf.mxu0 }
 0x13a   :  { %v537_v58 = vadd.f32 %v536_v57, %v522_v55 }
 0x13c   :  { %v575_v62 = vmul.f32 %v571_v59, %v537_v58 }
 0x13e   :  { %v585_v6 = vadd.f32 %v581_v63, %v575_v62 }
 0x13f   :  { %v564_v1 = vpop.f32.mrf.mxu3  ;;  %v552_v13 = vpop.f32.mrf.mxu2 }
 0x140   :  { %v565_v2 = vadd.f32 %v564_v1, %v550_v61  ;;  %v589_v10 = vadd.f32 %v585_v6, %v1167_v37 }
 0x141   :  { %v538_v5 = vpop.f32.mrf.mxu1 }
 0x142   :  { %v576_v7 = vmul.f32 %v572_v0, %v565_v2  ;;  %v539_v8 = vadd.f32 %v538_v5, %v524_v4 }
 0x144   :  { %v586_v9 = vadd.f32 %v582_v3, %v576_v7  ;;  %v577_v12 = vmul.f32 %v571_v59, %v539_v8 }
 0x146   :  { %v590_v11 = vadd.f32 %v586_v9, %v1177_v42  ;;  %v587_v17 = vadd.f32 %v581_v63, %v577_v12 }
 0x147   :  { %v566_v14 = vpop.f32.mrf.mxu3 }
 0x148   :  { %v593_v15 = vpack.c.bf16 %v590_v11, %v589_v10  ;;  %v567_v16 = vadd.f32 %v566_v14, %v552_v13  ;;  %v591_v20 = vadd.f32 %v587_v17, %v1169_v38 }
 0x14a   :  { %595 = vst [vmem:[%s1401_s8] sm:$0xff] %v593_v15  ;;  %v578_v18 = vmul.f32 %v572_v0, %v567_v16 }
 0x14c   :  { %v588_v19 = vadd.f32 %v582_v3, %v578_v18 }
 0x14e   :  { %v592_v21 = vadd.f32 %v588_v19, %v1179_v43 }
 0x150   :  { %v594_v22 = vpack.c.bf16 %v592_v21, %v591_v20 }
 0x152   :  { %596 = vst [vmem:[%s1401_s8 + $0x8] sm:$0xff] %v594_v22 }

// kernel: pointmlp_encoder_forward.13
= control target key start
LH: loop header
LB: loop body
LE: loop exit
PB: predicated region body
PF: predicated region fallthrough
CT: control target
= control target key end

     0   :  { %s587_s0 = inlined_call_operand.vmem [shape: bf16[2,256], index: 0, kind: input, shape index: {}]   ;;  %s588_s1 = inlined_call_operand.vmem [shape: bf16[256,128], index: 1, kind: input, shape index: {}]   ;;  %s589_s2 = inlined_call_operand.vmem [shape: f32[1,128], index: 2, kind: input, shape index: {}]   ;;  %s590_s3 = inlined_call_operand.vmem [shape: f32[1,128], index: 3, kind: input, shape index: {}]   ;;  %s591_s4 = inlined_call_operand.vmem [shape: bf16[128,128], index: 4, kind: input, shape index: {}]   ;;  %s592_s5 = inlined_call_operand.vmem [shape: f32[1,128], index: 5, kind: input, shape index: {}]   ;;  %s593_s6 = inlined_call_operand.vmem [shape: f32[1,128], index: 6, kind: input, shape index: {}]   ;;  %s594_s7 = inlined_call_operand.hbm [shape: f32[2,128], index: 7, kind: output, shape index: {}]  }
   0x1   :  { %v408_v0 = vld [vmem:[%s588_s1 + $0x38] sm:$0xff]  ;;  %v407_v2 = vld [vmem:[%s588_s1 + $0x30] sm:$0xff]  ;;  %v27_v4 = vld [vmem:[%s587_s0] sm:$0x3] }
   0x2   :  { %v416_v1 = vld [vmem:[%s588_s1 + $0x78] sm:$0xff]  ;;  %162 = vmatpush.bf16.msra.mxu0 %v408_v0  ;;  %v415_v3 = vld [vmem:[%s588_s1 + $0x70] sm:$0xff]  ;;  %v406_v6 = vld [vmem:[%s588_s1 + $0x28] sm:$0xff]  ;;  %61 = vst [vmem:[#allocation1] ss:$9 sm:$0xff] %v27_v4 }
   0x3   :  { %175 = vmatpush.bf16.msra.mxu1 %v416_v1  ;;  %v424_v5 = vld [vmem:[%s591_s4 + $0x38] sm:$0xff]  ;;  %v414_v7 = vld [vmem:[%s588_s1 + $0x68] sm:$0xff]  ;;  %v423_v8 = vld [vmem:[%s591_s4 + $0x30] sm:$0xff] }
   0x4   :  { %264 = vmatpush.bf16.msra.mxu2 %v424_v5 }
   0x6   :  { %163 = vmatpush.bf16.msra.mxu0 %v407_v2 }
   0x7   :  { %176 = vmatpush.bf16.msra.mxu1 %v415_v3 }
   0x8   :  { %12 = vsyncpa [#allocation3], 0  ;;  %v405_v9 = vld [vmem:[%s588_s1 + $0x20] sm:$0xff]  ;;  %265 = vmatpush.bf16.msra.mxu2 %v423_v8  ;;  %v422_v11 = vld [vmem:[%s591_s4 + $0x28] sm:$0xff]  ;;  %s456_s8 = smov [#allocation2]   ;;  %s296_s11 = sshll.u32 %s594_s7, 4  ;;  %s297_s11 = int_to_ptr.hbm [resolvable:$true] %s296_s11 }
   0x9   :  { %v413_v10 = vld [vmem:[%s588_s1 + $0x60] sm:$0xff]  ;;  %v404_v12 = vld [vmem:[%s588_s1 + $0x18] sm:$0xff]  ;;  %v403_v15 = vld [vmem:[%s588_s1 + $0x10] sm:$0xff]  ;;  %s294_s9 = sshll.u32 %s456_s8, 4  ;;  %s295_s9 = int_to_ptr.vmem [resolvable:$true] %s294_s9 }
   0xa   :  { %164 = vmatpush.bf16.msra.mxu0 %v406_v6  ;;  %v412_v13 = vld [vmem:[%s588_s1 + $0x58] sm:$0xff]  ;;  %v421_v14 = vld [vmem:[%s591_s4 + $0x20] sm:$0xff]  ;;  %v411_v16 = vld [vmem:[%s588_s1 + $0x50] sm:$0xff] }
   0xb   :  { %177 = vmatpush.bf16.msra.mxu1 %v414_v7  ;;  %v420_v17 = vld [vmem:[%s591_s4 + $0x18] sm:$0xff]  ;;  %v402_v18 = vld [vmem:[%s588_s1 + $0x8] sm:$0xff]  ;;  %v401_v20 = vld [vmem:[%s588_s1] sm:$0xff] }
   0xc   :  { %266 = vmatpush.bf16.msra.mxu2 %v422_v11  ;;  %v410_v19 = vld [vmem:[%s588_s1 + $0x48] sm:$0xff]  ;;  %v409_v21 = vld [vmem:[%s588_s1 + $0x40] sm:$0xff]  ;;  %v419_v24 = vld [vmem:[%s591_s4 + $0x10] sm:$0xff] }
   0xd   :  { %v62_v22 = vld [vmem:[#allocation1] sm:$0xff]  ;;  %v63_v23 = vld [vmem:[#allocation1 + $0x9] sm:$0xff] }
   0xe   :  { %165 = vmatpush.bf16.msra.mxu0 %v405_v9  ;;  %v418_v25 = vld [vmem:[%s591_s4 + $0x8] sm:$0xff]  ;;  %v417_v26 = vld [vmem:[%s591_s4] sm:$0xff] }
   0xf   :  { %178 = vmatpush.bf16.msra.mxu1 %v413_v10  ;;  %v426_v27 = vld [vmem:[%s589_s2] ss:$0 sm:$0xff] }
  0x10   :  { %267 = vmatpush.bf16.msra.mxu2 %v421_v14  ;;  %v427_v31 = vld [vmem:[%s590_s3] ss:$0 sm:$0xff] }
  0x11   :  { %v428_v38 = vld [vmem:[%s592_s5] ss:$0 sm:$0xff] }
  0x12   :  { %166 = vmatpush.bf16.msra.mxu0 %v404_v12  ;;  %v429_v39 = vld [vmem:[%s593_s6] ss:$0 sm:$0xff] }
  0x13   :  { %179 = vmatpush.bf16.msra.mxu1 %v412_v13 }
  0x14   :  { %268 = vmatpush.bf16.msra.mxu2 %v420_v17 }
  0x16   :  { %167 = vmatpush.bf16.msra.mxu0 %v403_v15 }
  0x17   :  { %180 = vmatpush.bf16.msra.mxu1 %v411_v16 }
  0x18   :  { %269 = vmatpush.bf16.msra.mxu2 %v419_v24 }
  0x1a   :  { %168 = vmatpush.bf16.msra.mxu0 %v402_v18 }
  0x1b   :  { %181 = vmatpush.bf16.msra.mxu1 %v410_v19 }
  0x1c   :  { %270 = vmatpush.bf16.msra.mxu2 %v418_v25 }
  0x1e   :  { %169 = vmatpush.bf16.msra.mxu0 %v401_v20 }
  0x1f   :  { %182 = vmatpush.bf16.msra.mxu1 %v409_v21 }
  0x20   :  { %271 = vmatpush.bf16.msra.mxu2 %v417_v26 }
  0x21   :  { %170 = vmatmul.bf16.vlgmr.msra.gmra.mxu0 %v62_v22 }
  0x22   :  { %183 = vmatmul.bf16.vlgmr.msra.gmra.mxu1 %v63_v23 }
  0x9e   :  { %v171_v28 = vpop.f32.mrf.mxu0 }
  0x9f   :  { %v184_v29 = vpop.f32.mrf.mxu1 }
  0xa0   :  { %v185_v30 = vadd.f32 %v184_v29, %v171_v28 }
  0xa2   :  { %v192_v32 = vmul.f32 %v426_v27, %v185_v30 }
  0xa4   :  { %v197_v33 = vadd.f32 %v427_v31, %v192_v32 }
  0xa6   :  { %v198_v34 = vmax.f32 %v197_v33, 0.0  ;;  %v173_v35 = vpop.f32.mrf.mxu0 }
  0xa7   :  { %v186_v36 = vpop.f32.mrf.mxu1 }
  0xa8   :  { %v215_v37 = vpack.c.bf16 %v198_v34, %v198_v34 }
  0xaa   :  { %272 = vmatmul.bf16.vlgmr.msra.gmra.mxu2 %v215_v37 }
 0x12d   :  { %v273_v40 = vpop.f32.mrf.mxu2 }
 0x12e   :  { %v281_v41 = vmul.f32 %v428_v38, %v273_v40 }
 0x130   :  { %v286_v42 = vadd.f32 %v429_v39, %v281_v41 }
 0x132   :  { %v287_v43 = vmax.f32 %v286_v42, 0.0 }
 0x134   :  { %288 = vst [vmem:[#allocation2] sm:$0x3] %v287_v43 }
 0x135   :  { %v275_v44 = vpop.f32.mrf.mxu2  ;;  %299 = dma.vmem_to_hbm [thread:$0]  %s295_s9, 32, %s297_s11, [#allocation3]  }
 0x136   :  { %454 = dma.done.wait [#allocation3], 32  }
 0x137   :  { %455 = vsyncadd [#allocation3], 4294967264 }
 0x138   :  { %304 = vsyncpa [#allocation3], 1 }

</bundles_post_ra>
